<compile_context>
chip_gen: v5e
topology: v5e:2x2
jax: 0.10.0
libtpu: 0.0.40
codegen_flags: <defaults>
</compile_context>

<pallas_src>
import jax
import jax.numpy as jnp
from jax.experimental import pallas as pl
from jax.experimental.pallas import tpu as pltpu

FEATURE_D = 512
IN_D = 400


def _round_up(n, m):
    return ((n + m - 1) // m) * m


def tnetwork_kernel(x_ref, y_ref,
                    w1_ref, b1_ref,
                    w2_ref, b2_ref,
                    wf_ref, bf_ref,
                    wm_ref, bm_ref,
                    o_ref):
    # Inputs arrive in native f32; cast to bf16 only at the MXU boundary.
    x = x_ref[...].astype(jnp.bfloat16)   # (TB, 400)
    y = y_ref[...].astype(jnp.bfloat16)   # (TB, 512)

    # out1 = relu(x @ W1 + b1)
    out1 = jnp.dot(x, w1_ref[...], preferred_element_type=jnp.float32) + b1_ref[...]
    out1 = jnp.maximum(out1, 0.0)

    # out1 = sigmoid(out1 @ W2 + b2)
    z = jnp.dot(out1.astype(jnp.bfloat16), w2_ref[...],
                preferred_element_type=jnp.float32) + b2_ref[...]
    # TODO(synk): on v6e/v7x the exp+rcp could run in bf16 for ~2x EUP throughput;
    # kept f32 so the same kernel is safe on v5e (no bf16 EUP).
    out1 = pl.reciprocal(1.0 + jnp.exp(-z), approx=True)   # sigmoid: EUP exp + vrcp

    # out2 = relu(y @ Wf + bf)
    out2 = jnp.dot(y, wf_ref[...], preferred_element_type=jnp.float32) + bf_ref[...]
    out2 = jnp.maximum(out2, 0.0)

    # out = (out1 + 1) * out2   (relu omitted: out1 in (0,1) and out2 >= 0)
    out = (out1 + 1.0) * out2

    # out = relu(out @ Wm + bm)
    out = jnp.dot(out.astype(jnp.bfloat16), wm_ref[...],
                  preferred_element_type=jnp.float32) + bm_ref[...]
    o_ref[...] = jnp.maximum(out, 0.0).astype(o_ref.dtype)


def prepare_params(params):
    """One-time conversion: MXU weights -> bf16, biases -> f32 (1, D).

    Call this ONCE (e.g. after init / load); do NOT redo it per forward call —
    per-call weight cast/pad was the dominant small-batch cost.
    """
    return dict(
        w1=params["w1"].astype(jnp.bfloat16),   # (400, 512), K kept at 400
        w2=params["w2"].astype(jnp.bfloat16),
        wf=params["wf"].astype(jnp.bfloat16),
        wm=params["wm"].astype(jnp.bfloat16),
        b1=params["b1"].astype(jnp.float32).reshape(1, FEATURE_D),
        b2=params["b2"].astype(jnp.float32).reshape(1, FEATURE_D),
        bf=params["bf"].astype(jnp.float32).reshape(1, FEATURE_D),
        bm=params["bm"].astype(jnp.float32).reshape(1, FEATURE_D),
    )


def tnetwork_forward(x, y, prepared, *, block_b=512, out_dtype=jnp.float32):
    """x: (B, 400), y: (B, 512); `prepared` = prepare_params(...) output.

    out_dtype=jnp.bfloat16 halves output writeback if the consumer tolerates it.
    """
    B = x.shape[0]
    assert x.shape == (B, IN_D) and y.shape == (B, FEATURE_D)

    # Batch tile: multiple of 8 sublanes; when B > 8 guarantee >= 2 grid steps so
    # the "parallel" batch axis shards across both v7x TensorCores.
    if B > 8:
        tb = min(block_b, _round_up(-(-B // 2), 8))
    else:
        tb = _round_up(max(B, 1), 8)
    grid = (pl.cdiv(B, tb),)   # partial final block handled by Pallas masking

    p = prepared
    stream = lambda d: pl.BlockSpec((tb, d), lambda i: (i, 0))   # streamed per tile
    pinned = lambda a: pl.BlockSpec(a.shape, lambda i: (0, 0))   # VMEM-resident
    # TODO(synk): pipeline_mode=pl.Buffered(1) on the pinned weight specs would
    # drop their redundant second buffer (~2 MiB) if VMEM gets tight on v7x.

    out = pl.pallas_call(
        tnetwork_kernel,
        out_shape=jax.ShapeDtypeStruct((B, FEATURE_D), out_dtype),
        grid_spec=pl.GridSpec(
            grid=grid,
            in_specs=[stream(IN_D), stream(FEATURE_D),
                      pinned(p["w1"]), pinned(p["b1"]),
                      pinned(p["w2"]), pinned(p["b2"]),
                      pinned(p["wf"]), pinned(p["bf"]),
                      pinned(p["wm"]), pinned(p["bm"])],
            out_specs=stream(FEATURE_D),
        ),
        compiler_params=pltpu.CompilerParams(
            dimension_semantics=("parallel",),   # shard batch tiles across TCs (v7x)
            vmem_limit_bytes=32 << 20,           # ~2 MiB weights + act tiles, fits v7x
        ),
    )(x, y,
      p["w1"], p["b1"], p["w2"], p["b2"],
      p["wf"], p["bf"], p["wm"], p["bm"])

    # TODO(synk): tiny-batch (B<=64) calls are weight-DMA + launch bound; a P10
    # cross-pallas_call weight prefetch / layer fusion is the only lever there.
    return out


def init_params(key):
    """Deterministic synthetic init matching nn.Linear shapes (weights stored transposed)."""
    ks = jax.random.split(key, 8)

    def linear(kw, kb, fan_in, fan_out):
        bound = 1.0 / jnp.sqrt(fan_in)
        w = jax.random.uniform(kw, (fan_in, fan_out), jnp.float32, -bound, bound)
        b = jax.random.uniform(kb, (1, fan_out), jnp.float32, -bound, bound)
        return w, b

    w1, b1 = linear(ks[0], ks[1], IN_D, FEATURE_D)       # word_feature1: 400 -> 512
    w2, b2 = linear(ks[2], ks[3], FEATURE_D, FEATURE_D)  # word_feature2
    wf, bf = linear(ks[4], ks[5], FEATURE_D, FEATURE_D)  # features
    wm, bm = linear(ks[6], ks[7], FEATURE_D, FEATURE_D)  # map
    return dict(w1=w1, b1=b1, w2=w2, b2=b2, wf=wf, bf=bf, wm=wm, bm=bm)


def reference_forward(x, y, p):
    out1 = jax.nn.relu(x @ p["w1"] + p["b1"])
    out1 = jax.nn.sigmoid(out1 @ p["w2"] + p["b2"])
    out2 = jax.nn.relu(y @ p["wf"] + p["bf"])
    out = jax.nn.relu((out1 + 1.0) * out2)
    out = jax.nn.relu(out @ p["wm"] + p["bm"])
    return out


if __name__ == "__main__":
    key = jax.random.PRNGKey(0)
    kp, kx, ky = jax.random.split(key, 3)

    params = init_params(kp)
    prepared = prepare_params(params)   # one-time weight cast (hoisted out of forward)

    B = 8  # small batch; kernel handles any B (partial last tile masked by Pallas)
    x = jax.random.normal(kx, (B, IN_D), jnp.float32)
    y = jax.random.normal(ky, (B, FEATURE_D), jnp.float32)

    out = tnetwork_forward(x, y, prepared)
    out = jax.block_until_ready(out)

    ref = reference_forward(x, y, params)
    assert out.shape == (B, FEATURE_D)
    # bf16 MXU operands + approx reciprocal -> loosened tolerance vs f32 reference.
    assert jnp.allclose(out, ref, atol=2e-2, rtol=2e-2), "mismatch vs JAX reference"

    print("KERNEL_OK")
</pallas_src>

<mosaic_0001>
module attributes {stable_mosaic.version = 11 : i64} {
  func.func @tnetwork_kernel(%arg0: i32, %arg1: memref<8x400xf32, #tpu.memory_space<vmem>>, %arg2: memref<8x512xf32, #tpu.memory_space<vmem>>, %arg3: memref<400x512xbf16, #tpu.memory_space<vmem>>, %arg4: memref<1x512xf32, #tpu.memory_space<vmem>>, %arg5: memref<512x512xbf16, #tpu.memory_space<vmem>>, %arg6: memref<1x512xf32, #tpu.memory_space<vmem>>, %arg7: memref<512x512xbf16, #tpu.memory_space<vmem>>, %arg8: memref<1x512xf32, #tpu.memory_space<vmem>>, %arg9: memref<512x512xbf16, #tpu.memory_space<vmem>>, %arg10: memref<1x512xf32, #tpu.memory_space<vmem>>, %arg11: memref<8x512xf32, #tpu.memory_space<vmem>>) attributes {dimension_semantics = [#tpu.dimension_semantics<parallel>], iteration_bounds = array<i64: 1>, scalar_prefetch = 0 : i64, scratch_operands = 0 : i64, tpu.core_type = #tpu.core_type<tc>, window_params = [{transform_indices = @transform_0, window_bounds = array<i64: 8, 400>}, {transform_indices = @transform_1, window_bounds = array<i64: 8, 512>}, {pipeline_mode = #tpu.pipeline_mode<synchronous>, transform_indices = @transform_2, window_bounds = array<i64: 400, 512>}, {pipeline_mode = #tpu.pipeline_mode<synchronous>, transform_indices = @transform_3, window_bounds = array<i64: 1, 512>}, {pipeline_mode = #tpu.pipeline_mode<synchronous>, transform_indices = @transform_4, window_bounds = array<i64: 512, 512>}, {pipeline_mode = #tpu.pipeline_mode<synchronous>, transform_indices = @transform_5, window_bounds = array<i64: 1, 512>}, {pipeline_mode = #tpu.pipeline_mode<synchronous>, transform_indices = @transform_6, window_bounds = array<i64: 512, 512>}, {pipeline_mode = #tpu.pipeline_mode<synchronous>, transform_indices = @transform_7, window_bounds = array<i64: 1, 512>}, {pipeline_mode = #tpu.pipeline_mode<synchronous>, transform_indices = @transform_8, window_bounds = array<i64: 512, 512>}, {pipeline_mode = #tpu.pipeline_mode<synchronous>, transform_indices = @transform_9, window_bounds = array<i64: 1, 512>}, {transform_indices = @transform_10, window_bounds = array<i64: 8, 512>}]} {
    %c0 = arith.constant 0 : index
    %c0_0 = arith.constant 0 : index
    %0 = vector.load %arg1[%c0, %c0_0] : memref<8x400xf32, #tpu.memory_space<vmem>>, vector<8x400xf32>
    %1 = arith.truncf %0 : vector<8x400xf32> to vector<8x400xbf16>
    %c0_1 = arith.constant 0 : index
    %c0_2 = arith.constant 0 : index
    %2 = vector.load %arg2[%c0_1, %c0_2] : memref<8x512xf32, #tpu.memory_space<vmem>>, vector<8x512xf32>
    %3 = arith.truncf %2 : vector<8x512xf32> to vector<8x512xbf16>
    %c0_3 = arith.constant 0 : index
    %c0_4 = arith.constant 0 : index
    %4 = vector.load %arg3[%c0_3, %c0_4] : memref<400x512xbf16, #tpu.memory_space<vmem>>, vector<400x512xbf16>
    %cst = arith.constant dense<0.000000e+00> : vector<8x512xf32>
    %5 = tpu.matmul %1, %4, %cst {dimension_numbers = #tpu.dot_dimension_numbers<[1], [0], [0], [1], [0, 0, 1, 1], [], []>} : vector<8x400xbf16>, vector<400x512xbf16>, vector<8x512xf32> -> vector<8x512xf32>
    %c0_5 = arith.constant 0 : index
    %c0_6 = arith.constant 0 : index
    %6 = vector.load %arg4[%c0_5, %c0_6] : memref<1x512xf32, #tpu.memory_space<vmem>>, vector<1x512xf32>
    %7 = vector.broadcast %6 : vector<1x512xf32> to vector<8x512xf32>
    %8 = arith.addf %5, %7 : vector<8x512xf32>
    %cst_7 = arith.constant 0.000000e+00 : f32
    %9 = vector.broadcast %cst_7 : f32 to vector<8x512xf32>
    %10 = arith.maximumf %8, %9 : vector<8x512xf32>
    %11 = arith.truncf %10 : vector<8x512xf32> to vector<8x512xbf16>
    %c0_8 = arith.constant 0 : index
    %c0_9 = arith.constant 0 : index
    %12 = vector.load %arg5[%c0_8, %c0_9] : memref<512x512xbf16, #tpu.memory_space<vmem>>, vector<512x512xbf16>
    %cst_10 = arith.constant dense<0.000000e+00> : vector<8x512xf32>
    %13 = tpu.matmul %11, %12, %cst_10 {dimension_numbers = #tpu.dot_dimension_numbers<[1], [0], [0], [1], [0, 0, 1, 1], [], []>} : vector<8x512xbf16>, vector<512x512xbf16>, vector<8x512xf32> -> vector<8x512xf32>
    %c0_11 = arith.constant 0 : index
    %c0_12 = arith.constant 0 : index
    %14 = vector.load %arg6[%c0_11, %c0_12] : memref<1x512xf32, #tpu.memory_space<vmem>>, vector<1x512xf32>
    %15 = vector.broadcast %14 : vector<1x512xf32> to vector<8x512xf32>
    %16 = arith.addf %13, %15 : vector<8x512xf32>
    %cst_13 = arith.constant 0.000000e+00 : f32
    %17 = vector.broadcast %cst_13 : f32 to vector<8x512xf32>
    %18 = arith.subf %17, %16 : vector<8x512xf32>
    %19 = math.exp %18 : vector<8x512xf32>
    %cst_14 = arith.constant 1.000000e+00 : f32
    %20 = vector.broadcast %cst_14 : f32 to vector<8x512xf32>
    %21 = arith.addf %20, %19 : vector<8x512xf32>
    %22 = tpu.reciprocal %21 {approx = true} : vector<8x512xf32> -> vector<8x512xf32>
    %c0_15 = arith.constant 0 : index
    %c0_16 = arith.constant 0 : index
    %23 = vector.load %arg7[%c0_15, %c0_16] : memref<512x512xbf16, #tpu.memory_space<vmem>>, vector<512x512xbf16>
    %cst_17 = arith.constant dense<0.000000e+00> : vector<8x512xf32>
    %24 = tpu.matmul %3, %23, %cst_17 {dimension_numbers = #tpu.dot_dimension_numbers<[1], [0], [0], [1], [0, 0, 1, 1], [], []>} : vector<8x512xbf16>, vector<512x512xbf16>, vector<8x512xf32> -> vector<8x512xf32>
    %c0_18 = arith.constant 0 : index
    %c0_19 = arith.constant 0 : index
    %25 = vector.load %arg8[%c0_18, %c0_19] : memref<1x512xf32, #tpu.memory_space<vmem>>, vector<1x512xf32>
    %26 = vector.broadcast %25 : vector<1x512xf32> to vector<8x512xf32>
    %27 = arith.addf %24, %26 : vector<8x512xf32>
    %cst_20 = arith.constant 0.000000e+00 : f32
    %28 = vector.broadcast %cst_20 : f32 to vector<8x512xf32>
    %29 = arith.maximumf %27, %28 : vector<8x512xf32>
    %cst_21 = arith.constant 1.000000e+00 : f32
    %30 = vector.broadcast %cst_21 : f32 to vector<8x512xf32>
    %31 = arith.addf %22, %30 : vector<8x512xf32>
    %32 = arith.mulf %31, %29 : vector<8x512xf32>
    %33 = arith.truncf %32 : vector<8x512xf32> to vector<8x512xbf16>
    %c0_22 = arith.constant 0 : index
    %c0_23 = arith.constant 0 : index
    %34 = vector.load %arg9[%c0_22, %c0_23] : memref<512x512xbf16, #tpu.memory_space<vmem>>, vector<512x512xbf16>
    %cst_24 = arith.constant dense<0.000000e+00> : vector<8x512xf32>
    %35 = tpu.matmul %33, %34, %cst_24 {dimension_numbers = #tpu.dot_dimension_numbers<[1], [0], [0], [1], [0, 0, 1, 1], [], []>} : vector<8x512xbf16>, vector<512x512xbf16>, vector<8x512xf32> -> vector<8x512xf32>
    %c0_25 = arith.constant 0 : index
    %c0_26 = arith.constant 0 : index
    %36 = vector.load %arg10[%c0_25, %c0_26] : memref<1x512xf32, #tpu.memory_space<vmem>>, vector<1x512xf32>
    %37 = vector.broadcast %36 : vector<1x512xf32> to vector<8x512xf32>
    %38 = arith.addf %35, %37 : vector<8x512xf32>
    %cst_27 = arith.constant 0.000000e+00 : f32
    %39 = vector.broadcast %cst_27 : f32 to vector<8x512xf32>
    %40 = arith.maximumf %38, %39 : vector<8x512xf32>
    %c0_28 = arith.constant 0 : index
    %c0_29 = arith.constant 0 : index
    %41 = vector.load %arg11[%c0_28, %c0_29] : memref<8x512xf32, #tpu.memory_space<vmem>>, vector<8x512xf32>
    tpu.vector_store %arg11[%c0_28, %c0_29], %40 {strides = array<i32>} : memref<8x512xf32, #tpu.memory_space<vmem>>, vector<8x512xf32>,
    return
  }
  func.func @transform_0(%arg0: i32) -> (i32, i32) {
    %c0_i32 = arith.constant 0 : i32
    %c0_i32_0 = arith.constant 0 : i32
    return %arg0, %c0_i32 : i32, i32
  }
  func.func @transform_1(%arg0: i32) -> (i32, i32) {
    %c0_i32 = arith.constant 0 : i32
    %c0_i32_0 = arith.constant 0 : i32
    return %arg0, %c0_i32 : i32, i32
  }
  func.func @transform_2(%arg0: i32) -> (i32, i32) {
    %c0_i32 = arith.constant 0 : i32
    %c0_i32_0 = arith.constant 0 : i32
    %c0_i32_1 = arith.constant 0 : i32
    return %c0_i32, %c0_i32_0 : i32, i32
  }
  func.func @transform_3(%arg0: i32) -> (i32, i32) {
    %c0_i32 = arith.constant 0 : i32
    %c0_i32_0 = arith.constant 0 : i32
    %c0_i32_1 = arith.constant 0 : i32
    return %c0_i32, %c0_i32_0 : i32, i32
  }
  func.func @transform_4(%arg0: i32) -> (i32, i32) {
    %c0_i32 = arith.constant 0 : i32
    %c0_i32_0 = arith.constant 0 : i32
    %c0_i32_1 = arith.constant 0 : i32
    return %c0_i32, %c0_i32_0 : i32, i32
  }
  func.func @transform_5(%arg0: i32) -> (i32, i32) {
    %c0_i32 = arith.constant 0 : i32
    %c0_i32_0 = arith.constant 0 : i32
    %c0_i32_1 = arith.constant 0 : i32
    return %c0_i32, %c0_i32_0 : i32, i32
  }
  func.func @transform_6(%arg0: i32) -> (i32, i32) {
    %c0_i32 = arith.constant 0 : i32
    %c0_i32_0 = arith.constant 0 : i32
    %c0_i32_1 = arith.constant 0 : i32
    return %c0_i32, %c0_i32_0 : i32, i32
  }
  func.func @transform_7(%arg0: i32) -> (i32, i32) {
    %c0_i32 = arith.constant 0 : i32
    %c0_i32_0 = arith.constant 0 : i32
    %c0_i32_1 = arith.constant 0 : i32
    return %c0_i32, %c0_i32_0 : i32, i32
  }
  func.func @transform_8(%arg0: i32) -> (i32, i32) {
    %c0_i32 = arith.constant 0 : i32
    %c0_i32_0 = arith.constant 0 : i32
    %c0_i32_1 = arith.constant 0 : i32
    return %c0_i32, %c0_i32_0 : i32, i32
  }
  func.func @transform_9(%arg0: i32) -> (i32, i32) {
    %c0_i32 = arith.constant 0 : i32
    %c0_i32_0 = arith.constant 0 : i32
    %c0_i32_1 = arith.constant 0 : i32
    return %c0_i32, %c0_i32_0 : i32, i32
  }
  func.func @transform_10(%arg0: i32) -> (i32, i32) {
    %c0_i32 = arith.constant 0 : i32
    %c0_i32_0 = arith.constant 0 : i32
    return %arg0, %c0_i32 : i32, i32
  }
}

</mosaic_0001>

<bundles_post_ra>
// kernel: tpu_custom_call.1
= control target key start
LH: loop header
LB: loop body
LE: loop exit
PB: predicated region body
PF: predicated region fallthrough
CT: control target
= control target key end

     0   :  { %15 = vsyncpa [#allocation3], 0  ;;  %s7009_s0 = inlined_call_operand.hbm [shape: f32[8,400], index: 0, kind: input, shape index: {}]   ;;  %s7010_s1 = inlined_call_operand.hbm [shape: f32[8,512], index: 1, kind: input, shape index: {}]   ;;  %s7011_s2 = inlined_call_operand.hbm [shape: bf16[400,512], index: 2, kind: input, shape index: {}]   ;;  %s7012_s3 = inlined_call_operand.hbm [shape: f32[1,512], index: 3, kind: input, shape index: {}]   ;;  %s7013_s4 = inlined_call_operand.hbm [shape: bf16[512,512], index: 4, kind: input, shape index: {}]   ;;  %s7014_s5 = inlined_call_operand.vmem [shape: f32[1,512], index: 5, kind: input, shape index: {}]   ;;  %s7015_s6 = inlined_call_operand.hbm [shape: bf16[512,512], index: 6, kind: input, shape index: {}]   ;;  %s7016_s7 = inlined_call_operand.hbm [shape: f32[1,512], index: 7, kind: input, shape index: {}]   ;;  %s7017_s8 = inlined_call_operand.hbm [shape: bf16[512,512], index: 8, kind: input, shape index: {}]   ;;  %s7018_s9 = inlined_call_operand.vmem [shape: f32[1,512], index: 9, kind: input, shape index: {}]   ;;  %s7019_s10 = inlined_call_operand.hbm [shape: f32[8,512], index: 10, kind: output, shape index: {}]  }
   0x1   :  { %16 = vsyncpa [#allocation6], 0 }
   0x2   :  { %17 = vsyncpa [#allocation9], 0 }
   0x3   :  { %18 = vsyncpa [#allocation12], 0 }
   0x4   :  { %19 = vsyncpa [#allocation15], 0  ;;  %s37_s15 = sshll.u32 %s7010_s1, 4  ;;  %s38_s15 = int_to_ptr.hbm [resolvable:$true] %s37_s15 }
   0x5   :  { %20 = vsyncpa [#allocation4], 0  ;;  %s6702_s16 = smov [#allocation5]   ;;  %s61_s20 = sshll.u32 %s7012_s3, 4  ;;  %s62_s20 = int_to_ptr.hbm [resolvable:$true] %s61_s20 }
   0x6   :  { %s39_s17 = sshll.u32 %s6702_s16, 4  ;;  %s6703_s21 = smov [#allocation8]   ;;  %s40_s17 = int_to_ptr.vmem [resolvable:$true] %s39_s17 }
   0x7   :  { %42 = dma.hbm_to_vmem [thread:$0]  %s38_s15, 512, %s40_s17, [#allocation6]  }
   0x8   :  { %s63_s22 = sshll.u32 %s6703_s21, 4  ;;  %s86_s25 = sshll.u32 %s7015_s6, 4  ;;  %s64_s22 = int_to_ptr.vmem [resolvable:$true] %s63_s22  ;;  %s87_s25 = int_to_ptr.hbm [resolvable:$true] %s86_s25 }
   0x9   :  { %66 = dma.hbm_to_vmem [thread:$0]  %s62_s20, 64, %s64_s22, [#allocation9]  }
   0xa   :  { %s6704_s1 = smov [#allocation11]   ;;  %s26_s29 = sshll.u32 %s7009_s0, 4  ;;  %s27_s29 = int_to_ptr.hbm [resolvable:$true] %s26_s29 }
   0xb   :  { %s88_s26 = sshll.u32 %s6704_s1, 4  ;;  %s6705_s30 = smov 256   ;;  %s89_s26 = int_to_ptr.vmem [resolvable:$true] %s88_s26 }
   0xc   :  { %s6706_s3 = smov 16   ;;  %s6707_s11 = smov [#allocation2]  }
   0xd   :  { %94 = dma.hbm_to_vmem [thread:$0]  %s87_s25, 16384, %s89_s26, [#allocation12], %s6705_s30, %s6705_s30, %s6706_s3  }
   0xe   :  { %s28_s12 = sshll.u32 %s6707_s11, 4  ;;  %s47_s6 = sshll.u32 %s7011_s2, 4  ;;  %s29_s12 = int_to_ptr.vmem [resolvable:$true] %s28_s12  ;;  %s48_s6 = int_to_ptr.hbm [resolvable:$true] %s47_s6 }
   0xf   :  { %31 = dma.hbm_to_vmem [thread:$0]  %s27_s29, 512, %s29_s12, [#allocation3]  }
  0x10   :  { %s71_s0 = sshll.u32 %s7013_s4, 4  ;;  %s6708_s17 = smov [#allocation7]   ;;  %s72_s0 = int_to_ptr.hbm [resolvable:$true] %s71_s0 }
  0x11   :  { %s49_s18 = sshll.u32 %s6708_s17, 4  ;;  %s6709_s19 = smov [#allocation10]   ;;  %s50_s18 = int_to_ptr.vmem [resolvable:$true] %s49_s18 }
  0x12   :  { %55 = dma.hbm_to_vmem [thread:$0]  %s48_s6, 12800, %s50_s18, [#allocation6], %s6705_s30, %s6705_s30, %s6706_s3  }
  0x13   :  { %s73_s20 = sshll.u32 %s6709_s19, 4  ;;  %s100_s2 = sshll.u32 %s7016_s7, 4  ;;  %s74_s20 = int_to_ptr.vmem [resolvable:$true] %s73_s20  ;;  %s101_s2 = int_to_ptr.hbm [resolvable:$true] %s100_s2 }
  0x14   :  { %79 = dma.hbm_to_vmem [thread:$0]  %s72_s0, 16384, %s74_s20, [#allocation9], %s6705_s30, %s6705_s30, %s6706_s3  }
  0x15   :  { %s110_s24 = sshll.u32 %s7017_s8, 4  ;;  %s6710_s25 = smov [#allocation13]   ;;  %s111_s24 = int_to_ptr.hbm [resolvable:$true] %s110_s24 }
  0x16   :  { %s102_s1 = sshll.u32 %s6710_s25, 4  ;;  %s6711_s26 = smov [#allocation14]   ;;  %s103_s1 = int_to_ptr.vmem [resolvable:$true] %s102_s1 }
  0x17   :  { %105 = dma.hbm_to_vmem [thread:$0]  %s101_s2, 64, %s103_s1, [#allocation12]  }
  0x18   :  { %s112_s27 = sshll.u32 %s6711_s26, 4  ;;  %s113_s27 = int_to_ptr.vmem [resolvable:$true] %s112_s27 }
  0x19   :  { %118 = dma.hbm_to_vmem [thread:$0]  %s111_s24, 16384, %s113_s27, [#allocation15], %s6705_s30, %s6705_s30, %s6706_s3  }
  0x1a   :  { %6690 = dma.done.wait [#allocation3], 512  }
  0x1b   :  { %6691 = vsyncadd [#allocation3], 4294966784 }
  0x1c   :  { %6692 = dma.done.wait [#allocation6], 13312  }
  0x1d   :  { %6693 = vsyncadd [#allocation6], 4294953984 }
  0x1e   :  { %6694 = dma.done.wait [#allocation9], 16448  }
  0x1f   :  { %6695 = vsyncadd [#allocation9], 4294950848 }
  0x20   :  { %6696 = dma.done.wait [#allocation12], 16448  }
  0x21   :  { %6697 = vsyncadd [#allocation12], 4294950848 }
  0x22   :  { %6698 = dma.done.wait [#allocation15], 16384  }
  0x23   :  { %6699 = vsyncadd [#allocation15], 4294950912  ;;  %v4137_v0 = vld [vmem:[#allocation7 + $0xe0] sm:$0xf]  ;;  %v5993_v1 = vld [vmem:[#allocation7 + $0xec] sm:$0xf0] }
  0x24   :  { %v4393_v2 = vld [vmem:[#allocation7 + $0x2e0] sm:$0xf]  ;;  %v4138_v3 = vor.u32 %v5993_v1, %v4137_v0  ;;  %v6057_v4 = vld [vmem:[#allocation7 + $0x2ec] sm:$0xf0]  ;;  %v5991_v11 = vld [vmem:[#allocation7 + $0xe4] sm:$0xf] }
  0x25   :  { %v4409_v5 = vld [vmem:[#allocation7 + $0x300] sm:$0xf]  ;;  %v6061_v6 = vld [vmem:[#allocation7 + $0x30c] sm:$0xf0]  ;;  %v4394_v7 = vor.u32 %v6057_v4, %v4393_v2  ;;  %v4139_v13 = vld [vmem:[#allocation7 + $0xf0] sm:$0xf0] }
  0x26   :  { %v4410_v8 = vor.u32 %v6061_v6, %v4409_v5  ;;  %v4265_v9 = vld [vmem:[#allocation7 + $0x1e0] sm:$0xf]  ;;  %v6025_v10 = vld [vmem:[#allocation7 + $0x1ec] sm:$0xf0]  ;;  %784 = vmatpush.bf16.msra.mxu0 %v4138_v3  ;;  %v4142_v16 = vor.u32 %v5991_v11, %v4139_v13  ;;  %v5987_v23 = vld [vmem:[#allocation7 + $0xc4] sm:$0xf] }
  0x27   :  { %v4266_v12 = vor.u32 %v6025_v10, %v4265_v9  ;;  %v4121_v14 = vld [vmem:[#allocation7 + $0xc0] sm:$0xf]  ;;  %v5989_v15 = vld [vmem:[#allocation7 + $0xcc] sm:$0xf0]  ;;  %810 = vmatpush.bf16.msra.mxu2 %v4394_v7  ;;  %v4123_v24 = vld [vmem:[#allocation7 + $0xd0] sm:$0xf0] }
  0x28   :  { %830 = vmatpush.bf16.msra.mxu3 %v4410_v8  ;;  %v4122_v17 = vor.u32 %v5989_v15, %v4121_v14  ;;  %v4377_v18 = vld [vmem:[#allocation7 + $0x2c0] sm:$0xf]  ;;  %v6053_v19 = vld [vmem:[#allocation7 + $0x2cc] sm:$0xf0]  ;;  %v4126_v26 = vor.u32 %v5987_v23, %v4123_v24  ;;  %v5983_v35 = vld [vmem:[#allocation7 + $0xa4] sm:$0xf] }
  0x29   :  { %v4249_v20 = vld [vmem:[#allocation7 + $0x1c0] sm:$0xf]  ;;  %797 = vmatpush.bf16.msra.mxu1 %v4266_v12  ;;  %v4378_v21 = vor.u32 %v6053_v19, %v4377_v18  ;;  %v6021_v22 = vld [vmem:[#allocation7 + $0x1cc] sm:$0xf0]  ;;  %v4107_v36 = vld [vmem:[#allocation7 + $0xb0] sm:$0xf0] }
  0x2a   :  { %v4250_v25 = vor.u32 %v6021_v22, %v4249_v20  ;;  %v4105_v27 = vld [vmem:[#allocation7 + $0xa0] sm:$0xf]  ;;  %v5985_v28 = vld [vmem:[#allocation7 + $0xac] sm:$0xf0]  ;;  %785 = vmatpush.bf16.msra.mxu0 %v4122_v17  ;;  %v4110_v42 = vor.u32 %v5983_v35, %v4107_v36  ;;  %v5979_v46 = vld [vmem:[#allocation7 + $0x84] sm:$0xf] }
  0x2b   :  { %v4361_v29 = vld [vmem:[#allocation7 + $0x2a0] sm:$0xf]  ;;  %v4106_v30 = vor.u32 %v5985_v28, %v4105_v27  ;;  %v6049_v31 = vld [vmem:[#allocation7 + $0x2ac] sm:$0xf0]  ;;  %811 = vmatpush.bf16.msra.mxu2 %v4378_v21  ;;  %v4091_v47 = vld [vmem:[#allocation7 + $0x90] sm:$0xf0] }
  0x2c   :  { %836 = vmatpush.bf16.msrb.mxu3 %v4142_v16  ;;  %v4233_v32 = vld [vmem:[#allocation7 + $0x1a0] sm:$0xf]  ;;  %v6017_v33 = vld [vmem:[#allocation7 + $0x1ac] sm:$0xf0]  ;;  %v4362_v34 = vor.u32 %v6049_v31, %v4361_v29  ;;  %v4094_v54 = vor.u32 %v5979_v46, %v4091_v47  ;;  %v5975_v58 = vld [vmem:[#allocation7 + $0x64] sm:$0xf] }
  0x2d   :  { %v4089_v37 = vld [vmem:[#allocation7 + $0x80] sm:$0xf]  ;;  %798 = vmatpush.bf16.msra.mxu1 %v4250_v25  ;;  %v4234_v38 = vor.u32 %v6017_v33, %v4233_v32  ;;  %v5981_v39 = vld [vmem:[#allocation7 + $0x8c] sm:$0xf0]  ;;  %v4075_v59 = vld [vmem:[#allocation7 + $0x70] sm:$0xf0] }
  0x2e   :  { %v4345_v40 = vld [vmem:[#allocation7 + $0x280] sm:$0xf]  ;;  %v6045_v41 = vld [vmem:[#allocation7 + $0x28c] sm:$0xf0]  ;;  %786 = vmatpush.bf16.msra.mxu0 %v4106_v30  ;;  %v4090_v45 = vor.u32 %v5981_v39, %v4089_v37  ;;  %v4078_v2 = vor.u32 %v5975_v58, %v4075_v59  ;;  %v157_v5 = vld [vmem:[#allocation2 + $0x18] sm:$0xff]  ;;  %vm780_vm0 = vcmask 130048  }
  0x2f   :  { %v4217_v43 = vld [vmem:[#allocation7 + $0x180] sm:$0xf]  ;;  %v6013_v44 = vld [vmem:[#allocation7 + $0x18c] sm:$0xf0]  ;;  %812 = vmatpush.bf16.msra.mxu2 %v4362_v34  ;;  %v4346_v48 = vor.u32 %v6045_v41, %v4345_v40  ;;  %v5971_v7 = vld [vmem:[#allocation7 + $0x44] sm:$0xf]  ;;  %v6804_v9 = vpack.c.bf16 %v157_v5, %v157_v5 }
  0x30   :  { %837 = vmatpush.bf16.msrb.mxu3 %v4126_v26  ;;  %v4073_v49 = vld [vmem:[#allocation7 + $0x60] sm:$0xf]  ;;  %v5977_v50 = vld [vmem:[#allocation7 + $0x6c] sm:$0xf0]  ;;  %v4218_v51 = vor.u32 %v6013_v44, %v4217_v43  ;;  %v4059_v8 = vld [vmem:[#allocation7 + $0x50] sm:$0xf0] }
  0x31   :  { %799 = vmatpush.bf16.msra.mxu1 %v4234_v38  ;;  %v4329_v52 = vld [vmem:[#allocation7 + $0x260] sm:$0xf]  ;;  %v6041_v53 = vld [vmem:[#allocation7 + $0x26c] sm:$0xf0]  ;;  %v4074_v57 = vor.u32 %v5977_v50, %v4073_v49  ;;  %4423 = vmatmul.msk.bf16.vlgmr.msra.gmra.mxu3 %vm780_vm0, %v6804_v9  ;;  %v4062_v16 = vor.u32 %v5971_v7, %v4059_v8  ;;  %v5967_v19 = vld [vmem:[#allocation7 + $0x24] sm:$0xf] }
  0x32   :  { %v4201_v55 = vld [vmem:[#allocation7 + $0x160] sm:$0xf]  ;;  %v6009_v56 = vld [vmem:[#allocation7 + $0x16c] sm:$0xf0]  ;;  %787 = vmatpush.bf16.msra.mxu0 %v4090_v45  ;;  %v4330_v60 = vor.u32 %v6041_v53, %v4329_v52  ;;  %v4043_v21 = vld [vmem:[#allocation7 + $0x30] sm:$0xf0] }
  0x33   :  { %813 = vmatpush.bf16.msra.mxu2 %v4346_v48  ;;  %v4057_v61 = vld [vmem:[#allocation7 + $0x40] sm:$0xf]  ;;  %v5973_v62 = vld [vmem:[#allocation7 + $0x4c] sm:$0xf0]  ;;  %v4202_v63 = vor.u32 %v6009_v56, %v4201_v55  ;;  %v6023_v30 = vld [vmem:[#allocation7 + $0x1e4] sm:$0xf]  ;;  %v4046_v32 = vor.u32 %v5967_v19, %v4043_v21 }
  0x34   :  { %838 = vmatpush.bf16.msrb.mxu3 %v4110_v42  ;;  %v4313_v0 = vld [vmem:[#allocation7 + $0x240] sm:$0xf]  ;;  %v6037_v1 = vld [vmem:[#allocation7 + $0x24c] sm:$0xf0]  ;;  %v4058_v6 = vor.u32 %v5973_v62, %v4057_v61  ;;  %v4267_v31 = vld [vmem:[#allocation7 + $0x1f0] sm:$0xf0] }
  0x35   :  { %800 = vmatpush.bf16.msra.mxu1 %v4218_v51  ;;  %v4185_v3 = vld [vmem:[#allocation7 + $0x140] sm:$0xf]  ;;  %v6005_v4 = vld [vmem:[#allocation7 + $0x14c] sm:$0xf0]  ;;  %v4314_v10 = vor.u32 %v6037_v1, %v4313_v0  ;;  %v5963_v33 = vld [vmem:[#allocation7 + $0x4] sm:$0xf]  ;;  %v4270_v41 = vor.u32 %v6023_v30, %v4267_v31 }
  0x36   :  { %788 = vmatpush.bf16.msra.mxu0 %v4074_v57  ;;  %v4041_v11 = vld [vmem:[#allocation7 + $0x20] sm:$0xf]  ;;  %v5969_v12 = vld [vmem:[#allocation7 + $0x2c] sm:$0xf0]  ;;  %v4186_v13 = vor.u32 %v6005_v4, %v4185_v3  ;;  %v6059_v34 = vld [vmem:[#allocation7 + $0x304] sm:$0xf] }
  0x37   :  { %814 = vmatpush.bf16.msra.mxu2 %v4330_v60  ;;  %v4297_v14 = vld [vmem:[#allocation7 + $0x220] sm:$0xf]  ;;  %v6033_v15 = vld [vmem:[#allocation7 + $0x22c] sm:$0xf0]  ;;  %v4042_v20 = vor.u32 %v5969_v12, %v4041_v11  ;;  %v4411_v35 = vld [vmem:[#allocation7 + $0x310] sm:$0xf0] }
  0x38   :  { %839 = vmatpush.bf16.msrb.mxu3 %v4094_v54  ;;  %v4169_v17 = vld [vmem:[#allocation7 + $0x120] sm:$0xf]  ;;  %v6001_v18 = vld [vmem:[#allocation7 + $0x12c] sm:$0xf0]  ;;  %v4298_v24 = vor.u32 %v6033_v15, %v4297_v14  ;;  %v4027_v37 = vld [vmem:[#allocation7 + $0x10] sm:$0xf0]  ;;  %v4414_v46 = vor.u32 %v6059_v34, %v4411_v35 }
  0x39   :  { %801 = vmatpush.bf16.msra.mxu1 %v4202_v63  ;;  %v4025_v22 = vld [vmem:[#allocation7] sm:$0xf]  ;;  %v5965_v23 = vld [vmem:[#allocation7 + $0xc] sm:$0xf0]  ;;  %v4170_v28 = vor.u32 %v6001_v18, %v4169_v17  ;;  %v6055_v38 = vld [vmem:[#allocation7 + $0x2e4] sm:$0xf]  ;;  %v4030_v50 = vor.u32 %v5963_v33, %v4027_v37 }
  0x3a   :  { %789 = vmatpush.bf16.msra.mxu0 %v4058_v6  ;;  %v4281_v25 = vld [vmem:[#allocation7 + $0x200] sm:$0xf]  ;;  %v6029_v26 = vld [vmem:[#allocation7 + $0x20c] sm:$0xf0]  ;;  %v4026_v36 = vor.u32 %v5965_v23, %v4025_v22  ;;  %v4395_v39 = vld [vmem:[#allocation7 + $0x2f0] sm:$0xf0] }
  0x3b   :  { %815 = vmatpush.bf16.msra.mxu2 %v4314_v10  ;;  %v4153_v27 = vld [vmem:[#allocation7 + $0x100] sm:$0xf]  ;;  %v5997_v29 = vld [vmem:[#allocation7 + $0x10c] sm:$0xf0]  ;;  %v4282_v40 = vor.u32 %v6029_v26, %v4281_v25  ;;  %v4145_v42 = vld [vmem:[#allocation7 + $0xe8] sm:$0xf]  ;;  %v4398_v51 = vor.u32 %v6055_v38, %v4395_v39 }
  0x3c   :  { %840 = vmatpush.bf16.msrb.mxu3 %v4078_v2  ;;  %v5994_v43 = vld [vmem:[#allocation7 + $0xf4] sm:$0xf0]  ;;  %v156_v44 = vld [vmem:[#allocation2 + $0x10] sm:$0xff]  ;;  %v4154_v45 = vor.u32 %v5997_v29, %v4153_v27  ;;  %v4273_v47 = vld [vmem:[#allocation7 + $0x1e8] sm:$0xf]  ;;  %s4009_s11 = sshll.u32 %s7019_s10, 4  ;;  %s4010_s11 = int_to_ptr.hbm [resolvable:$true] %s4009_s11 }
  0x3d   :  { %802 = vmatpush.bf16.msra.mxu1 %v4186_v13  ;;  %v6026_v48 = vld [vmem:[#allocation7 + $0x1f4] sm:$0xf0]  ;;  %v154_v49 = vld [vmem:[#allocation2] sm:$0xff]  ;;  %v4251_v53 = vld [vmem:[#allocation7 + $0x1d0] sm:$0xf0]  ;;  %v4146_v55 = vor.u32 %v5994_v43, %v4145_v42  ;;  %v6808_v56 = vpack.c.bf16 %v156_v44, %v156_v44 }
  0x3e   :  { %790 = vmatpush.bf16.msra.mxu0 %v4042_v20  ;;  %v6019_v52 = vld [vmem:[#allocation7 + $0x1c4] sm:$0xf]  ;;  %v155_v54 = vld [vmem:[#allocation2 + $0x8] sm:$0xff]  ;;  %v4379_v58 = vld [vmem:[#allocation7 + $0x2d0] sm:$0xf0]  ;;  %v4274_v59 = vor.u32 %v6026_v48, %v4273_v47  ;;  %v6810_v60 = vpack.c.bf16 %v154_v49, %v154_v49 }
  0x3f   :  { %816 = vmatpush.bf16.msra.mxu2 %v4298_v24  ;;  %v6051_v57 = vld [vmem:[#allocation7 + $0x2c4] sm:$0xf]  ;;  %v4129_v61 = vld [vmem:[#allocation7 + $0xc8] sm:$0xf]  ;;  %v5990_v62 = vld [vmem:[#allocation7 + $0xd4] sm:$0xf0]  ;;  %v4254_v63 = vor.u32 %v6019_v52, %v4251_v53  ;;  %v6812_v0 = vpack.c.bf16 %v155_v54, %v155_v54 }
  0x40   :  { %841 = vmatpush.bf16.msrb.mxu3 %v4062_v16  ;;  %v4257_v1 = vld [vmem:[#allocation7 + $0x1c8] sm:$0xf]  ;;  %v6022_v2 = vld [vmem:[#allocation7 + $0x1d4] sm:$0xf0]  ;;  %v4382_v3 = vor.u32 %v6051_v57, %v4379_v58  ;;  %v6015_v4 = vld [vmem:[#allocation7 + $0x1a4] sm:$0xf]  ;;  %v4130_v6 = vor.u32 %v5990_v62, %v4129_v61 }
  0x41   :  { %803 = vmatpush.bf16.msra.mxu1 %v4170_v28  ;;  %v4235_v5 = vld [vmem:[#allocation7 + $0x1b0] sm:$0xf0]  ;;  %v6047_v7 = vld [vmem:[#allocation7 + $0x2a4] sm:$0xf]  ;;  %v4258_v10 = vor.u32 %v6022_v2, %v4257_v1  ;;  %v4113_v11 = vld [vmem:[#allocation7 + $0xa8] sm:$0xf] }
  0x42   :  { %791 = vmatpush.bf16.msra.mxu0 %v4026_v36  ;;  %v4363_v8 = vld [vmem:[#allocation7 + $0x2b0] sm:$0xf0]  ;;  %v5986_v12 = vld [vmem:[#allocation7 + $0xb4] sm:$0xf0]  ;;  %v4238_v13 = vor.u32 %v6015_v4, %v4235_v5  ;;  %v4241_v14 = vld [vmem:[#allocation7 + $0x1a8] sm:$0xf] }
  0x43   :  { %817 = vmatpush.bf16.msra.mxu2 %v4282_v40  ;;  %v6018_v15 = vld [vmem:[#allocation7 + $0x1b4] sm:$0xf0]  ;;  %v4366_v16 = vor.u32 %v6047_v7, %v4363_v8  ;;  %v6011_v17 = vld [vmem:[#allocation7 + $0x184] sm:$0xf]  ;;  %v4219_v18 = vld [vmem:[#allocation7 + $0x190] sm:$0xf0]  ;;  %v4114_v19 = vor.u32 %v5986_v12, %v4113_v11 }
  0x44   :  { %842 = vmatpush.bf16.msrb.mxu3 %v4046_v32  ;;  %v6043_v20 = vld [vmem:[#allocation7 + $0x284] sm:$0xf]  ;;  %v4347_v21 = vld [vmem:[#allocation7 + $0x290] sm:$0xf0]  ;;  %v4242_v22 = vor.u32 %v6018_v15, %v4241_v14  ;;  %v4097_v23 = vld [vmem:[#allocation7 + $0x88] sm:$0xf]  ;;  %v4222_v25 = vor.u32 %v6011_v17, %v4219_v18 }
  0x45   :  { %804 = vmatpush.bf16.msra.mxu1 %v4154_v45  ;;  %792 = vmatmul.bf16.vlgmr.msra.gmra.mxu0 %v6810_v60  ;;  %v5982_v24 = vld [vmem:[#allocation7 + $0x94] sm:$0xf0]  ;;  %v4225_v26 = vld [vmem:[#allocation7 + $0x188] sm:$0xf]  ;;  %v4350_v28 = vor.u32 %v6043_v20, %v4347_v21  ;;  %v6007_v29 = vld [vmem:[#allocation7 + $0x164] sm:$0xf] }
  0x46   :  { %849 = vmatpush.bf16.msrb.mxu0 %v4270_v41  ;;  %818 = vmatmul.bf16.vlgmr.msra.gmra.mxu2 %v6808_v56  ;;  %v6014_v27 = vld [vmem:[#allocation7 + $0x194] sm:$0xf0]  ;;  %v4203_v30 = vld [vmem:[#allocation7 + $0x170] sm:$0xf0]  ;;  %v4098_v31 = vor.u32 %v5982_v24, %v4097_v23  ;;  %v6039_v32 = vld [vmem:[#allocation7 + $0x264] sm:$0xf] }
  0x47   :  { %882 = vmatpush.bf16.msrb.mxu2 %v4414_v46  ;;  %v4331_v33 = vld [vmem:[#allocation7 + $0x270] sm:$0xf0]  ;;  %v4226_v34 = vor.u32 %v6014_v27, %v4225_v26  ;;  %v4081_v35 = vld [vmem:[#allocation7 + $0x68] sm:$0xf]  ;;  %v5978_v36 = vld [vmem:[#allocation7 + $0x74] sm:$0xf0]  ;;  %v4206_v37 = vor.u32 %v6007_v29, %v4203_v30 }
  0x48   :  { %843 = vmatpush.bf16.msrb.mxu3 %v4030_v50  ;;  %805 = vmatmul.bf16.vlgmr.msra.gmra.mxu1 %v6812_v0  ;;  %v4209_v38 = vld [vmem:[#allocation7 + $0x168] sm:$0xf]  ;;  %v6010_v39 = vld [vmem:[#allocation7 + $0x174] sm:$0xf0]  ;;  %v4334_v40 = vor.u32 %v6039_v32, %v4331_v33  ;;  %v6003_v41 = vld [vmem:[#allocation7 + $0x144] sm:$0xf]  ;;  %v4082_v43 = vor.u32 %v5978_v36, %v4081_v35 }
  0x49   :  { %862 = vmatpush.bf16.msrb.mxu1 %v4398_v51  ;;  %v4187_v42 = vld [vmem:[#allocation7 + $0x150] sm:$0xf0]  ;;  %v6035_v44 = vld [vmem:[#allocation7 + $0x244] sm:$0xf]  ;;  %v4210_v46 = vor.u32 %v6010_v39, %v4209_v38  ;;  %v4065_v47 = vld [vmem:[#allocation7 + $0x48] sm:$0xf] }
  0x4a   :  { %850 = vmatpush.bf16.msrb.mxu0 %v4254_v63  ;;  %v4315_v45 = vld [vmem:[#allocation7 + $0x250] sm:$0xf0]  ;;  %v5974_v48 = vld [vmem:[#allocation7 + $0x54] sm:$0xf0]  ;;  %v4190_v49 = vor.u32 %v6003_v41, %v4187_v42  ;;  %v4193_v50 = vld [vmem:[#allocation7 + $0x148] sm:$0xf] }
  0x4b   :  { %901 = vmatpush.bf16.msra.mxu2 %v4274_v59  ;;  %844 = vmatmul.bf16.vlgmr.msrb.gmra.mxu3 %v6810_v60  ;;  %v6006_v51 = vld [vmem:[#allocation7 + $0x154] sm:$0xf0]  ;;  %v4318_v52 = vor.u32 %v6035_v44, %v4315_v45  ;;  %v5999_v53 = vld [vmem:[#allocation7 + $0x124] sm:$0xf]  ;;  %v4171_v54 = vld [vmem:[#allocation7 + $0x130] sm:$0xf0] }
  0x4c   :  { %888 = vmatpush.bf16.msra.mxu3 %v4146_v55  ;;  %v4066_v55 = vor.u32 %v5974_v48, %v4065_v47  ;;  %v6031_v57 = vld [vmem:[#allocation7 + $0x224] sm:$0xf]  ;;  %v4299_v58 = vld [vmem:[#allocation7 + $0x230] sm:$0xf0]  ;;  %v4194_v59 = vor.u32 %v6006_v51, %v4193_v50  ;;  %v4049_v61 = vld [vmem:[#allocation7 + $0x28] sm:$0xf]  ;;  %v4174_v63 = vor.u32 %v5999_v53, %v4171_v54 }
  0x4d   :  { %863 = vmatpush.bf16.msrb.mxu1 %v4382_v3  ;;  %v5970_v62 = vld [vmem:[#allocation7 + $0x34] sm:$0xf0]  ;;  %v4177_v1 = vld [vmem:[#allocation7 + $0x128] sm:$0xf]  ;;  %v5995_v3 = vld [vmem:[#allocation7 + $0x104] sm:$0xf]  ;;  %v4302_v4 = vor.u32 %v6031_v57, %v4299_v58 }
  0x4e   :  { %851 = vmatpush.bf16.msrb.mxu0 %v4238_v13  ;;  %v6002_v2 = vld [vmem:[#allocation7 + $0x134] sm:$0xf0]  ;;  %v4155_v5 = vld [vmem:[#allocation7 + $0x110] sm:$0xf0]  ;;  %v4050_v8 = vor.u32 %v5970_v62, %v4049_v61  ;;  %v4401_v11 = vld [vmem:[#allocation7 + $0x2e8] sm:$0xf] }
  0x4f   :  { %902 = vmatpush.bf16.msra.mxu2 %v4258_v10  ;;  %v4283_v7 = vld [vmem:[#allocation7 + $0x210] sm:$0xf0]  ;;  %v4033_v10 = vld [vmem:[#allocation7 + $0x8] sm:$0xf]  ;;  %v6058_v12 = vld [vmem:[#allocation7 + $0x2f4] sm:$0xf0]  ;;  %v4178_v13 = vor.u32 %v6002_v2, %v4177_v1  ;;  %v4158_v17 = vor.u32 %v5995_v3, %v4155_v5 }
  0x50   :  { %889 = vmatpush.bf16.msra.mxu3 %v4130_v6  ;;  %v6027_v6 = vld [vmem:[#allocation7 + $0x204] sm:$0xf]  ;;  %v5966_v14 = vld [vmem:[#allocation7 + $0x14] sm:$0xf0]  ;;  %v4417_v15 = vld [vmem:[#allocation7 + $0x308] sm:$0xf]  ;;  %v4402_v21 = vor.u32 %v6058_v12, %v4401_v11 }
  0x51   :  { %864 = vmatpush.bf16.msrb.mxu1 %v4366_v16  ;;  %v6062_v16 = vld [vmem:[#allocation7 + $0x314] sm:$0xf0]  ;;  %v5992_v18 = vld [vmem:[#allocation7 + $0xec] sm:$0xf]  ;;  %v4286_v20 = vor.u32 %v6027_v6, %v4283_v7  ;;  %v4403_v27 = vld [vmem:[#allocation7 + $0x2f8] sm:$0xf0] }
  0x52   :  { %852 = vmatpush.bf16.msrb.mxu0 %v4222_v25  ;;  %v5998_v23 = vld [vmem:[#allocation7 + $0x114] sm:$0xf0]  ;;  %v6056_v24 = vld [vmem:[#allocation7 + $0x2ec] sm:$0xf]  ;;  %v4034_v25 = vor.u32 %v5966_v14, %v4033_v10  ;;  %v4418_v26 = vor.u32 %v6062_v16, %v4417_v15  ;;  %v4275_v32 = vld [vmem:[#allocation7 + $0x1f8] sm:$0xf0] }
  0x53   :  { %903 = vmatpush.bf16.msra.mxu2 %v4242_v22  ;;  %v4161_v22 = vld [vmem:[#allocation7 + $0x108] sm:$0xf]  ;;  %v6054_v29 = vld [vmem:[#allocation7 + $0x2d4] sm:$0xf0]  ;;  %v4131_v35 = vld [vmem:[#allocation7 + $0xd8] sm:$0xf0]  ;;  %v4406_v36 = vor.u32 %v6056_v24, %v4403_v27 }
  0x54   :  { %890 = vmatpush.bf16.msra.mxu3 %v4114_v19  ;;  %v4147_v19 = vld [vmem:[#allocation7 + $0xf8] sm:$0xf0]  ;;  %v4162_v33 = vor.u32 %v5998_v23, %v4161_v22  ;;  %v6052_v38 = vld [vmem:[#allocation7 + $0x2cc] sm:$0xf]  ;;  %v4369_v41 = vld [vmem:[#allocation7 + $0x2a8] sm:$0xf] }
  0x55   :  { %865 = vmatpush.bf16.msrb.mxu1 %v4350_v28  ;;  %v4385_v28 = vld [vmem:[#allocation7 + $0x2c8] sm:$0xf]  ;;  %v4150_v30 = vor.u32 %v5992_v18, %v4147_v19  ;;  %v6050_v42 = vld [vmem:[#allocation7 + $0x2b4] sm:$0xf0]  ;;  %v6020_v44 = vld [vmem:[#allocation7 + $0x1cc] sm:$0xf] }
  0x56   :  { %853 = vmatpush.bf16.msrb.mxu0 %v4206_v37  ;;  %4424 = vmatmul.msk.bf16.vlgmr.msrb.gmra.mxu2 %vm780_vm0, %v6804_v9  ;;  %v4386_v37 = vor.u32 %v6054_v29, %v4385_v28  ;;  %v4259_v45 = vld [vmem:[#allocation7 + $0x1d8] sm:$0xf0]  ;;  %v6048_v50 = vld [vmem:[#allocation7 + $0x2ac] sm:$0xf]  ;;  %v4353_v53 = vld [vmem:[#allocation7 + $0x288] sm:$0xf] }
  0x57   :  { %904 = vmatpush.bf16.msra.mxu2 %v4226_v34  ;;  %v5988_v34 = vld [vmem:[#allocation7 + $0xcc] sm:$0xf]  ;;  %v4115_v47 = vld [vmem:[#allocation7 + $0xb8] sm:$0xf0]  ;;  %v4262_v51 = vor.u32 %v6020_v44, %v4259_v45  ;;  %v6046_v54 = vld [vmem:[#allocation7 + $0x294] sm:$0xf0] }
  0x58   :  { %891 = vmatpush.bf16.msra.mxu3 %v4098_v31  ;;  %v6024_v31 = vld [vmem:[#allocation7 + $0x1ec] sm:$0xf]  ;;  %v4243_v58 = vld [vmem:[#allocation7 + $0x1b8] sm:$0xf0]  ;;  %v6042_v5 = vld [vmem:[#allocation7 + $0x274] sm:$0xf0] }
  0x59   :  { %866 = vmatpush.bf16.msrb.mxu1 %v4334_v40  ;;  %v4278_v39 = vor.u32 %v6024_v31, %v4275_v32  ;;  %v4387_v40 = vld [vmem:[#allocation7 + $0x2d8] sm:$0xf0]  ;;  %v6016_v57 = vld [vmem:[#allocation7 + $0x1ac] sm:$0xf]  ;;  %v6038_v18 = vld [vmem:[#allocation7 + $0x254] sm:$0xf0] }
  0x5a   :  { %854 = vmatpush.bf16.msrb.mxu0 %v4190_v49  ;;  %v4390_v48 = vor.u32 %v6052_v38, %v4387_v40  ;;  %v4370_v49 = vor.u32 %v6050_v42, %v4369_v41  ;;  %v4099_v61 = vld [vmem:[#allocation7 + $0x98] sm:$0xf0]  ;;  %v6044_v1 = vld [vmem:[#allocation7 + $0x28c] sm:$0xf]  ;;  %v4246_v2 = vor.u32 %v6016_v57, %v4243_v58  ;;  %v4305_v29 = vld [vmem:[#allocation7 + $0x228] sm:$0xf] }
  0x5b   :  { %905 = vmatpush.bf16.msra.mxu2 %v4210_v46  ;;  %v5984_v46 = vld [vmem:[#allocation7 + $0xac] sm:$0xf]  ;;  %v4355_v3 = vld [vmem:[#allocation7 + $0x298] sm:$0xf0]  ;;  %v4289_v41 = vld [vmem:[#allocation7 + $0x208] sm:$0xf] }
  0x5c   :  { %892 = vmatpush.bf16.msra.mxu3 %v4082_v43  ;;  %v4134_v43 = vor.u32 %v5988_v34, %v4131_v35  ;;  %v6012_v7 = vld [vmem:[#allocation7 + $0x18c] sm:$0xf]  ;;  %v4083_v11 = vld [vmem:[#allocation7 + $0x78] sm:$0xf0]  ;;  %v4358_v12 = vor.u32 %v6044_v1, %v4355_v3  ;;  %v6030_v42 = vld [vmem:[#allocation7 + $0x214] sm:$0xf0] }
  0x5d   :  { %867 = vmatpush.bf16.msrb.mxu1 %v4318_v52  ;;  %v4371_v52 = vld [vmem:[#allocation7 + $0x2b8] sm:$0xf0]  ;;  %v5976_v10 = vld [vmem:[#allocation7 + $0x6c] sm:$0xf] }
  0x5e   :  { %855 = vmatpush.bf16.msrb.mxu0 %v4174_v63  ;;  %v4374_v62 = vor.u32 %v6048_v50, %v4371_v52  ;;  %v4354_v63 = vor.u32 %v6046_v54, %v4353_v53  ;;  %v6040_v14 = vld [vmem:[#allocation7 + $0x26c] sm:$0xf]  ;;  %v4339_v16 = vld [vmem:[#allocation7 + $0x278] sm:$0xf0]  ;;  %v4086_v19 = vor.u32 %v5976_v10, %v4083_v11  ;;  %v4541_v53 = vld [vmem:[#allocation10 + $0xe0] sm:$0xf] }
  0x5f   :  { %906 = vmatpush.bf16.msra.mxu2 %v4194_v59  ;;  %v5980_v59 = vld [vmem:[#allocation7 + $0x8c] sm:$0xf]  ;;  %v4067_v23 = vld [vmem:[#allocation7 + $0x58] sm:$0xf0]  ;;  %v4342_v24 = vor.u32 %v6040_v14, %v4339_v16  ;;  %v6093_v54 = vld [vmem:[#allocation10 + $0xec] sm:$0xf0] }
  0x60   :  { %893 = vmatpush.bf16.msra.mxu3 %v4066_v55  ;;  %v4118_v55 = vor.u32 %v5984_v46, %v4115_v47  ;;  %v4102_v6 = vor.u32 %v5980_v59, %v4099_v61  ;;  %v5972_v22 = vld [vmem:[#allocation7 + $0x4c] sm:$0xf]  ;;  %v4323_v28 = vld [vmem:[#allocation7 + $0x258] sm:$0xf0]  ;;  %v4669_v59 = vld [vmem:[#allocation10 + $0x1e0] sm:$0xf] }
  0x61   :  { %868 = vmatpush.bf16.msrb.mxu1 %v4302_v4  ;;  %v4337_v4 = vld [vmem:[#allocation7 + $0x268] sm:$0xf]  ;;  %v4070_v31 = vor.u32 %v5972_v22, %v4067_v23  ;;  %v6004_v32 = vld [vmem:[#allocation7 + $0x14c] sm:$0xf]  ;;  %v4051_v35 = vld [vmem:[#allocation7 + $0x38] sm:$0xf0] }
  0x62   :  { %856 = vmatpush.bf16.msrb.mxu0 %v4158_v17  ;;  %v4321_v17 = vld [vmem:[#allocation7 + $0x248] sm:$0xf]  ;;  %v5968_v34 = vld [vmem:[#allocation7 + $0x2c] sm:$0xf]  ;;  %v4179_v45 = vld [vmem:[#allocation7 + $0x138] sm:$0xf0] }
  0x63   :  { %907 = vmatpush.bf16.msra.mxu2 %v4178_v13  ;;  %v4338_v13 = vor.u32 %v6042_v5, %v4337_v4  ;;  %v6032_v38 = vld [vmem:[#allocation7 + $0x22c] sm:$0xf]  ;;  %v4054_v44 = vor.u32 %v5968_v34, %v4051_v35  ;;  %v4419_v47 = vld [vmem:[#allocation7 + $0x318] sm:$0xf0]  ;;  %v6125_v61 = vld [vmem:[#allocation10 + $0x1ec] sm:$0xf0] }
  0x64   :  { %894 = vmatpush.bf16.msra.mxu3 %v4050_v8  ;;  %v4227_v8 = vld [vmem:[#allocation7 + $0x198] sm:$0xf0]  ;;  %v6060_v46 = vld [vmem:[#allocation7 + $0x30c] sm:$0xf]  ;;  %v4525_v4 = vld [vmem:[#allocation10 + $0xc0] sm:$0xf] }
  0x65   :  { %869 = vmatpush.bf16.msrb.mxu1 %v4286_v20  ;;  %857 = vmatmul.bf16.vlgmr.msrb.gmra.mxu0 %v6812_v0  ;;  %v4230_v15 = vor.u32 %v6012_v7, %v4227_v8  ;;  %v6008_v20 = vld [vmem:[#allocation7 + $0x16c] sm:$0xf]  ;;  %v4291_v57 = vld [vmem:[#allocation7 + $0x218] sm:$0xf0]  ;;  %v4422_v58 = vor.u32 %v6060_v46, %v4419_v47  ;;  %v6089_v5 = vld [vmem:[#allocation10 + $0xcc] sm:$0xf0] }
  0x66   :  { %914 = vmatpush.bf16.msra.mxu0 %v4402_v21  ;;  %v4211_v21 = vld [vmem:[#allocation7 + $0x178] sm:$0xf0]  ;;  %v6028_v52 = vld [vmem:[#allocation7 + $0x20c] sm:$0xf]  ;;  %v4653_v8 = vld [vmem:[#allocation10 + $0x1c0] sm:$0xf]  ;;  %v4526_v11 = vor.u32 %v6089_v5, %v4525_v4 }
  0x67   :  { %908 = vmatpush.bf16.msra.mxu2 %v4162_v33  ;;  %v4214_v27 = vor.u32 %v6008_v20, %v4211_v21  ;;  %v4195_v33 = vld [vmem:[#allocation7 + $0x158] sm:$0xf0]  ;;  %v4294_v3 = vor.u32 %v6028_v52, %v4291_v57  ;;  %v6121_v10 = vld [vmem:[#allocation10 + $0x1cc] sm:$0xf0]  ;;  %v4621_v21 = vld [vmem:[#allocation10 + $0x180] sm:$0xf] }
  0x68   :  { %895 = vmatpush.bf16.msra.mxu3 %v4034_v25  ;;  %870 = vmatmul.bf16.vlgmr.msrb.gmra.mxu1 %v6808_v56  ;;  %v4322_v25 = vor.u32 %v6038_v18, %v4321_v17  ;;  %v4198_v40 = vor.u32 %v6004_v32, %v4195_v33  ;;  %v4163_v1 = vld [vmem:[#allocation7 + $0x118] sm:$0xf0]  ;;  %v4654_v14 = vor.u32 %v6121_v10, %v4653_v8  ;;  %v6117_v16 = vld [vmem:[#allocation10 + $0x1ac] sm:$0xf0]  ;;  %v4493_v18 = vld [vmem:[#allocation10 + $0x80] sm:$0xf] }
  0x69   :  { %934 = vmatpush.bf16.msra.mxu1 %v4418_v26  ;;  %v6036_v26 = vld [vmem:[#allocation7 + $0x24c] sm:$0xf]  ;;  %v6113_v22 = vld [vmem:[#allocation10 + $0x18c] sm:$0xf0]  ;;  %v4429_v34 = vld [vmem:[#allocation10] sm:$0xf] }
  0x6a   :  { %915 = vmatpush.bf16.msra.mxu0 %v4386_v37  ;;  %909 = vmatmul.bf16.vlgmr.msra.gmra.mxu2 %v6812_v0  ;;  %v6069_v32 = vld [vmem:[#allocation10 + $0x2c] sm:$0xf0]  ;;  %v4495_v46 = vld [vmem:[#allocation10 + $0x90] sm:$0xf0]  ;;  %v4589_v47 = vld [vmem:[#allocation10 + $0x140] sm:$0xf] }
  0x6b   :  { %966 = vmatpush.bf16.msrb.mxu2 %v4406_v36  ;;  %896 = vmatmul.bf16.vlgmr.msra.gmra.mxu3 %v6810_v60  ;;  %v4326_v36 = vor.u32 %v6036_v26, %v4323_v28  ;;  %v4605_v26 = vld [vmem:[#allocation10 + $0x160] sm:$0xf]  ;;  %v6065_v35 = vld [vmem:[#allocation10 + $0xc] sm:$0xf0]  ;;  %v4479_v52 = vld [vmem:[#allocation10 + $0x70] sm:$0xf0] }
  0x6c   :  { %940 = vmatpush.bf16.msrb.mxu3 %v4150_v30  ;;  %v6034_v30 = vld [vmem:[#allocation7 + $0x234] sm:$0xf0]  ;;  %v4461_v28 = vld [vmem:[#allocation10 + $0x40] sm:$0xf]  ;;  %v6123_v4 = vld [vmem:[#allocation10 + $0x1e4] sm:$0xf] }
  0x6d   :  { %953 = vmatpush.bf16.msrb.mxu1 %v4278_v39  ;;  %v4306_v37 = vor.u32 %v6034_v30, %v4305_v29  ;;  %v4307_v39 = vld [vmem:[#allocation7 + $0x238] sm:$0xf0]  ;;  %v6073_v29 = vld [vmem:[#allocation10 + $0x4c] sm:$0xf0]  ;;  %v4671_v5 = vld [vmem:[#allocation10 + $0x1f0] sm:$0xf0] }
  0x6e   :  { %916 = vmatpush.bf16.msra.mxu0 %v4370_v49  ;;  %v4035_v49 = vld [vmem:[#allocation7 + $0x18] sm:$0xf0]  ;;  %v4310_v50 = vor.u32 %v6032_v38, %v4307_v39  ;;  %v4462_v30 = vor.u32 %v6073_v29, %v4461_v28  ;;  %v4430_v38 = vor.u32 %v6065_v35, %v4429_v34  ;;  %v4674_v8 = vor.u32 %v6123_v4, %v4671_v5  ;;  %v4447_v10 = vld [vmem:[#allocation10 + $0x30] sm:$0xf0]  ;;  %v4925_v28 = vld [vmem:[#allocation10 + $0x3e0] sm:$0xf] }
  0x6f   :  { %967 = vmatpush.bf16.msrb.mxu2 %v4390_v48  ;;  %v5964_v48 = vld [vmem:[#allocation7 + $0xc] sm:$0xf]  ;;  %v6189_v29 = vld [vmem:[#allocation10 + $0x3ec] sm:$0xf0]  ;;  %v4685_v5 = vld [vmem:[#allocation10 + $0x200] sm:$0xf] }
  0x70   :  { %941 = vmatpush.bf16.msrb.mxu3 %v4134_v43  ;;  %v6000_v43 = vld [vmem:[#allocation7 + $0x12c] sm:$0xf]  ;;  %v6141_v34 = vld [vmem:[#allocation10 + $0x26c] sm:$0xf0] }
  0x71   :  { %954 = vmatpush.bf16.msrb.mxu1 %v4262_v51  ;;  %v4290_v51 = vor.u32 %v6030_v42, %v4289_v41  ;;  %v4527_v41 = vld [vmem:[#allocation10 + $0xd0] sm:$0xf0] }
  0x72   :  { %917 = vmatpush.bf16.msra.mxu0 %v4354_v63  ;;  %v5996_v63 = vld [vmem:[#allocation7 + $0x10c] sm:$0xf] }
  0x73   :  { %968 = vmatpush.bf16.msrb.mxu2 %v4374_v62  ;;  %v4038_v62 = vor.u32 %v5964_v48, %v4035_v49  ;;  %v4166_v7 = vor.u32 %v5996_v63, %v4163_v1  ;;  %v6105_v48 = vld [vmem:[#allocation10 + $0x14c] sm:$0xf0]  ;;  %v4557_v1 = vld [vmem:[#allocation10 + $0x100] sm:$0xf] }
  0x74   :  { %942 = vmatpush.bf16.msrb.mxu3 %v4118_v55  ;;  %v4182_v55 = vor.u32 %v6000_v43, %v4179_v45  ;;  %v4511_v43 = vld [vmem:[#allocation10 + $0xb0] sm:$0xf0]  ;;  %v6079_v45 = vld [vmem:[#allocation10 + $0x84] sm:$0xf]  ;;  %v4590_v49 = vor.u32 %v6105_v48, %v4589_v47  ;;  %v6181_v47 = vld [vmem:[#allocation10 + $0x3ac] sm:$0xf0] }
  0x75   :  { %955 = vmatpush.bf16.msrb.mxu1 %v4246_v2  ;;  %v4542_v2 = vor.u32 %v6093_v54, %v4541_v53  ;;  %v4573_v53 = vld [vmem:[#allocation10 + $0x120] sm:$0xf]  ;;  %v6101_v54 = vld [vmem:[#allocation10 + $0x12c] sm:$0xf0]  ;;  %v6103_v48 = vld [vmem:[#allocation10 + $0x144] sm:$0xf] }
  0x76   :  { %918 = vmatpush.bf16.msra.mxu0 %v4338_v13  ;;  %v6085_v13 = vld [vmem:[#allocation10 + $0xac] sm:$0xf0] }
  0x77   :  { %969 = vmatpush.bf16.msrb.mxu2 %v4358_v12  ;;  %v4509_v12 = vld [vmem:[#allocation10 + $0xa0] sm:$0xf] }
  0x78   :  { %943 = vmatpush.bf16.msrb.mxu3 %v4102_v6  ;;  %4425 = vmatmul.msk.bf16.vlgmr.msra.gmra.mxu1 %vm780_vm0, %v6804_v9  ;;  %v4670_v6 = vor.u32 %v6125_v61, %v4669_v59  ;;  %v4510_v17 = vor.u32 %v6085_v13, %v4509_v12  ;;  %v4463_v59 = vld [vmem:[#allocation10 + $0x50] sm:$0xf0]  ;;  %v4797_v61 = vld [vmem:[#allocation10 + $0x2e0] sm:$0xf]  ;;  %v6153_v12 = vld [vmem:[#allocation10 + $0x2cc] sm:$0xf0] }
  0x79   :  { %956 = vmatpush.bf16.msrb.mxu1 %v4230_v15  ;;  %v4637_v15 = vld [vmem:[#allocation10 + $0x1a0] sm:$0xf] }
  0x7a   :  { %919 = vmatpush.bf16.msra.mxu0 %v4322_v25  ;;  %v4638_v20 = vor.u32 %v6117_v16, %v4637_v15  ;;  %v6077_v25 = vld [vmem:[#allocation10 + $0x6c] sm:$0xf0]  ;;  %v4655_v15 = vld [vmem:[#allocation10 + $0x1d0] sm:$0xf0] }
  0x7b   :  { %970 = vmatpush.bf16.msrb.mxu2 %v4342_v24  ;;  %v4477_v24 = vld [vmem:[#allocation10 + $0x60] sm:$0xf] }
  0x7c   :  { %944 = vmatpush.bf16.msrb.mxu3 %v4086_v19  ;;  %v6081_v19 = vld [vmem:[#allocation10 + $0x8c] sm:$0xf0] }
  0x7d   :  { %957 = vmatpush.bf16.msrb.mxu1 %v4214_v27  ;;  %v4494_v23 = vor.u32 %v6081_v19, %v4493_v18  ;;  %v6109_v27 = vld [vmem:[#allocation10 + $0x16c] sm:$0xf0]  ;;  %v4431_v19 = vld [vmem:[#allocation10 + $0x10] sm:$0xf0] }
  0x7e   :  { %920 = vmatpush.bf16.msra.mxu0 %v4306_v37  ;;  %v4543_v37 = vld [vmem:[#allocation10 + $0xf0] sm:$0xf0] }
  0x7f   :  { %971 = vmatpush.bf16.msrb.mxu2 %v4326_v36  ;;  %v6091_v36 = vld [vmem:[#allocation10 + $0xe4] sm:$0xf] }
  0x80   :  { %945 = vmatpush.bf16.msrb.mxu3 %v4070_v31  ;;  %v4445_v31 = vld [vmem:[#allocation10 + $0x20] sm:$0xf]  ;;  %v4546_v39 = vor.u32 %v6091_v36, %v4543_v37 }
  0x81   :  { %958 = vmatpush.bf16.msrb.mxu1 %v4198_v40  ;;  %v4446_v33 = vor.u32 %v6069_v32, %v4445_v31  ;;  %v6087_v40 = vld [vmem:[#allocation10 + $0xc4] sm:$0xf]  ;;  %v4623_v31 = vld [vmem:[#allocation10 + $0x190] sm:$0xf0]  ;;  %v4909_v37 = vld [vmem:[#allocation10 + $0x3c0] sm:$0xf] }
  0x82   :  { %921 = vmatpush.bf16.msra.mxu0 %v4290_v51  ;;  %v4530_v42 = vor.u32 %v6087_v40, %v4527_v41  ;;  %v6075_v51 = vld [vmem:[#allocation10 + $0x64] sm:$0xf]  ;;  %v4607_v41 = vld [vmem:[#allocation10 + $0x170] sm:$0xf0] }
  0x83   :  { %972 = vmatpush.bf16.msrb.mxu2 %v4310_v50  ;;  %v4498_v50 = vor.u32 %v6079_v45, %v4495_v46  ;;  %v4482_v57 = vor.u32 %v6075_v51, %v4479_v52  ;;  %v6107_v40 = vld [vmem:[#allocation10 + $0x164] sm:$0xf]  ;;  %v4893_v46 = vld [vmem:[#allocation10 + $0x3a0] sm:$0xf]  ;;  %v4591_v51 = vld [vmem:[#allocation10 + $0x150] sm:$0xf0] }
  0x84   :  { %946 = vmatpush.bf16.msrb.mxu3 %v4054_v44  ;;  %v4594_v52 = vor.u32 %v6103_v48, %v4591_v51  ;;  %v6187_v51 = vld [vmem:[#allocation10 + $0x3e4] sm:$0xf] }
  0x85   :  { %959 = vmatpush.bf16.msrb.mxu1 %v4182_v55  ;;  %922 = vmatmul.bf16.vlgmr.msra.gmra.mxu0 %v6808_v56  ;;  %v4574_v55 = vor.u32 %v6101_v54, %v4573_v53  ;;  %v4701_v53 = vld [vmem:[#allocation10 + $0x220] sm:$0xf]  ;;  %v6133_v54 = vld [vmem:[#allocation10 + $0x22c] sm:$0xf0] }
  0x86   :  { %986 = vmatpush.bf16.msrb.mxu0 %v4422_v58  ;;  %v6071_v58 = vld [vmem:[#allocation10 + $0x44] sm:$0xf] }
  0x87   :  { %973 = vmatpush.bf16.msrb.mxu2 %v4294_v3 }
  0x88   :  { %947 = vmatpush.bf16.msrb.mxu3 %v4038_v62  ;;  %v6157_v62 = vld [vmem:[#allocation10 + $0x2ec] sm:$0xf0] }
  0x89   :  { %960 = vmatpush.bf16.msrb.mxu1 %v4166_v7  ;;  %v4798_v63 = vor.u32 %v6157_v62, %v4797_v61  ;;  %v6067_v7 = vld [vmem:[#allocation10 + $0x24] sm:$0xf]  ;;  %v6177_v61 = vld [vmem:[#allocation10 + $0x38c] sm:$0xf0] }
  0x8a   :  { %1791 = vmatpush.bf16.msra.mxu0 %v4670_v6  ;;  %974 = vmatmul.bf16.vlgmr.msrb.gmra.mxu2 %v6808_v56  ;;  %v4478_v56 = vor.u32 %v6077_v25, %v4477_v24  ;;  %v4466_v6 = vor.u32 %v6071_v58, %v4463_v59  ;;  %v4450_v16 = vor.u32 %v6067_v7, %v4447_v10  ;;  %v4639_v24 = vld [vmem:[#allocation10 + $0x1b0] sm:$0xf0]  ;;  %v4877_v59 = vld [vmem:[#allocation10 + $0x380] sm:$0xf]  ;;  %v6099_v62 = vld [vmem:[#allocation10 + $0x124] sm:$0xf] }
  0x8b   :  { %948 = vmatmul.bf16.vlgmr.msrb.gmra.mxu3 %v6810_v60  ;;  %v4622_v60 = vor.u32 %v6113_v22, %v4621_v21  ;;  %v6149_v21 = vld [vmem:[#allocation10 + $0x2ac] sm:$0xf0]  ;;  %v6155_v10 = vld [vmem:[#allocation10 + $0x2e4] sm:$0xf] }
  0x8c   :  { %1778 = vmatpush.bf16.msra.mxu3 %v4542_v2  ;;  %961 = vmatmul.bf16.vlgmr.msrb.gmra.mxu1 %v6812_v0  ;;  %v4606_v0 = vor.u32 %v6109_v27, %v4605_v26  ;;  %v6097_v2 = vld [vmem:[#allocation10 + $0x10c] sm:$0xf0]  ;;  %v4749_v26 = vld [vmem:[#allocation10 + $0x280] sm:$0xf] }
  0x8d   :  { %v4558_v3 = vor.u32 %v6097_v2, %v4557_v1  ;;  %1804 = vmatpush.bf16.msra.mxu1 %v4798_v63  ;;  %v6145_v27 = vld [vmem:[#allocation10 + $0x28c] sm:$0xf0]  ;;  %v4878_v2 = vor.u32 %v6177_v61, %v4877_v59  ;;  %v4501_v59 = vld [vmem:[#allocation10 + $0x88] sm:$0xf]  ;;  %v6082_v61 = vld [vmem:[#allocation10 + $0x94] sm:$0xf0] }
  0x8e   :  { %1792 = vmatpush.bf16.msra.mxu0 %v4654_v14  ;;  %v6119_v14 = vld [vmem:[#allocation10 + $0x1c4] sm:$0xf] }
  0x8f   :  { %v4658_v18 = vor.u32 %v6119_v14, %v4655_v15  ;;  %v6173_v14 = vld [vmem:[#allocation10 + $0x36c] sm:$0xf0]  ;;  %v6095_v15 = vld [vmem:[#allocation10 + $0x104] sm:$0xf] }
  0x90   :  { %1779 = vmatpush.bf16.msra.mxu3 %v4526_v11  ;;  %v4781_v11 = vld [vmem:[#allocation10 + $0x2c0] sm:$0xf] }
  0x91   :  { %v4782_v13 = vor.u32 %v6153_v12, %v4781_v11  ;;  %v4799_v11 = vld [vmem:[#allocation10 + $0x2f0] sm:$0xf0] }
  0x92   :  { %1793 = vmatpush.bf16.msra.mxu0 %v4638_v20  ;;  %v4765_v20 = vld [vmem:[#allocation10 + $0x2a0] sm:$0xf]  ;;  %v4802_v12 = vor.u32 %v6155_v10, %v4799_v11  ;;  %v6078_v10 = vld [vmem:[#allocation10 + $0x74] sm:$0xf0] }
  0x93   :  { %1805 = vmatpush.bf16.msra.mxu1 %v4782_v13  ;;  %v4766_v22 = vor.u32 %v6149_v21, %v4765_v20  ;;  %v4861_v13 = vld [vmem:[#allocation10 + $0x360] sm:$0xf]  ;;  %v4549_v21 = vld [vmem:[#allocation10 + $0xe8] sm:$0xf] }
  0x94   :  { %1780 = vmatpush.bf16.msra.mxu3 %v4510_v17  ;;  %v6063_v17 = vld [vmem:[#allocation10 + $0x4] sm:$0xf] }
  0x95   :  { %4426 = vmatmul.msk.bf16.vlgmr.msrb.gmra.mxu0 %vm780_vm0, %v6804_v9  ;;  %v6083_v9 = vld [vmem:[#allocation10 + $0xa4] sm:$0xf] }
  0x96   :  { %1794 = vmatpush.bf16.msra.mxu0 %v4622_v60  ;;  %v4514_v44 = vor.u32 %v6083_v9, %v4511_v43  ;;  %v4434_v60 = vor.u32 %v6063_v17, %v4431_v19  ;;  %v6834_v9 = vld [vmem:[#allocation8] sm:$0xf]  ;;  %v4717_v43 = vld [vmem:[#allocation10 + $0x240] sm:$0xf]  ;;  %v4862_v17 = vor.u32 %v6173_v14, %v4861_v13  ;;  %v6179_v13 = vld [vmem:[#allocation10 + $0x3a4] sm:$0xf] }
  0x97   :  { %1806 = vmatpush.bf16.msra.mxu1 %v4766_v22  ;;  %v6151_v22 = vld [vmem:[#allocation10 + $0x2c4] sm:$0xf]  ;;  %v4895_v14 = vld [vmem:[#allocation10 + $0x3b0] sm:$0xf0] }
  0x98   :  { %1781 = vmatpush.bf16.msra.mxu3 %v4494_v23  ;;  %v6115_v23 = vld [vmem:[#allocation10 + $0x1a4] sm:$0xf] }
  0x99   :  { %v4642_v25 = vor.u32 %v6115_v23, %v4639_v24  ;;  %v4783_v23 = vld [vmem:[#allocation10 + $0x2d0] sm:$0xf0] }
  0x9a   :  { %1795 = vmatpush.bf16.msra.mxu0 %v4606_v0  ;;  %v6111_v0 = vld [vmem:[#allocation10 + $0x184] sm:$0xf] }
  0x9b   :  { %v4626_v32 = vor.u32 %v6111_v0, %v4623_v31 }
  0x9c   :  { %1782 = vmatpush.bf16.msra.mxu3 %v4478_v56  ;;  %v4750_v56 = vor.u32 %v6145_v27, %v4749_v26  ;;  %v4786_v27 = vor.u32 %v6151_v22, %v4783_v23 }
  0x9e   :  { %1796 = vmatpush.bf16.msra.mxu0 %v4590_v49  ;;  %1807 = vmatpush.bf16.msra.mxu1 %v4750_v56  ;;  %v272_v49 = vperm.slane %v6834_v9, 0  ;;  %v4845_v56 = vld [vmem:[#allocation10 + $0x340] sm:$0xf] }
  0xa0   :  { %1783 = vmatpush.bf16.msra.mxu3 %v4462_v30  ;;  %v4926_v30 = vor.u32 %v6189_v29, %v4925_v28  ;;  %v6169_v28 = vld [vmem:[#allocation10 + $0x34c] sm:$0xf0] }
  0xa1   :  { %v4846_v0 = vor.u32 %v6169_v28, %v4845_v56 }
  0xa2   :  { %1797 = vmatpush.bf16.msra.mxu0 %v4574_v55  ;;  %1817 = vmatpush.bf16.msra.mxu2 %v4926_v30 }
  0xa4   :  { %1784 = vmatpush.bf16.msra.mxu3 %v4446_v33  ;;  %v4733_v33 = vld [vmem:[#allocation10 + $0x260] sm:$0xf] }
  0xa5   :  { %v4734_v36 = vor.u32 %v6141_v34, %v4733_v33  ;;  %v6147_v33 = vld [vmem:[#allocation10 + $0x2a4] sm:$0xf]  ;;  %v4767_v34 = vld [vmem:[#allocation10 + $0x2b0] sm:$0xf0] }
  0xa6   :  { %1798 = vmatpush.bf16.msra.mxu0 %v4558_v3  ;;  %v4575_v3 = vld [vmem:[#allocation10 + $0x130] sm:$0xf0] }
  0xa7   :  { %1808 = vmatpush.bf16.msra.mxu1 %v4734_v36  ;;  %v4578_v4 = vor.u32 %v6099_v62, %v4575_v3  ;;  %v4911_v3 = vld [vmem:[#allocation10 + $0x3d0] sm:$0xf0] }
  0xa8   :  { %1785 = vmatpush.bf16.msra.mxu3 %v4430_v38  ;;  %v6185_v38 = vld [vmem:[#allocation10 + $0x3cc] sm:$0xf0] }
  0xaa   :  { %1843 = vmatpush.bf16.msrb.mxu0 %v4674_v8 }
  0xac   :  { %1830 = vmatpush.bf16.msrb.mxu3 %v4546_v39  ;;  %v4910_v39 = vor.u32 %v6185_v38, %v4909_v37  ;;  %v6090_v37 = vld [vmem:[#allocation10 + $0xd4] sm:$0xf0]  ;;  %v4829_v38 = vld [vmem:[#allocation10 + $0x320] sm:$0xf] }
  0xae   :  { %1844 = vmatpush.bf16.msrb.mxu0 %v4658_v18  ;;  %1818 = vmatpush.bf16.msra.mxu2 %v4910_v39  ;;  %v4559_v18 = vld [vmem:[#allocation10 + $0x110] sm:$0xf0]  ;;  %v6165_v39 = vld [vmem:[#allocation10 + $0x32c] sm:$0xf0] }
  0xaf   :  { %v4562_v20 = vor.u32 %v6095_v15, %v4559_v18  ;;  %v4898_v15 = vor.u32 %v6179_v13, %v4895_v14  ;;  %v4703_v18 = vld [vmem:[#allocation10 + $0x230] sm:$0xf0]  ;;  %v4519_v14 = vld [vmem:[#allocation10 + $0xb8] sm:$0xf0] }
  0xb0   :  { %1831 = vmatpush.bf16.msrb.mxu3 %v4530_v42  ;;  %v4610_v42 = vor.u32 %v6107_v40, %v4607_v41  ;;  %v4830_v41 = vor.u32 %v6165_v39, %v4829_v38  ;;  %v4863_v38 = vld [vmem:[#allocation10 + $0x370] sm:$0xf0] }
  0xb2   :  { %1845 = vmatpush.bf16.msrb.mxu0 %v4642_v25  ;;  %v6094_v25 = vld [vmem:[#allocation10 + $0xf4] sm:$0xf0] }
  0xb3   :  { %v4550_v31 = vor.u32 %v6094_v25, %v4549_v21  ;;  %v6074_v21 = vld [vmem:[#allocation10 + $0x54] sm:$0xf0] }
  0xb4   :  { %1832 = vmatpush.bf16.msrb.mxu3 %v4514_v44  ;;  %v6832_v35 = vpop.f32.mrf.mxu3  ;;  %v6137_v44 = vld [vmem:[#allocation10 + $0x24c] sm:$0xf0] }
  0xb5   :  { %v4718_v45 = vor.u32 %v6137_v44, %v4717_v43  ;;  %v6086_v44 = vld [vmem:[#allocation10 + $0xb4] sm:$0xf0] }
  0xb6   :  { %1846 = vmatpush.bf16.msrb.mxu0 %v4626_v32  ;;  %v4533_v32 = vld [vmem:[#allocation10 + $0xc8] sm:$0xf] }
  0xb7   :  { %1809 = vmatpush.bf16.msra.mxu1 %v4718_v45  ;;  %v4534_v43 = vor.u32 %v6090_v37, %v4533_v32  ;;  %v6143_v45 = vld [vmem:[#allocation10 + $0x284] sm:$0xf]  ;;  %v4677_v32 = vld [vmem:[#allocation10 + $0x1e8] sm:$0xf]  ;;  %v6126_v37 = vld [vmem:[#allocation10 + $0x1f4] sm:$0xf0] }
  0xb8   :  { %1833 = vmatpush.bf16.msrb.mxu3 %v4498_v50  ;;  %v4894_v50 = vor.u32 %v6181_v47, %v4893_v46  ;;  %v4751_v46 = vld [vmem:[#allocation10 + $0x290] sm:$0xf0] }
  0xb9   :  { %v4754_v48 = vor.u32 %v6143_v45, %v4751_v46  ;;  %v4661_v46 = vld [vmem:[#allocation10 + $0x1c8] sm:$0xf] }
  0xba   :  { %1847 = vmatpush.bf16.msrb.mxu0 %v4610_v42  ;;  %1819 = vmatpush.bf16.msra.mxu2 %v4894_v50  ;;  %v4517_v42 = vld [vmem:[#allocation10 + $0xa8] sm:$0xf]  ;;  %v6161_v50 = vld [vmem:[#allocation10 + $0x30c] sm:$0xf0] }
  0xbc   :  { %1834 = vmatpush.bf16.msrb.mxu3 %v4482_v57  ;;  %v834_v55 = vpop.f32.mrf.mxu3  ;;  %v4702_v57 = vor.u32 %v6133_v54, %v4701_v53  ;;  %v4927_v53 = vld [vmem:[#allocation10 + $0x3f0] sm:$0xf0] }
  0xbd   :  { %v4930_v54 = vor.u32 %v6187_v51, %v4927_v53  ;;  %v4518_v55 = vor.u32 %v6086_v44, %v4517_v42  ;;  %v4437_v42 = vld [vmem:[#allocation10 + $0x8] sm:$0xf]  ;;  %v4678_v44 = vor.u32 %v6126_v37, %v4677_v32  ;;  %v6167_v53 = vld [vmem:[#allocation10 + $0x344] sm:$0xf] }
  0xbe   :  { %1848 = vmatpush.bf16.msrb.mxu0 %v4594_v52  ;;  %1810 = vmatpush.bf16.msra.mxu1 %v4702_v57  ;;  %v6139_v57 = vld [vmem:[#allocation10 + $0x264] sm:$0xf] }
  0xbf   :  { %1820 = vmatpush.bf16.msra.mxu2 %v4878_v2  ;;  %v6183_v2 = vld [vmem:[#allocation10 + $0x3c4] sm:$0xf] }
  0xc0   :  { %1835 = vmatpush.bf16.msrb.mxu3 %v4466_v6  ;;  %v6129_v6 = vld [vmem:[#allocation10 + $0x20c] sm:$0xf0] }
  0xc1   :  { %v4686_v8 = vor.u32 %v6129_v6, %v4685_v5  ;;  %v4502_v5 = vor.u32 %v6082_v61, %v4501_v59  ;;  %v6135_v6 = vld [vmem:[#allocation10 + $0x244] sm:$0xf] }
  0xc2   :  { %v793_v58 = vpop.f32.mrf.mxu0  ;;  %1849 = vmatpush.bf16.msrb.mxu0 %v4578_v4  ;;  %v4914_v4 = vor.u32 %v6183_v2, %v4911_v3  ;;  %v4535_v2 = vld [vmem:[#allocation10 + $0xd8] sm:$0xf0]  ;;  %v6163_v3 = vld [vmem:[#allocation10 + $0x324] sm:$0xf] }
  0xc3   :  { %v794_v63 = vadd.f32 %v793_v58, %v272_v49  ;;  %1811 = vmatpush.bf16.msra.mxu1 %v4686_v8  ;;  %1821 = vmatpush.bf16.msra.mxu2 %v4862_v17  ;;  %v4813_v49 = vld [vmem:[#allocation10 + $0x300] sm:$0xf]  ;;  %v4735_v58 = vld [vmem:[#allocation10 + $0x270] sm:$0xf0]  ;;  %v4485_v8 = vld [vmem:[#allocation10 + $0x68] sm:$0xf] }
  0xc4   :  { %1836 = vmatpush.bf16.msrb.mxu3 %v4450_v16  ;;  %v4814_v52 = vor.u32 %v6161_v50, %v4813_v49  ;;  %v4738_v62 = vor.u32 %v6139_v57, %v4735_v58  ;;  %v6131_v17 = vld [vmem:[#allocation10 + $0x224] sm:$0xf] }
  0xc5   :  { %v806_v1 = vpop.f32.mrf.mxu1  ;;  %v4706_v22 = vor.u32 %v6131_v17, %v4703_v18 }
  0xc6   :  { %v807_v7 = vadd.f32 %v806_v1, %v794_v63  ;;  %1850 = vmatpush.bf16.msrb.mxu0 %v4562_v20  ;;  %v273_v63 = vperm.slane %v6834_v9, 1  ;;  %v4469_v20 = vld [vmem:[#allocation10 + $0x48] sm:$0xf] }
  0xc7   :  { %1856 = vmatpush.bf16.msrb.mxu1 %v4802_v12  ;;  %1822 = vmatpush.bf16.msra.mxu2 %v4846_v0  ;;  %v4470_v28 = vor.u32 %v6074_v21, %v4469_v20  ;;  %v4687_v0 = vld [vmem:[#allocation10 + $0x210] sm:$0xf0] }
  0xc8   :  { %1837 = vmatpush.bf16.msrb.mxu3 %v4434_v60 }
  0xc9   :  { %v819_v16 = vpop.f32.mrf.mxu2 }
  0xca   :  { %v820_v19 = vadd.f32 %v819_v16, %v807_v7  ;;  %v795_v60 = vpop.f32.mrf.mxu0  ;;  %v4719_v7 = vld [vmem:[#allocation10 + $0x250] sm:$0xf0]  ;;  %v4486_v16 = vor.u32 %v6078_v10, %v4485_v8  ;;  %v4629_v8 = vld [vmem:[#allocation10 + $0x188] sm:$0xf]  ;;  %v6114_v10 = vld [vmem:[#allocation10 + $0x194] sm:$0xf0] }
  0xcb   :  { %1857 = vmatpush.bf16.msrb.mxu1 %v4786_v27  ;;  %1823 = vmatpush.bf16.msra.mxu2 %v4830_v41  ;;  %v4722_v11 = vor.u32 %v6135_v6, %v4719_v7  ;;  %v6175_v60 = vld [vmem:[#allocation10 + $0x384] sm:$0xf]  ;;  %v4879_v27 = vld [vmem:[#allocation10 + $0x390] sm:$0xf0]  ;;  %v4630_v20 = vor.u32 %v6114_v10, %v4629_v8 }
  0xcc   :  { %v833_v24 = vadd.f32 %v6832_v35, %v820_v19  ;;  %v4770_v35 = vor.u32 %v6147_v33, %v4767_v34 }
  0xcd   :  { %v808_v29 = vpop.f32.mrf.mxu1 }
  0xce   :  { %v845_v26 = vpop.f32.mrf.mxu3  ;;  %v992_v30 = vmax.f32 %v833_v24, 0.0  ;;  %v6127_v29 = vld [vmem:[#allocation10 + $0x204] sm:$0xf] }
  0xcf   :  { %1858 = vmatpush.bf16.msrb.mxu1 %v4770_v35  ;;  %1824 = vmatpush.bf16.msra.mxu2 %v4814_v52  ;;  %v846_v12 = vadd.f32 %v845_v26, %v273_v63  ;;  %v4882_v26 = vor.u32 %v6175_v60, %v4879_v27  ;;  %v4690_v33 = vor.u32 %v6127_v29, %v4687_v0  ;;  %v6171_v35 = vld [vmem:[#allocation10 + $0x364] sm:$0xf]  ;;  %v4551_v52 = vld [vmem:[#allocation10 + $0xf8] sm:$0xf0]  ;;  %v6118_v63 = vld [vmem:[#allocation10 + $0x1b4] sm:$0xf0] }
  0xd0   :  { %v6838_v36 = vpack.c.bf16 %v992_v30, %v992_v30  ;;  %v4453_v30 = vld [vmem:[#allocation10 + $0x28] sm:$0xf]  ;;  %v4866_v39 = vor.u32 %v6171_v35, %v4863_v38  ;;  %v6106_v29 = vld [vmem:[#allocation10 + $0x154] sm:$0xf0]  ;;  %v6076_v0 = vld [vmem:[#allocation10 + $0x6c] sm:$0xf] }
  0xd1   :  { %v821_v40 = vpop.f32.mrf.mxu2  ;;  %v6102_v35 = vld [vmem:[#allocation10 + $0x134] sm:$0xf0]  ;;  %v6072_v38 = vld [vmem:[#allocation10 + $0x4c] sm:$0xf] }
  0xd2   :  { %1786 = vmatmul.bf16.vlgmr.msra.gmra.mxu3 %v6838_v36 }
  0xd3   :  { %1882 = vmatpush.bf16.msra.mxu3 %v4550_v31  ;;  %1859 = vmatpush.bf16.msrb.mxu1 %v4754_v48  ;;  %v6070_v31 = vld [vmem:[#allocation10 + $0x34] sm:$0xf0]  ;;  %v6092_v48 = vld [vmem:[#allocation10 + $0xec] sm:$0xf] }
  0xd4   :  { %1869 = vmatpush.bf16.msrb.mxu2 %v4930_v54  ;;  %v4454_v41 = vor.u32 %v6070_v31, %v4453_v30  ;;  %v4847_v54 = vld [vmem:[#allocation10 + $0x350] sm:$0xf0]  ;;  %v4554_v61 = vor.u32 %v6092_v48, %v4551_v52  ;;  %v4487_v30 = vld [vmem:[#allocation10 + $0x78] sm:$0xf0]  ;;  %v6068_v48 = vld [vmem:[#allocation10 + $0x2c] sm:$0xf] }
  0xd5   :  { %v4850_v57 = vor.u32 %v6167_v53, %v4847_v54  ;;  %v275_v53 = vperm.slane %v6834_v9, 3  ;;  %v6124_v54 = vld [vmem:[#allocation10 + $0x1ec] sm:$0xf] }
  0xd6   :  { %v847_v47 = vpop.f32.mrf.mxu3 }
  0xd7   :  { %1883 = vmatpush.bf16.msra.mxu3 %v4534_v43  ;;  %1860 = vmatpush.bf16.msrb.mxu1 %v4738_v62  ;;  %v6066_v43 = vld [vmem:[#allocation10 + $0x14] sm:$0xf0]  ;;  %v4645_v62 = vld [vmem:[#allocation10 + $0x1a8] sm:$0xf] }
  0xd8   :  { %1870 = vmatpush.bf16.msrb.mxu2 %v4914_v4  ;;  %v6122_v47 = vld [vmem:[#allocation10 + $0x1d4] sm:$0xf0]  ;;  %v4438_v58 = vor.u32 %v6066_v43, %v4437_v42  ;;  %v4831_v4 = vld [vmem:[#allocation10 + $0x330] sm:$0xf0]  ;;  %v4646_v6 = vor.u32 %v6118_v63, %v4645_v62  ;;  %v4789_v62 = vld [vmem:[#allocation10 + $0x2c8] sm:$0xf] }
  0xd9   :  { %v884_v1 = vpop.f32.mrf.mxu2  ;;  %v4662_v59 = vor.u32 %v6122_v47, %v4661_v46  ;;  %v4565_v46 = vld [vmem:[#allocation10 + $0x108] sm:$0xf]  ;;  %v6098_v47 = vld [vmem:[#allocation10 + $0x114] sm:$0xf0] }
  0xda   :  { %v6154_v63 = vld [vmem:[#allocation10 + $0x2d4] sm:$0xf0] }
  0xdb   :  { %1884 = vmatpush.bf16.msra.mxu3 %v4518_v55  ;;  %1861 = vmatpush.bf16.msrb.mxu1 %v4722_v11  ;;  %v6084_v11 = vld [vmem:[#allocation10 + $0xac] sm:$0xf]  ;;  %v4790_v10 = vor.u32 %v6154_v63, %v4789_v62  ;;  %v4583_v62 = vld [vmem:[#allocation10 + $0x138] sm:$0xf0] }
  0xdc   :  { %1871 = vmatpush.bf16.msrb.mxu2 %v4898_v15  ;;  %v6159_v15 = vld [vmem:[#allocation10 + $0x304] sm:$0xf]  ;;  %v4522_v21 = vor.u32 %v6084_v11, %v4519_v14  ;;  %v6150_v14 = vld [vmem:[#allocation10 + $0x2b4] sm:$0xf0] }
  0xdf   :  { %1885 = vmatpush.bf16.msra.mxu3 %v4502_v5  ;;  %1862 = vmatpush.bf16.msrb.mxu1 %v4706_v22  ;;  %v4834_v5 = vor.u32 %v6163_v3, %v4831_v4  ;;  %v4613_v22 = vld [vmem:[#allocation10 + $0x168] sm:$0xf]  ;;  %v6064_v4 = vld [vmem:[#allocation10 + $0xc] sm:$0xf] }
  0xe0   :  { %1872 = vmatpush.bf16.msrb.mxu2 %v4882_v26 }
  0xe1   :  { %v886_v25 = vpop.f32.mrf.mxu2 }
  0xe2   :  { %v858_v19 = vpop.f32.mrf.mxu0  ;;  %1838 = vmatmul.bf16.vlgmr.msrb.gmra.mxu3 %v6838_v36  ;;  %v4503_v25 = vld [vmem:[#allocation10 + $0x98] sm:$0xf0] }
  0xe3   :  { %v859_v23 = vadd.f32 %v858_v19, %v846_v12  ;;  %1886 = vmatpush.bf16.msra.mxu3 %v4486_v16  ;;  %1863 = vmatpush.bf16.msrb.mxu1 %v4690_v33  ;;  %v4815_v16 = vld [vmem:[#allocation10 + $0x310] sm:$0xf0]  ;;  %v274_v19 = vperm.slane %v6834_v9, 2  ;;  %v4490_v33 = vor.u32 %v6076_v0, %v4487_v30  ;;  %v6120_v9 = vld [vmem:[#allocation10 + $0x1cc] sm:$0xf] }
  0xe4   :  { %1873 = vmatpush.bf16.msrb.mxu2 %v4866_v39  ;;  %v4818_v18 = vor.u32 %v6159_v15, %v4815_v16  ;;  %v4471_v39 = vld [vmem:[#allocation10 + $0x58] sm:$0xf0] }
  0xe5   :  { %v871_v24 = vpop.f32.mrf.mxu1  ;;  %v4474_v43 = vor.u32 %v6072_v38, %v4471_v39  ;;  %v6186_v38 = vld [vmem:[#allocation10 + $0x3d4] sm:$0xf0]  ;;  %v6108_v39 = vld [vmem:[#allocation10 + $0x16c] sm:$0xf] }
  0xe6   :  { %v872_v56 = vadd.f32 %v871_v24, %v859_v23  ;;  %v6110_v23 = vld [vmem:[#allocation10 + $0x174] sm:$0xf0]  ;;  %v6080_v24 = vld [vmem:[#allocation10 + $0x8c] sm:$0xf] }
  0xe7   :  { %1887 = vmatpush.bf16.msra.mxu3 %v4470_v28  ;;  %v4614_v27 = vor.u32 %v6110_v23, %v4613_v22  ;;  %v4506_v26 = vor.u32 %v6080_v24, %v4503_v25  ;;  %v6146_v22 = vld [vmem:[#allocation10 + $0x294] sm:$0xf0] }
  0xe8   :  { %v885_v34 = vadd.f32 %v884_v1, %v872_v56  ;;  %v6088_v1 = vld [vmem:[#allocation10 + $0xcc] sm:$0xf]  ;;  %1874 = vmatpush.bf16.msrb.mxu2 %v4850_v57  ;;  %v4597_v56 = vld [vmem:[#allocation10 + $0x148] sm:$0xf] }
  0xe9   :  { %v4538_v7 = vor.u32 %v6088_v1, %v4535_v2  ;;  %v4598_v32 = vor.u32 %v6106_v29, %v4597_v56  ;;  %v6112_v56 = vld [vmem:[#allocation10 + $0x18c] sm:$0xf] }
  0xea   :  { %v993_v40 = vmax.f32 %v885_v34, 0.0  ;;  %v860_v45 = vpop.f32.mrf.mxu0  ;;  %v4581_v34 = vld [vmem:[#allocation10 + $0x128] sm:$0xf] }
  0xeb   :  { %1888 = vmatpush.bf16.msra.mxu3 %v4454_v41  ;;  %v4582_v42 = vor.u32 %v6102_v35, %v4581_v34  ;;  %v6158_v45 = vld [vmem:[#allocation10 + $0x2f4] sm:$0xf0] }
  0xec   :  { %v6843_v49 = vpack.c.bf16 %v993_v40, %v993_v40  ;;  %1875 = vmatpush.bf16.msrb.mxu2 %v4834_v5  ;;  %v4439_v5 = vld [vmem:[#allocation10 + $0x18] sm:$0xf0] }
  0xed   :  { %v873_v50 = vpop.f32.mrf.mxu1  ;;  %v910_v55 = vpop.f32.mrf.mxu2 }
  0xee   :  { %v897_v51 = vpop.f32.mrf.mxu3  ;;  %1799 = vmatmul.bf16.vlgmr.msra.gmra.mxu0 %v6843_v49  ;;  %v4455_v50 = vld [vmem:[#allocation10 + $0x38] sm:$0xf0] }
  0xef   :  { %1895 = vmatpush.bf16.msra.mxu0 %v4678_v44  ;;  %1889 = vmatpush.bf16.msra.mxu3 %v4438_v58  ;;  %v898_v60 = vadd.f32 %v897_v51, %v274_v19  ;;  %v4805_v44 = vld [vmem:[#allocation10 + $0x2e8] sm:$0xf]  ;;  %v4647_v19 = vld [vmem:[#allocation10 + $0x1b8] sm:$0xf0] }
  0xf0   :  { %1876 = vmatpush.bf16.msrb.mxu2 %v4818_v18  ;;  %v4806_v57 = vor.u32 %v6158_v45, %v4805_v44  ;;  %v6116_v18 = vld [vmem:[#allocation10 + $0x1ac] sm:$0xf] }
  0xf1   :  { %v911_v31 = vadd.f32 %v910_v55, %v898_v60  ;;  %v4679_v55 = vld [vmem:[#allocation10 + $0x1f8] sm:$0xf0]  ;;  %v4650_v25 = vor.u32 %v6116_v18, %v4647_v19  ;;  %v4933_v60 = vld [vmem:[#allocation10 + $0x3e8] sm:$0xf]  ;;  %v6152_v18 = vld [vmem:[#allocation10 + $0x2cc] sm:$0xf] }
  0xf2   :  { %1890 = vmatmul.bf16.vlgmr.msra.gmra.mxu3 %v6838_v36  ;;  %v4682_v3 = vor.u32 %v6124_v54, %v4679_v55  ;;  %v4791_v19 = vld [vmem:[#allocation10 + $0x2d8] sm:$0xf0] }
  0xf3   :  { %1896 = vmatpush.bf16.msra.mxu0 %v4662_v59  ;;  %1934 = vmatpush.bf16.msrb.mxu3 %v4554_v61  ;;  %v4566_v59 = vor.u32 %v6098_v47, %v4565_v46  ;;  %v4458_v61 = vor.u32 %v6068_v48, %v4455_v50  ;;  %v4901_v46 = vld [vmem:[#allocation10 + $0x3a8] sm:$0xf]  ;;  %v6182_v47 = vld [vmem:[#allocation10 + $0x3b4] sm:$0xf0]  ;;  %v6104_v48 = vld [vmem:[#allocation10 + $0x14c] sm:$0xf] }
  0xf4   :  { %v4599_v50 = vld [vmem:[#allocation10 + $0x158] sm:$0xf0]  ;;  %v4902_v54 = vor.u32 %v6182_v47, %v4901_v46  ;;  %v6249_v47 = vld [vmem:[#allocation11 + $0x1cc] sm:$0xf0] }
  0xf5   :  { %v936_v12 = vpop.f32.mrf.mxu1  ;;  %v912_v17 = vpop.f32.mrf.mxu2  ;;  %v4602_v55 = vor.u32 %v6104_v48, %v4599_v50 }
  0xf6   :  { %v899_v13 = vpop.f32.mrf.mxu3 }
  0xf7   :  { %1897 = vmatpush.bf16.msra.mxu0 %v4646_v6  ;;  %1935 = vmatpush.bf16.msrb.mxu3 %v4538_v7  ;;  %v4663_v7 = vld [vmem:[#allocation10 + $0x1d8] sm:$0xf0]  ;;  %v4773_v13 = vld [vmem:[#allocation10 + $0x2a8] sm:$0xf] }
  0xf8   :  { %v4666_v15 = vor.u32 %v6120_v9, %v4663_v7  ;;  %v4869_v9 = vld [vmem:[#allocation10 + $0x368] sm:$0xf]  ;;  %v6174_v7 = vld [vmem:[#allocation10 + $0x374] sm:$0xf0] }
  0xfb   :  { %1898 = vmatpush.bf16.msra.mxu0 %v4630_v20  ;;  %1936 = vmatpush.bf16.msrb.mxu3 %v4522_v21  ;;  %v4774_v20 = vor.u32 %v6150_v14, %v4773_v13  ;;  %v4757_v21 = vld [vmem:[#allocation10 + $0x288] sm:$0xf] }
  0xfc   :  { %v4758_v0 = vor.u32 %v6146_v22, %v4757_v21  ;;  %v6170_v21 = vld [vmem:[#allocation10 + $0x354] sm:$0xf0]  ;;  %v5037_v22 = vld [vmem:[#allocation11 + $0xc0] sm:$0xf] }
  0xfd   :  { %v938_v28 = vpop.f32.mrf.mxu1 }
  0xfe   :  { %1851 = vmatmul.bf16.vlgmr.msrb.gmra.mxu0 %v6843_v49  ;;  %v4631_v28 = vld [vmem:[#allocation10 + $0x198] sm:$0xf0] }
  0xff   :  { %1899 = vmatpush.bf16.msra.mxu0 %v4614_v27  ;;  %1937 = vmatpush.bf16.msrb.mxu3 %v4506_v26  ;;  %v6190_v26 = vld [vmem:[#allocation10 + $0x3f4] sm:$0xf0]  ;;  %v4634_v34 = vor.u32 %v6112_v56, %v4631_v28  ;;  %v4837_v56 = vld [vmem:[#allocation10 + $0x328] sm:$0xf] }
 0x100   :  { %v6166_v28 = vld [vmem:[#allocation10 + $0x334] sm:$0xf0] }
 0x102   :  { %v923_v37 = vpop.f32.mrf.mxu0 }
 0x103   :  { %v924_v40 = vadd.f32 %v923_v37, %v911_v31  ;;  %1900 = vmatpush.bf16.msra.mxu0 %v4598_v32  ;;  %1938 = vmatpush.bf16.msrb.mxu3 %v4490_v33  ;;  %v4741_v31 = vld [vmem:[#allocation10 + $0x268] sm:$0xf]  ;;  %v6142_v32 = vld [vmem:[#allocation10 + $0x274] sm:$0xf0]  ;;  %v4934_v33 = vor.u32 %v6190_v26, %v4933_v60  ;;  %v6148_v60 = vld [vmem:[#allocation10 + $0x2ac] sm:$0xf] }
 0x104   :  { %v4917_v37 = vld [vmem:[#allocation10 + $0x3c8] sm:$0xf]  ;;  %v4775_v26 = vld [vmem:[#allocation10 + $0x2b8] sm:$0xf0] }
 0x105   :  { %v937_v41 = vadd.f32 %v936_v12, %v924_v40  ;;  %v4442_v12 = vor.u32 %v6064_v4, %v4439_v5  ;;  %v4615_v40 = vld [vmem:[#allocation10 + $0x178] sm:$0xf0]  ;;  %v4918_v44 = vor.u32 %v6186_v38, %v4917_v37  ;;  %v4838_v38 = vor.u32 %v6166_v28, %v4837_v56  ;;  %v6172_v56 = vld [vmem:[#allocation10 + $0x36c] sm:$0xf] }
 0x106   :  { %v4618_v45 = vor.u32 %v6108_v39, %v4615_v40  ;;  %v4807_v4 = vld [vmem:[#allocation10 + $0x2f8] sm:$0xf0]  ;;  %v4821_v40 = vld [vmem:[#allocation10 + $0x308] sm:$0xf] }
 0x107   :  { %v994_v51 = vmax.f32 %v937_v41, 0.0  ;;  %1901 = vmatpush.bf16.msra.mxu0 %v4582_v42  ;;  %1939 = vmatpush.bf16.msrb.mxu3 %v4474_v43  ;;  %v4742_v41 = vor.u32 %v6142_v32, %v4741_v31  ;;  %v4725_v42 = vld [vmem:[#allocation10 + $0x248] sm:$0xf]  ;;  %v6138_v43 = vld [vmem:[#allocation10 + $0x254] sm:$0xf0] }
 0x108   :  { %v6253_v32 = vld [vmem:[#allocation11 + $0x1ec] sm:$0xf0]  ;;  %v4759_v39 = vld [vmem:[#allocation10 + $0x298] sm:$0xf0] }
 0x109   :  { %v962_v52 = vpop.f32.mrf.mxu1  ;;  %v6850_v58 = vpack.c.bf16 %v994_v51, %v994_v51  ;;  %v4726_v51 = vor.u32 %v6138_v43, %v4725_v42  ;;  %v5005_v42 = vld [vmem:[#allocation11 + $0x80] sm:$0xf]  ;;  %v6209_v43 = vld [vmem:[#allocation11 + $0x8c] sm:$0xf0]  ;;  %v4871_v28 = vld [vmem:[#allocation10 + $0x378] sm:$0xf0] }
 0x10a   :  { %v925_v2 = vpop.f32.mrf.mxu0  ;;  %v5006_v46 = vor.u32 %v6209_v43, %v5005_v42  ;;  %v6168_v43 = vld [vmem:[#allocation10 + $0x34c] sm:$0xf] }
 0x10b   :  { %1812 = vmatmul.bf16.vlgmr.msra.gmra.mxu1 %v6850_v58  ;;  %1902 = vmatpush.bf16.msra.mxu0 %v4566_v59  ;;  %v6178_v59 = vld [vmem:[#allocation10 + $0x394] sm:$0xf0] }
 0x10c   :  { %1908 = vmatpush.bf16.msra.mxu1 %v4806_v57  ;;  %1940 = vmatpush.bf16.msrb.mxu3 %v4458_v61  ;;  %v4885_v57 = vld [vmem:[#allocation10 + $0x388] sm:$0xf]  ;;  %v6100_v61 = vld [vmem:[#allocation10 + $0x12c] sm:$0xf]  ;;  %v6130_v2 = vld [vmem:[#allocation10 + $0x214] sm:$0xf0] }
 0x10d   :  { %v975_v8 = vpop.f32.mrf.mxu2  ;;  %v4886_v5 = vor.u32 %v6178_v59, %v4885_v57  ;;  %v5149_v57 = vld [vmem:[#allocation11 + $0x1a0] sm:$0xf]  ;;  %v6184_v59 = vld [vmem:[#allocation10 + $0x3cc] sm:$0xf] }
 0x10e   :  { %v949_v1 = vpop.f32.mrf.mxu3  ;;  %1903 = vmatmul.bf16.vlgmr.msra.gmra.mxu0 %v6843_v49 }
 0x10f   :  { %v950_v6 = vadd.f32 %v949_v1, %v275_v53  ;;  %1947 = vmatpush.bf16.msrb.mxu0 %v4682_v3  ;;  %v6134_v53 = vld [vmem:[#allocation10 + $0x234] sm:$0xf0]  ;;  %v4693_v1 = vld [vmem:[#allocation10 + $0x208] sm:$0xf]  ;;  %v6156_v3 = vld [vmem:[#allocation10 + $0x2ec] sm:$0xf] }
 0x110   :  { %1909 = vmatpush.bf16.msra.mxu1 %v4790_v10  ;;  %1941 = vmatpush.bf16.msrb.mxu3 %v4442_v12  ;;  %v4567_v10 = vld [vmem:[#allocation10 + $0x118] sm:$0xf0]  ;;  %v6221_v12 = vld [vmem:[#allocation11 + $0xec] sm:$0xf0]  ;;  %v4694_v13 = vor.u32 %v6130_v2, %v4693_v1 }
 0x111   :  { %v963_v11 = vadd.f32 %v962_v52, %v950_v6  ;;  %v964_v17 = vpop.f32.mrf.mxu1  ;;  %v4709_v52 = vld [vmem:[#allocation10 + $0x228] sm:$0xf]  ;;  %v4586_v6 = vor.u32 %v6100_v61, %v4583_v62  ;;  %v4919_v61 = vld [vmem:[#allocation10 + $0x3d8] sm:$0xf0] }
 0x112   :  { %v988_v24 = vpop.f32.mrf.mxu0  ;;  %v4710_v63 = vor.u32 %v6134_v53, %v4709_v52  ;;  %v4743_v52 = vld [vmem:[#allocation10 + $0x278] sm:$0xf0] }
 0x113   :  { %v976_v16 = vadd.f32 %v975_v8, %v963_v11  ;;  %1948 = vmatpush.bf16.msrb.mxu0 %v4666_v15  ;;  %1942 = vmatmul.bf16.vlgmr.msrb.gmra.mxu3 %v6838_v36  ;;  %v6096_v8 = vld [vmem:[#allocation10 + $0x10c] sm:$0xf]  ;;  %v5053_v11 = vld [vmem:[#allocation11 + $0xe0] sm:$0xf]  ;;  %v4810_v15 = vor.u32 %v6156_v3, %v4807_v4  ;;  %v4727_v4 = vld [vmem:[#allocation10 + $0x258] sm:$0xf0] }
 0x114   :  { %1910 = vmatpush.bf16.msra.mxu1 %v4774_v20  ;;  %v5054_v14 = vor.u32 %v6221_v12, %v5053_v11  ;;  %v4570_v17 = vor.u32 %v6096_v8, %v4567_v10  ;;  %v4853_v20 = vld [vmem:[#allocation10 + $0x348] sm:$0xf]  ;;  %v6136_v3 = vld [vmem:[#allocation10 + $0x24c] sm:$0xf]  ;;  %v4903_v10 = vld [vmem:[#allocation10 + $0x3b8] sm:$0xf0] }
 0x115   :  { %v989_v27 = vadd.f32 %v988_v24, %v976_v16  ;;  %v977_v29 = vpop.f32.mrf.mxu2  ;;  %v4870_v16 = vor.u32 %v6174_v7, %v4869_v9  ;;  %v6201_v9 = vld [vmem:[#allocation11 + $0x4c] sm:$0xf0]  ;;  %v5133_v7 = vld [vmem:[#allocation11 + $0x180] sm:$0xf]  ;;  %v6180_v8 = vld [vmem:[#allocation10 + $0x3ac] sm:$0xf] }
 0x116   :  { %v951_v23 = vpop.f32.mrf.mxu3  ;;  %2784 = vmatpush.bf16.msra.mxu3 %v5054_v14  ;;  %v5021_v29 = vld [vmem:[#allocation11 + $0xa0] sm:$0xf]  ;;  %v6241_v12 = vld [vmem:[#allocation11 + $0x18c] sm:$0xf0] }
 0x117   :  { %v995_v30 = vmax.f32 %v989_v27, 0.0  ;;  %1949 = vmatpush.bf16.msrb.mxu0 %v4650_v25  ;;  %v6217_v23 = vld [vmem:[#allocation11 + $0xcc] sm:$0xf0]  ;;  %v4794_v25 = vor.u32 %v6152_v18, %v4791_v19  ;;  %v4854_v27 = vor.u32 %v6170_v21, %v4853_v20  ;;  %v5134_v14 = vor.u32 %v6241_v12, %v5133_v7  ;;  %v4957_v18 = vld [vmem:[#allocation11 + $0x20] sm:$0xf] }
 0x118   :  { %1911 = vmatpush.bf16.msra.mxu1 %v4758_v0  ;;  %v5038_v24 = vor.u32 %v6217_v23, %v5037_v22  ;;  %v6213_v0 = vld [vmem:[#allocation11 + $0xac] sm:$0xf0]  ;;  %v5117_v20 = vld [vmem:[#allocation11 + $0x160] sm:$0xf]  ;;  %v6176_v21 = vld [vmem:[#allocation10 + $0x38c] sm:$0xf] }
 0x119   :  { %v6855_v35 = vpack.c.bf16 %v995_v30, %v995_v30  ;;  %v5181_v30 = vld [vmem:[#allocation11 + $0x1e0] sm:$0xf]  ;;  %v5022_v31 = vor.u32 %v6213_v0, %v5021_v29  ;;  %v6197_v19 = vld [vmem:[#allocation11 + $0x2c] sm:$0xf0]  ;;  %v4887_v22 = vld [vmem:[#allocation10 + $0x398] sm:$0xf0] }
 0x11a   :  { %v990_v36 = vpop.f32.mrf.mxu0  ;;  %2785 = vmatpush.bf16.msra.mxu3 %v5038_v24  ;;  %v5182_v37 = vor.u32 %v6253_v32, %v5181_v30  ;;  %v4958_v23 = vor.u32 %v6197_v19, %v4957_v18  ;;  %v6237_v24 = vld [vmem:[#allocation11 + $0x16c] sm:$0xf0]  ;;  %v5309_v29 = vld [vmem:[#allocation11 + $0x2e0] sm:$0xf]  ;;  %v4890_v30 = vor.u32 %v6176_v21, %v4887_v22  ;;  %v6160_v7 = vld [vmem:[#allocation10 + $0x30c] sm:$0xf] }
 0x11b   :  { %1825 = vmatmul.bf16.vlgmr.msra.gmra.mxu2 %v6855_v35  ;;  %1950 = vmatpush.bf16.msrb.mxu0 %v4634_v34  ;;  %v6144_v34 = vld [vmem:[#allocation10 + $0x28c] sm:$0xf]  ;;  %v5165_v36 = vld [vmem:[#allocation11 + $0x1c0] sm:$0xf]  ;;  %v6285_v0 = vld [vmem:[#allocation11 + $0x2ec] sm:$0xf0] }
 0x11c   :  { %1921 = vmatpush.bf16.msra.mxu2 %v4934_v33  ;;  %1864 = vmatmul.bf16.vlgmr.msrb.gmra.mxu1 %v6850_v58  ;;  %v4778_v33 = vor.u32 %v6148_v60, %v4775_v26  ;;  %v5166_v48 = vor.u32 %v6249_v47, %v5165_v36  ;;  %v6128_v60 = vld [vmem:[#allocation10 + $0x20c] sm:$0xf]  ;;  %v5118_v26 = vor.u32 %v6237_v24, %v5117_v20  ;;  %v6193_v32 = vld [vmem:[#allocation11 + $0xc] sm:$0xf0]  ;;  %v5085_v47 = vld [vmem:[#allocation11 + $0x120] sm:$0xf] }
 0x11d   :  { %1912 = vmatpush.bf16.msra.mxu1 %v4742_v41  ;;  %v6162_v41 = vld [vmem:[#allocation10 + $0x314] sm:$0xf0]  ;;  %v5310_v36 = vor.u32 %v6285_v0, %v5309_v29  ;;  %v6247_v18 = vld [vmem:[#allocation11 + $0x1c4] sm:$0xf]  ;;  %v5437_v19 = vld [vmem:[#allocation11 + $0x3e0] sm:$0xf] }
 0x11e   :  { %2786 = vmatpush.bf16.msra.mxu3 %v5022_v31  ;;  %v4822_v50 = vor.u32 %v6162_v41, %v4821_v40  ;;  %v4941_v31 = vld [vmem:[#allocation11] sm:$0xf]  ;;  %v6317_v20 = vld [vmem:[#allocation11 + $0x3ec] sm:$0xf0]  ;;  %v5167_v22 = vld [vmem:[#allocation11 + $0x1d0] sm:$0xf0] }
 0x11f   :  { %1951 = vmatpush.bf16.msrb.mxu0 %v4618_v45  ;;  %v4935_v45 = vld [vmem:[#allocation10 + $0x3f8] sm:$0xf0]  ;;  %v5170_v24 = vor.u32 %v6247_v18, %v5167_v22  ;;  %v4991_v29 = vld [vmem:[#allocation11 + $0x70] sm:$0xf0]  ;;  %v6313_v0 = vld [vmem:[#allocation11 + $0x3cc] sm:$0xf0] }
 0x120   :  { %1922 = vmatpush.bf16.msra.mxu2 %v4918_v44  ;;  %v6188_v44 = vld [vmem:[#allocation10 + $0x3ec] sm:$0xf]  ;;  %v6279_v22 = vld [vmem:[#allocation11 + $0x2c4] sm:$0xf] }
 0x121   :  { %1913 = vmatpush.bf16.msra.mxu1 %v4726_v51  ;;  %v6140_v51 = vld [vmem:[#allocation10 + $0x26c] sm:$0xf]  ;;  %v4938_v53 = vor.u32 %v6188_v44, %v4935_v45  ;;  %v5293_v44 = vld [vmem:[#allocation11 + $0x2c0] sm:$0xf]  ;;  %v4874_v45 = vor.u32 %v6172_v56, %v4871_v28  ;;  %v6203_v28 = vld [vmem:[#allocation11 + $0x64] sm:$0xf] }
 0x122   :  { %2787 = vmatpush.bf16.msra.mxu3 %v5006_v46  ;;  %v4746_v1 = vor.u32 %v6140_v51, %v4743_v52  ;;  %v6281_v46 = vld [vmem:[#allocation11 + $0x2cc] sm:$0xf0]  ;;  %v6215_v51 = vld [vmem:[#allocation11 + $0xc4] sm:$0xf]  ;;  %v5039_v52 = vld [vmem:[#allocation11 + $0xd0] sm:$0xf0] }
 0x123   :  { %1952 = vmatpush.bf16.msrb.mxu0 %v4602_v55  ;;  %v6205_v55 = vld [vmem:[#allocation11 + $0x6c] sm:$0xf0]  ;;  %v5421_v56 = vld [vmem:[#allocation11 + $0x3c0] sm:$0xf] }
 0x124   :  { %1923 = vmatpush.bf16.msra.mxu2 %v4902_v54  ;;  %v4989_v54 = vld [vmem:[#allocation11 + $0x60] sm:$0xf] }
 0x125   :  { %1914 = vmatpush.bf16.msra.mxu1 %v4710_v63  ;;  %v4990_v62 = vor.u32 %v6205_v55, %v4989_v54  ;;  %v6245_v63 = vld [vmem:[#allocation11 + $0x1ac] sm:$0xf0]  ;;  %v6164_v54 = vld [vmem:[#allocation10 + $0x32c] sm:$0xf]  ;;  %v5294_v55 = vor.u32 %v6281_v46, %v5293_v44  ;;  %v6239_v46 = vld [vmem:[#allocation11 + $0x184] sm:$0xf] }
 0x126   :  { %v5150_v2 = vor.u32 %v6245_v63, %v5149_v57  ;;  %v5277_v57 = vld [vmem:[#allocation11 + $0x2a0] sm:$0xf]  ;;  %v6225_v63 = vld [vmem:[#allocation11 + $0x10c] sm:$0xf0] }
 0x127   :  { %1953 = vmatpush.bf16.msrb.mxu0 %v4586_v6  ;;  %2788 = vmatpush.bf16.msra.mxu3 %v4990_v62  ;;  %v4973_v6 = vld [vmem:[#allocation11 + $0x40] sm:$0xf]  ;;  %v6309_v44 = vld [vmem:[#allocation11 + $0x3ac] sm:$0xf0] }
 0x128   :  { %1924 = vmatpush.bf16.msra.mxu2 %v4886_v5  ;;  %v4922_v5 = vor.u32 %v6184_v59, %v4919_v61  ;;  %v4974_v11 = vor.u32 %v6201_v9, %v4973_v6  ;;  %v6277_v61 = vld [vmem:[#allocation11 + $0x2ac] sm:$0xf0]  ;;  %v5069_v62 = vld [vmem:[#allocation11 + $0x100] sm:$0xf]  ;;  %v6251_v6 = vld [vmem:[#allocation11 + $0x1e4] sm:$0xf] }
 0x129   :  { %1915 = vmatpush.bf16.msra.mxu1 %v4694_v13  ;;  %v4730_v13 = vor.u32 %v6136_v3, %v4727_v4  ;;  %v6211_v3 = vld [vmem:[#allocation11 + $0xa4] sm:$0xf]  ;;  %v5023_v4 = vld [vmem:[#allocation11 + $0xb0] sm:$0xf0] }
 0x12a   :  { %v5183_v9 = vld [vmem:[#allocation11 + $0x1f0] sm:$0xf0] }
 0x12b   :  { %1877 = vmatmul.bf16.vlgmr.msrb.gmra.mxu2 %v6855_v35  ;;  %1954 = vmatpush.bf16.msrb.mxu0 %v4570_v17  ;;  %v4906_v17 = vor.u32 %v6180_v8, %v4903_v10  ;;  %v4823_v8 = vld [vmem:[#allocation10 + $0x318] sm:$0xf0]  ;;  %v5278_v10 = vor.u32 %v6277_v61, %v5277_v57  ;;  %v5389_v57 = vld [vmem:[#allocation11 + $0x380] sm:$0xf] }
 0x12c   :  { %1925 = vmatpush.bf16.msra.mxu2 %v4870_v16  ;;  %1916 = vmatmul.bf16.vlgmr.msra.gmra.mxu1 %v6850_v58  ;;  %v4711_v16 = vld [vmem:[#allocation10 + $0x238] sm:$0xf0] }
 0x12d   :  { %1960 = vmatpush.bf16.msrb.mxu1 %v4810_v15  ;;  %v6132_v15 = vld [vmem:[#allocation10 + $0x22c] sm:$0xf]  ;;  %2789 = vmatpush.bf16.msra.mxu3 %v4974_v11  ;;  %v5186_v11 = vor.u32 %v6251_v6, %v5183_v9  ;;  %v6283_v6 = vld [vmem:[#allocation11 + $0x2e4] sm:$0xf]  ;;  %v5311_v9 = vld [vmem:[#allocation11 + $0x2f0] sm:$0xf0] }
 0x12e   :  { %1955 = vmatmul.bf16.vlgmr.msrb.gmra.mxu0 %v6843_v49  ;;  %v4762_v49 = vor.u32 %v6144_v34, %v4759_v39  ;;  %v4942_v34 = vor.u32 %v6193_v32, %v4941_v31  ;;  %v5055_v39 = vld [vmem:[#allocation11 + $0xf0] sm:$0xf0]  ;;  %v6243_v31 = vld [vmem:[#allocation11 + $0x1a4] sm:$0xf] }
 0x12f   :  { %2797 = vmatpush.bf16.msra.mxu0 %v5182_v37  ;;  %v6233_v37 = vld [vmem:[#allocation11 + $0x14c] sm:$0xf0]  ;;  %v5151_v32 = vld [vmem:[#allocation11 + $0x1b0] sm:$0xf0] }
 0x130   :  { %1926 = vmatpush.bf16.msra.mxu2 %v4854_v27  ;;  %v4695_v27 = vld [vmem:[#allocation10 + $0x218] sm:$0xf0] }
 0x131   :  { %1961 = vmatpush.bf16.msrb.mxu1 %v4794_v25  ;;  %v4714_v25 = vor.u32 %v6132_v15, %v4711_v16  ;;  %2790 = vmatpush.bf16.msra.mxu3 %v4958_v23  ;;  %v4698_v40 = vor.u32 %v6128_v60, %v4695_v27  ;;  %v162_v15 = vld [vmem:[#allocation5] sm:$0xff]  ;;  %v6207_v16 = vld [vmem:[#allocation11 + $0x84] sm:$0xf]  ;;  %v6269_v27 = vld [vmem:[#allocation11 + $0x26c] sm:$0xf0] }
 0x132   :  { %v5245_v60 = vld [vmem:[#allocation11 + $0x260] sm:$0xf] }
 0x133   :  { %2798 = vmatpush.bf16.msra.mxu0 %v5166_v48  ;;  %v4855_v48 = vld [vmem:[#allocation10 + $0x358] sm:$0xf0] }
 0x134   :  { %1927 = vmatpush.bf16.msra.mxu2 %v4838_v38  ;;  %v6219_v38 = vld [vmem:[#allocation11 + $0xe4] sm:$0xf]  ;;  %v4858_v59 = vor.u32 %v6168_v43, %v4855_v48 }
 0x135   :  { %1962 = vmatpush.bf16.msrb.mxu1 %v4778_v33  ;;  %v5101_v33 = vld [vmem:[#allocation11 + $0x140] sm:$0xf]  ;;  %v5058_v42 = vor.u32 %v6219_v38, %v5055_v39  ;;  %2791 = vmatpush.bf16.msra.mxu3 %v4942_v34  ;;  %v5154_v34 = vor.u32 %v6243_v31, %v5151_v32  ;;  %v6265_v39 = vld [vmem:[#allocation11 + $0x24c] sm:$0xf0]  ;;  %v6199_v43 = vld [vmem:[#allocation11 + $0x44] sm:$0xf] }
 0x136   :  { %v5102_v41 = vor.u32 %v6233_v37, %v5101_v33  ;;  %v5246_v33 = vor.u32 %v6269_v27, %v5245_v60  ;;  %v163_v37 = vld [vmem:[#allocation5 + $0x8] sm:$0xff]  ;;  %v5229_v38 = vld [vmem:[#allocation11 + $0x240] sm:$0xf]  ;;  %v5087_v60 = vld [vmem:[#allocation11 + $0x130] sm:$0xf0] }
 0x137   :  { %2799 = vmatpush.bf16.msra.mxu0 %v5150_v2  ;;  %v5070_v2 = vor.u32 %v6225_v63, %v5069_v62  ;;  %v5119_v62 = vld [vmem:[#allocation11 + $0x170] sm:$0xf0]  ;;  %v6297_v27 = vld [vmem:[#allocation11 + $0x34c] sm:$0xf0]  ;;  %v5341_v32 = vld [vmem:[#allocation11 + $0x320] sm:$0xf] }
 0x138   :  { %1928 = vmatpush.bf16.msra.mxu2 %v4822_v50 }
 0x139   :  { %1963 = vmatpush.bf16.msrb.mxu1 %v4762_v49  ;;  %v6229_v49 = vld [vmem:[#allocation11 + $0x12c] sm:$0xf0]  ;;  %2836 = vmatpush.bf16.msrb.mxu3 %v5058_v42  ;;  %v5405_v42 = vld [vmem:[#allocation11 + $0x3a0] sm:$0xf] }
 0x13a   :  { %v5086_v50 = vor.u32 %v6229_v49, %v5085_v47  ;;  %v5135_v47 = vld [vmem:[#allocation11 + $0x190] sm:$0xf0]  ;;  %v5230_v49 = vor.u32 %v6265_v39, %v5229_v38 }
 0x13b   :  { %1929 = vmatmul.bf16.vlgmr.msra.gmra.mxu2 %v6855_v35  ;;  %2800 = vmatpush.bf16.msra.mxu0 %v5134_v14  ;;  %v6273_v14 = vld [vmem:[#allocation11 + $0x28c] sm:$0xf0]  ;;  %v5138_v48 = vor.u32 %v6239_v46, %v5135_v47  ;;  %v5279_v39 = vld [vmem:[#allocation11 + $0x2b0] sm:$0xf0]  ;;  %v6254_v47 = vld [vmem:[#allocation11 + $0x1f4] sm:$0xf0] }
 0x13c   :  { %1973 = vmatpush.bf16.msrb.mxu2 %v4938_v53  ;;  %v5042_v53 = vor.u32 %v6215_v51, %v5039_v52  ;;  %v6261_v51 = vld [vmem:[#allocation11 + $0x22c] sm:$0xf0]  ;;  %v5406_v52 = vor.u32 %v6309_v44, %v5405_v42  ;;  %v5071_v42 = vld [vmem:[#allocation11 + $0x110] sm:$0xf0]  ;;  %v6214_v44 = vld [vmem:[#allocation11 + $0xb4] sm:$0xf0] }
 0x13d   :  { %1964 = vmatpush.bf16.msrb.mxu1 %v4746_v1  ;;  %v4839_v1 = vld [vmem:[#allocation10 + $0x338] sm:$0xf0] }
 0x13e   :  { %2837 = vmatpush.bf16.msrb.mxu3 %v5042_v53  ;;  %v4842_v12 = vor.u32 %v6164_v54, %v4839_v1  ;;  %v6195_v53 = vld [vmem:[#allocation11 + $0x24] sm:$0xf]  ;;  %v4959_v54 = vld [vmem:[#allocation11 + $0x30] sm:$0xf0]  ;;  %v5197_v1 = vld [vmem:[#allocation11 + $0x200] sm:$0xf] }
 0x13f   :  { %2801 = vmatpush.bf16.msra.mxu0 %v5118_v26  ;;  %v5438_v26 = vor.u32 %v6317_v20, %v5437_v19  ;;  %v4962_v61 = vor.u32 %v6195_v53, %v4959_v54  ;;  %v5357_v20 = vld [vmem:[#allocation11 + $0x340] sm:$0xf]  ;;  %v6289_v53 = vld [vmem:[#allocation11 + $0x30c] sm:$0xf0]  ;;  %v6271_v54 = vld [vmem:[#allocation11 + $0x284] sm:$0xf] }
 0x140   :  { %1974 = vmatpush.bf16.msrb.mxu2 %v4922_v5  ;;  %v5026_v5 = vor.u32 %v6211_v3, %v5023_v4  ;;  %v5373_v3 = vld [vmem:[#allocation11 + $0x360] sm:$0xf]  ;;  %v6301_v4 = vld [vmem:[#allocation11 + $0x36c] sm:$0xf0]  ;;  %v5358_v38 = vor.u32 %v6297_v27, %v5357_v20  ;;  %v6202_v27 = vld [vmem:[#allocation11 + $0x54] sm:$0xf0] }
 0x141   :  { %1965 = vmatpush.bf16.msrb.mxu1 %v4730_v13  ;;  %v5261_v13 = vld [vmem:[#allocation11 + $0x280] sm:$0xf] }
 0x142   :  { %2838 = vmatpush.bf16.msrb.mxu3 %v5026_v5  ;;  %v5262_v23 = vor.u32 %v6273_v14, %v5261_v13  ;;  %v6257_v5 = vld [vmem:[#allocation11 + $0x20c] sm:$0xf0]  ;;  %v5103_v13 = vld [vmem:[#allocation11 + $0x150] sm:$0xf0]  ;;  %v5061_v14 = vld [vmem:[#allocation11 + $0xe8] sm:$0xf] }
 0x143   :  { %2802 = vmatpush.bf16.msra.mxu0 %v5102_v41  ;;  %v5422_v41 = vor.u32 %v6313_v0, %v5421_v56  ;;  %v6878_v0 = vld [vmem:[%s7014_s5] sm:$0xf] }
 0x144   :  { %1975 = vmatpush.bf16.msrb.mxu2 %v4906_v17  ;;  %v5007_v17 = vld [vmem:[#allocation11 + $0x90] sm:$0xf0] }
 0x145   :  { %1966 = vmatpush.bf16.msrb.mxu1 %v4714_v25  ;;  %v5010_v21 = vor.u32 %v6207_v16, %v5007_v17  ;;  %v4826_v25 = vor.u32 %v6160_v7, %v4823_v8  ;;  %v6191_v8 = vld [vmem:[#allocation11 + $0x4] sm:$0xf]  ;;  %v5198_v16 = vor.u32 %v6257_v5, %v5197_v1  ;;  %v164_v17 = vld [vmem:[#allocation5 + $0x10] sm:$0xff]  ;;  %v5439_v1 = vld [vmem:[#allocation11 + $0x3f0] sm:$0xf0] }
 0x147   :  { %2803 = vmatpush.bf16.msra.mxu0 %v5086_v50  ;;  %2839 = vmatpush.bf16.msrb.mxu3 %v5010_v21  ;;  %v5213_v50 = vld [vmem:[#allocation11 + $0x220] sm:$0xf]  ;;  %v5314_v21 = vor.u32 %v6283_v6, %v5311_v9 }
 0x148   :  { %1976 = vmatpush.bf16.msrb.mxu2 %v4890_v30  ;;  %v4994_v30 = vor.u32 %v6203_v28, %v4991_v29  ;;  %v5045_v28 = vld [vmem:[#allocation11 + $0xc8] sm:$0xf]  ;;  %v6218_v29 = vld [vmem:[#allocation11 + $0xd4] sm:$0xf0] }
 0x149   :  { %1967 = vmatpush.bf16.msrb.mxu1 %v4698_v40  ;;  %v6867_v40 = vpack.c.bf16 %v163_v37, %v163_v37  ;;  %v5046_v31 = vor.u32 %v6218_v29, %v5045_v28  ;;  %v6275_v37 = vld [vmem:[#allocation11 + $0x2a4] sm:$0xf] }
 0x14a   :  { %v6307_v29 = vld [vmem:[#allocation11 + $0x3a4] sm:$0xf] }
 0x14b   :  { %2804 = vmatpush.bf16.msra.mxu0 %v5070_v2  ;;  %2840 = vmatpush.bf16.msrb.mxu3 %v4994_v30 }
 0x14c   :  { %1977 = vmatpush.bf16.msrb.mxu2 %v4874_v45  ;;  %1968 = vmatmul.bf16.vlgmr.msrb.gmra.mxu1 %v6850_v58  ;;  %v6864_v58 = vpack.c.bf16 %v162_v15, %v162_v15  ;;  %v6222_v15 = vld [vmem:[#allocation11 + $0xf4] sm:$0xf0] }
 0x14d   :  { %2810 = vmatpush.bf16.msra.mxu1 %v5310_v36  ;;  %v4975_v36 = vld [vmem:[#allocation11 + $0x50] sm:$0xf0]  ;;  %v5062_v19 = vor.u32 %v6222_v15, %v5061_v14  ;;  %v6206_v14 = vld [vmem:[#allocation11 + $0x74] sm:$0xf0]  ;;  %v5157_v15 = vld [vmem:[#allocation11 + $0x1a8] sm:$0xf] }
 0x14e   :  { %2792 = vmatmul.bf16.vlgmr.msra.gmra.mxu3 %v6864_v58  ;;  %v4978_v45 = vor.u32 %v6199_v43, %v4975_v36  ;;  %2805 = vmatmul.bf16.vlgmr.msra.gmra.mxu0 %v6867_v40  ;;  %v5029_v36 = vld [vmem:[#allocation11 + $0xa8] sm:$0xf] }
 0x14f   :  { %2849 = vmatpush.bf16.msrb.mxu0 %v5186_v11  ;;  %v6231_v11 = vld [vmem:[#allocation11 + $0x144] sm:$0xf]  ;;  %v5030_v46 = vor.u32 %v6214_v44, %v5029_v36  ;;  %v5125_v36 = vld [vmem:[#allocation11 + $0x168] sm:$0xf] }
 0x150   :  { %1978 = vmatpush.bf16.msrb.mxu2 %v4858_v59  ;;  %v6305_v59 = vld [vmem:[#allocation11 + $0x38c] sm:$0xf0]  ;;  %2841 = vmatpush.bf16.msrb.mxu3 %v4978_v45  ;;  %v5106_v18 = vor.u32 %v6231_v11, %v5103_v13  ;;  %v5189_v45 = vld [vmem:[#allocation11 + $0x1e8] sm:$0xf]  ;;  %v6303_v44 = vld [vmem:[#allocation11 + $0x384] sm:$0xf] }
 0x151   :  { %2811 = vmatpush.bf16.msra.mxu1 %v5294_v55  ;;  %v6235_v55 = vld [vmem:[#allocation11 + $0x164] sm:$0xf]  ;;  %v5390_v7 = vor.u32 %v6305_v59, %v5389_v57  ;;  %v5013_v57 = vld [vmem:[#allocation11 + $0x88] sm:$0xf]  ;;  %v6210_v59 = vld [vmem:[#allocation11 + $0x94] sm:$0xf0] }
 0x152   :  { %v5122_v2 = vor.u32 %v6235_v55, %v5119_v62  ;;  %v5263_v55 = vld [vmem:[#allocation11 + $0x290] sm:$0xf0]  ;;  %v4997_v13 = vld [vmem:[#allocation11 + $0x68] sm:$0xf] }
 0x153   :  { %2850 = vmatpush.bf16.msrb.mxu0 %v5170_v24  ;;  %v5295_v24 = vld [vmem:[#allocation11 + $0x2d0] sm:$0xf0] }
 0x154   :  { %1979 = vmatpush.bf16.msrb.mxu2 %v4842_v12  ;;  %2842 = vmatpush.bf16.msrb.mxu3 %v4962_v61  ;;  %v5173_v61 = vld [vmem:[#allocation11 + $0x1c8] sm:$0xf] }
 0x155   :  { %2812 = vmatpush.bf16.msra.mxu1 %v5278_v10  ;;  %v6871_v63 = vpop.f32.mrf.mxu3  ;;  %v4943_v10 = vld [vmem:[#allocation11 + $0x10] sm:$0xf0] }
 0x156   :  { %v4946_v12 = vor.u32 %v6191_v8, %v4943_v10  ;;  %v6267_v8 = vld [vmem:[#allocation11 + $0x264] sm:$0xf]  ;;  %v5247_v10 = vld [vmem:[#allocation11 + $0x270] sm:$0xf0] }
 0x157   :  { %2851 = vmatpush.bf16.msrb.mxu0 %v5154_v34  ;;  %v5298_v34 = vor.u32 %v6279_v22, %v5295_v24  ;;  %v5231_v24 = vld [vmem:[#allocation11 + $0x250] sm:$0xf0] }
 0x158   :  { %1980 = vmatpush.bf16.msrb.mxu2 %v4826_v25  ;;  %v6227_v25 = vld [vmem:[#allocation11 + $0x124] sm:$0xf]  ;;  %2843 = vmatpush.bf16.msrb.mxu3 %v4946_v12 }
 0x159   :  { %2813 = vmatpush.bf16.msra.mxu1 %v5262_v23  ;;  %v5374_v23 = vor.u32 %v6301_v4, %v5373_v3  ;;  %v5090_v56 = vor.u32 %v6227_v25, %v5087_v60  ;;  %v6250_v3 = vld [vmem:[#allocation11 + $0x1d4] sm:$0xf0]  ;;  %v5266_v4 = vor.u32 %v6271_v54, %v5263_v55  ;;  %v4981_v60 = vld [vmem:[#allocation11 + $0x48] sm:$0xf]  ;;  %v5199_v54 = vld [vmem:[#allocation11 + $0x210] sm:$0xf0] }
 0x15a   :  { %v5174_v5 = vor.u32 %v6250_v3, %v5173_v61  ;;  %v5317_v55 = vld [vmem:[#allocation11 + $0x2e8] sm:$0xf] }
 0x15b   :  { %1981 = vmatmul.bf16.vlgmr.msrb.gmra.mxu2 %v6855_v35  ;;  %2852 = vmatpush.bf16.msrb.mxu0 %v5138_v48  ;;  %v5214_v35 = vor.u32 %v6261_v51, %v5213_v50  ;;  %v5325_v48 = vld [vmem:[#allocation11 + $0x300] sm:$0xf]  ;;  %v5282_v50 = vor.u32 %v6275_v37, %v5279_v39  ;;  %v5190_v51 = vor.u32 %v6254_v47, %v5189_v45  ;;  %v6259_v37 = vld [vmem:[#allocation11 + $0x224] sm:$0xf]  ;;  %v5391_v45 = vld [vmem:[#allocation11 + $0x390] sm:$0xf0] }
 0x15c   :  { %2823 = vmatpush.bf16.msra.mxu2 %v5438_v26  ;;  %v6873_v26 = vpack.c.bf16 %v164_v17, %v164_v17  ;;  %2888 = vmatpush.bf16.msra.mxu3 %v5062_v19  ;;  %v5326_v9 = vor.u32 %v6289_v53, %v5325_v48  ;;  %v6311_v17 = vld [vmem:[#allocation11 + $0x3c4] sm:$0xf]  ;;  %v4998_v19 = vor.u32 %v6206_v14, %v4997_v13  ;;  %v6238_v47 = vld [vmem:[#allocation11 + $0x174] sm:$0xf0]  ;;  %v5375_v53 = vld [vmem:[#allocation11 + $0x370] sm:$0xf0] }
 0x15d   :  { %2814 = vmatpush.bf16.msra.mxu1 %v5246_v33  ;;  %v1789_v30 = vpop.f32.mrf.mxu3  ;;  %v6293_v33 = vld [vmem:[#allocation11 + $0x32c] sm:$0xf0]  ;;  %v4949_v61 = vld [vmem:[#allocation11 + $0x8] sm:$0xf] }
 0x15e   :  { %2844 = vmatmul.bf16.vlgmr.msrb.gmra.mxu3 %v6864_v58  ;;  %v5407_v30 = vld [vmem:[#allocation11 + $0x3b0] sm:$0xf0]  ;;  %v5301_v13 = vld [vmem:[#allocation11 + $0x2c8] sm:$0xf] }
 0x15f   :  { %2853 = vmatpush.bf16.msrb.mxu0 %v5122_v2  ;;  %v5014_v2 = vor.u32 %v6210_v59, %v5013_v57  ;;  %v6286_v57 = vld [vmem:[#allocation11 + $0x2f4] sm:$0xf0]  ;;  %v5394_v59 = vor.u32 %v6303_v44, %v5391_v45 }
 0x160   :  { %2824 = vmatpush.bf16.msra.mxu2 %v5422_v41  ;;  %v6223_v41 = vld [vmem:[#allocation11 + $0x104] sm:$0xf]  ;;  %2889 = vmatpush.bf16.msra.mxu3 %v5046_v31  ;;  %v4982_v31 = vor.u32 %v6202_v27, %v4981_v60  ;;  %v5343_v60 = vld [vmem:[#allocation11 + $0x330] sm:$0xf0] }
 0x161   :  { %2815 = vmatpush.bf16.msra.mxu1 %v5230_v49  ;;  %v5074_v43 = vor.u32 %v6223_v41, %v5071_v42  ;;  %v1130_v49 = vperm.slane %v6878_v0, 0  ;;  %v5410_v41 = vor.u32 %v6307_v29, %v5407_v30  ;;  %v4965_v42 = vld [vmem:[#allocation11 + $0x28] sm:$0xf]  ;;  %v6278_v29 = vld [vmem:[#allocation11 + $0x2b4] sm:$0xf0] }
 0x162   :  { %v5077_v30 = vld [vmem:[#allocation11 + $0x108] sm:$0xf] }
 0x163   :  { %2854 = vmatpush.bf16.msrb.mxu0 %v5106_v18  ;;  %v1788_v6 = vadd.f32 %v6871_v63, %v1130_v49  ;;  %v5423_v18 = vld [vmem:[#allocation11 + $0x3d0] sm:$0xf0]  ;;  %v6246_v63 = vld [vmem:[#allocation11 + $0x1b4] sm:$0xf0]  ;;  %v1131_v49 = vperm.slane %v6878_v0, 1 }
 0x164   :  { %2825 = vmatpush.bf16.msra.mxu2 %v5406_v52  ;;  %v5342_v52 = vor.u32 %v6293_v33, %v5341_v32  ;;  %2890 = vmatpush.bf16.msra.mxu3 %v5030_v46  ;;  %v5158_v22 = vor.u32 %v6246_v63, %v5157_v15  ;;  %v5426_v25 = vor.u32 %v6311_v17, %v5423_v18  ;;  %v6242_v32 = vld [vmem:[#allocation11 + $0x194] sm:$0xf0]  ;;  %v5093_v18 = vld [vmem:[#allocation11 + $0x128] sm:$0xf] }
 0x165   :  { %2816 = vmatpush.bf16.msra.mxu1 %v5214_v35  ;;  %v6883_v62 = vpop.f32.mrf.mxu3  ;;  %v6315_v35 = vld [vmem:[#allocation11 + $0x3e4] sm:$0xf]  ;;  %v6282_v17 = vld [vmem:[#allocation11 + $0x2d4] sm:$0xf0] }
 0x166   :  { %v5442_v12 = vor.u32 %v6315_v35, %v5439_v1  ;;  %v6194_v35 = vld [vmem:[#allocation11 + $0x14] sm:$0xf0]  ;;  %v5109_v1 = vld [vmem:[#allocation11 + $0x148] sm:$0xf]  ;;  %v5302_v27 = vor.u32 %v6282_v17, %v5301_v13  ;;  %v5159_v13 = vld [vmem:[#allocation11 + $0x1b8] sm:$0xf0] }
 0x167   :  { %2855 = vmatpush.bf16.msrb.mxu0 %v5090_v56  ;;  %v5141_v56 = vld [vmem:[#allocation11 + $0x188] sm:$0xf]  ;;  %v4950_v3 = vor.u32 %v6194_v35, %v4949_v61 }
 0x168   :  { %2826 = vmatpush.bf16.msra.mxu2 %v5390_v7  ;;  %v165_v7 = vld [vmem:[#allocation5 + $0x18] sm:$0xff]  ;;  %2891 = vmatpush.bf16.msra.mxu3 %v5014_v2 }
 0x169   :  { %2817 = vmatpush.bf16.msra.mxu1 %v5198_v16  ;;  %v6889_v20 = vpack.c.bf16 %v165_v7, %v165_v7 }
 0x16b   :  { %2856 = vmatpush.bf16.msrb.mxu0 %v5074_v43  ;;  %v1800_v11 = vpop.f32.mrf.mxu0  ;;  %v6198_v43 = vld [vmem:[#allocation11 + $0x34] sm:$0xf0] }
 0x16c   :  { %2827 = vmatpush.bf16.msra.mxu2 %v5374_v23  ;;  %2818 = vmatmul.bf16.vlgmr.msra.gmra.mxu1 %v6873_v26  ;;  %v6887_v16 = vadd.f32 %v1800_v11, %v1788_v6  ;;  %v6263_v23 = vld [vmem:[#allocation11 + $0x244] sm:$0xf]  ;;  %v4966_v46 = vor.u32 %v6198_v43, %v4965_v42  ;;  %v5063_v6 = vld [vmem:[#allocation11 + $0xf8] sm:$0xf0] }
 0x16d   :  { %2862 = vmatpush.bf16.msrb.mxu1 %v5314_v21  ;;  %v5250_v21 = vor.u32 %v6267_v8, %v5247_v10  ;;  %v1841_v28 = vpop.f32.mrf.mxu3  ;;  %2892 = vmatpush.bf16.msra.mxu3 %v4998_v19  ;;  %v5234_v33 = vor.u32 %v6263_v23, %v5231_v24  ;;  %v1840_v10 = vadd.f32 %v6883_v62, %v1131_v49  ;;  %v6295_v11 = vld [vmem:[#allocation11 + $0x344] sm:$0xf]  ;;  %v6230_v19 = vld [vmem:[#allocation11 + $0x134] sm:$0xf0]  ;;  %v6216_v23 = vld [vmem:[#allocation11 + $0xcc] sm:$0xf] }
 0x16e   :  { %2857 = vmatmul.bf16.vlgmr.msrb.gmra.mxu0 %v6867_v40  ;;  %v5047_v24 = vld [vmem:[#allocation11 + $0xd8] sm:$0xf0]  ;;  %v6287_v42 = vld [vmem:[#allocation11 + $0x304] sm:$0xf]  ;;  %v6274_v49 = vld [vmem:[#allocation11 + $0x294] sm:$0xf0] }
 0x16f   :  { %2901 = vmatpush.bf16.msra.mxu0 %v5190_v51  ;;  %v5126_v51 = vor.u32 %v6238_v47, %v5125_v36  ;;  %v5050_v62 = vor.u32 %v6216_v23, %v5047_v24  ;;  %v5269_v47 = vld [vmem:[#allocation11 + $0x288] sm:$0xf]  ;;  %v6200_v23 = vld [vmem:[#allocation11 + $0x4c] sm:$0xf]  ;;  %v4983_v24 = vld [vmem:[#allocation11 + $0x58] sm:$0xf0] }
 0x170   :  { %2828 = vmatpush.bf16.msra.mxu2 %v5358_v38  ;;  %v5215_v38 = vld [vmem:[#allocation11 + $0x230] sm:$0xf0]  ;;  %v5270_v61 = vor.u32 %v6274_v49, %v5269_v47  ;;  %v6258_v47 = vld [vmem:[#allocation11 + $0x214] sm:$0xf0]  ;;  %v6284_v49 = vld [vmem:[#allocation11 + $0x2ec] sm:$0xf] }
 0x171   :  { %2863 = vmatpush.bf16.msrb.mxu1 %v5298_v34  ;;  %v5142_v34 = vor.u32 %v6242_v32, %v5141_v56  ;;  %2893 = vmatpush.bf16.msra.mxu3 %v4982_v31  ;;  %v5218_v48 = vor.u32 %v6259_v37, %v5215_v38  ;;  %v5285_v56 = vld [vmem:[#allocation11 + $0x2a8] sm:$0xf]  ;;  %v6226_v31 = vld [vmem:[#allocation11 + $0x114] sm:$0xf0]  ;;  %v5031_v37 = vld [vmem:[#allocation11 + $0xb8] sm:$0xf0] }
 0x172   :  { %v6252_v38 = vld [vmem:[#allocation11 + $0x1ec] sm:$0xf]  ;;  %v5286_v43 = vor.u32 %v6278_v29, %v5285_v56 }
 0x173   :  { %2902 = vmatpush.bf16.msra.mxu0 %v5174_v5  ;;  %v1802_v39 = vpop.f32.mrf.mxu0  ;;  %v6220_v5 = vld [vmem:[#allocation11 + $0xec] sm:$0xf] }
 0x174   :  { %2829 = vmatpush.bf16.msra.mxu2 %v5342_v52  ;;  %v6299_v52 = vld [vmem:[#allocation11 + $0x364] sm:$0xf]  ;;  %v5066_v8 = vor.u32 %v6220_v5, %v5063_v6  ;;  %v6270_v5 = vld [vmem:[#allocation11 + $0x274] sm:$0xf0] }
 0x175   :  { %2864 = vmatpush.bf16.msrb.mxu1 %v5282_v50  ;;  %v6255_v50 = vld [vmem:[#allocation11 + $0x204] sm:$0xf]  ;;  %v6893_v2 = vpop.f32.mrf.mxu3  ;;  %2894 = vmatpush.bf16.msra.mxu3 %v4966_v46  ;;  %v5378_v15 = vor.u32 %v6299_v52, %v5375_v53  ;;  %v5327_v46 = vld [vmem:[#allocation11 + $0x310] sm:$0xf0]  ;;  %v5445_v52 = vld [vmem:[#allocation11 + $0x3e8] sm:$0xf] }
 0x176   :  { %v6318_v53 = vld [vmem:[#allocation11 + $0x3f4] sm:$0xf0] }
 0x177   :  { %2903 = vmatpush.bf16.msra.mxu0 %v5158_v22  ;;  %v5094_v22 = vor.u32 %v6230_v19, %v5093_v18  ;;  %v5446_v6 = vor.u32 %v6318_v53, %v5445_v52  ;;  %v5237_v18 = vld [vmem:[#allocation11 + $0x248] sm:$0xf]  ;;  %v6266_v19 = vld [vmem:[#allocation11 + $0x254] sm:$0xf0]  ;;  %v4951_v52 = vld [vmem:[#allocation11 + $0x18] sm:$0xf0] }
 0x178   :  { %2830 = vmatpush.bf16.msra.mxu2 %v5326_v9  ;;  %v5202_v9 = vor.u32 %v6255_v50, %v5199_v54  ;;  %v5015_v50 = vld [vmem:[#allocation11 + $0x98] sm:$0xf0]  ;;  %v6232_v53 = vld [vmem:[#allocation11 + $0x14c] sm:$0xf] }
 0x179   :  { %2865 = vmatpush.bf16.msrb.mxu1 %v5266_v4  ;;  %v6234_v4 = vld [vmem:[#allocation11 + $0x154] sm:$0xf0]  ;;  %2895 = vmatpush.bf16.msra.mxu3 %v4950_v3  ;;  %v5330_v3 = vor.u32 %v6287_v42, %v5327_v46  ;;  %v5127_v42 = vld [vmem:[#allocation11 + $0x178] sm:$0xf0] }
 0x17a   :  { %v5110_v7 = vor.u32 %v6234_v4, %v5109_v1  ;;  %v5253_v4 = vld [vmem:[#allocation11 + $0x268] sm:$0xf] }
 0x17b   :  { %2831 = vmatmul.bf16.vlgmr.msra.gmra.mxu2 %v6889_v20  ;;  %2904 = vmatpush.bf16.msra.mxu0 %v5142_v34  ;;  %v1852_v14 = vpop.f32.mrf.mxu0  ;;  %v6212_v34 = vld [vmem:[#allocation11 + $0xac] sm:$0xf] }
 0x17c   :  { %2875 = vmatpush.bf16.msrb.mxu2 %v5442_v12  ;;  %v5318_v12 = vor.u32 %v6286_v57, %v5317_v55  ;;  %v6896_v63 = vadd.f32 %v1852_v14, %v1840_v10  ;;  %2896 = vmatmul.bf16.vlgmr.msra.gmra.mxu3 %v6864_v58  ;;  %v5034_v39 = vor.u32 %v6212_v34, %v5031_v37  ;;  %v5175_v55 = vld [vmem:[#allocation11 + $0x1d8] sm:$0xf0]  ;;  %v1132_v57 = vperm.slane %v6878_v0, 2  ;;  %v5429_v10 = vld [vmem:[#allocation11 + $0x3c8] sm:$0xf] }
 0x17d   :  { %2866 = vmatpush.bf16.msrb.mxu1 %v5250_v21  ;;  %v5359_v21 = vld [vmem:[#allocation11 + $0x350] sm:$0xf0]  ;;  %2940 = vmatpush.bf16.msrb.mxu3 %v5066_v8  ;;  %v1893_v32 = vpop.f32.mrf.mxu3  ;;  %v6244_v8 = vld [vmem:[#allocation11 + $0x1ac] sm:$0xf]  ;;  %v4967_v34 = vld [vmem:[#allocation11 + $0x38] sm:$0xf0] }
 0x17e   :  { %v5362_v28 = vor.u32 %v6295_v11, %v5359_v21  ;;  %v6314_v11 = vld [vmem:[#allocation11 + $0x3d4] sm:$0xf0]  ;;  %v1892_v14 = vadd.f32 %v6893_v2, %v1132_v57  ;;  %v5143_v2 = vld [vmem:[#allocation11 + $0x198] sm:$0xf0]  ;;  %v6236_v37 = vld [vmem:[#allocation11 + $0x16c] sm:$0xf] }
 0x17f   :  { %2905 = vmatpush.bf16.msra.mxu0 %v5126_v51  ;;  %v6248_v51 = vld [vmem:[#allocation11 + $0x1cc] sm:$0xf]  ;;  %v6302_v57 = vld [vmem:[#allocation11 + $0x374] sm:$0xf0] }
 0x180   :  { %2876 = vmatpush.bf16.msrb.mxu2 %v5426_v25  ;;  %v6291_v25 = vld [vmem:[#allocation11 + $0x324] sm:$0xf]  ;;  %v5178_v35 = vor.u32 %v6248_v51, %v5175_v55  ;;  %v6192_v51 = vld [vmem:[#allocation11 + $0xc] sm:$0xf]  ;;  %v5381_v55 = vld [vmem:[#allocation11 + $0x368] sm:$0xf] }
 0x181   :  { %2867 = vmatpush.bf16.msrb.mxu1 %v5234_v33  ;;  %v5078_v33 = vor.u32 %v6226_v31, %v5077_v30  ;;  %2941 = vmatpush.bf16.msrb.mxu3 %v5050_v62  ;;  %v5346_v45 = vor.u32 %v6291_v25, %v5343_v60  ;;  %v6240_v62 = vld [vmem:[#allocation11 + $0x18c] sm:$0xf]  ;;  %v5413_v25 = vld [vmem:[#allocation11 + $0x3a8] sm:$0xf]  ;;  %v6310_v60 = vld [vmem:[#allocation11 + $0x3b4] sm:$0xf0] }
 0x182   :  { %v5146_v29 = vor.u32 %v6240_v62, %v5143_v2  ;;  %v5221_v30 = vld [vmem:[#allocation11 + $0x228] sm:$0xf]  ;;  %v6262_v31 = vld [vmem:[#allocation11 + $0x234] sm:$0xf0]  ;;  %v5414_v32 = vor.u32 %v6310_v60, %v5413_v25  ;;  %v6272_v2 = vld [vmem:[#allocation11 + $0x28c] sm:$0xf] }
 0x183   :  { %2906 = vmatpush.bf16.msra.mxu0 %v5110_v7  ;;  %v1854_v44 = vpop.f32.mrf.mxu0  ;;  %v4999_v7 = vld [vmem:[#allocation11 + $0x78] sm:$0xf0]  ;;  %v5349_v62 = vld [vmem:[#allocation11 + $0x328] sm:$0xf]  ;;  %v6294_v25 = vld [vmem:[#allocation11 + $0x334] sm:$0xf0] }
 0x184   :  { %2877 = vmatpush.bf16.msrb.mxu2 %v5410_v41  ;;  %v5191_v41 = vld [vmem:[#allocation11 + $0x1f8] sm:$0xf0]  ;;  %v5205_v44 = vld [vmem:[#allocation11 + $0x208] sm:$0xf] }
 0x185   :  { %2868 = vmatpush.bf16.msrb.mxu1 %v5218_v48  ;;  %v5194_v36 = vor.u32 %v6252_v38, %v5191_v41  ;;  %v6208_v48 = vld [vmem:[#allocation11 + $0x8c] sm:$0xf]  ;;  %2942 = vmatpush.bf16.msrb.mxu3 %v5034_v39  ;;  %v5397_v38 = vld [vmem:[#allocation11 + $0x388] sm:$0xf]  ;;  %v6306_v39 = vld [vmem:[#allocation11 + $0x394] sm:$0xf0] }
 0x186   :  { %v5018_v54 = vor.u32 %v6208_v48, %v5015_v50  ;;  %v5319_v48 = vld [vmem:[#allocation11 + $0x2f8] sm:$0xf0]  ;;  %v5398_v50 = vor.u32 %v6306_v39, %v5397_v38  ;;  %v6268_v39 = vld [vmem:[#allocation11 + $0x26c] sm:$0xf] }
 0x187   :  { %2907 = vmatpush.bf16.msra.mxu0 %v5094_v22  ;;  %v5430_v22 = vor.u32 %v6314_v11, %v5429_v10  ;;  %v6228_v10 = vld [vmem:[#allocation11 + $0x12c] sm:$0xf]  ;;  %v5095_v11 = vld [vmem:[#allocation11 + $0x138] sm:$0xf0] }
 0x188   :  { %2878 = vmatpush.bf16.msrb.mxu2 %v5394_v59  ;;  %v1813_v59 = vpop.f32.mrf.mxu1 }
 0x189   :  { %2869 = vmatpush.bf16.msrb.mxu1 %v5202_v9  ;;  %v6902_v1 = vadd.f32 %v1813_v59, %v6887_v16  ;;  %v6204_v9 = vld [vmem:[#allocation11 + $0x6c] sm:$0xf]  ;;  %2943 = vmatpush.bf16.msrb.mxu3 %v5018_v54  ;;  %v5254_v16 = vor.u32 %v6270_v5, %v5253_v4  ;;  %v4954_v59 = vor.u32 %v6192_v51, %v4951_v52 }
 0x18a   :  { %v6264_v51 = vld [vmem:[#allocation11 + $0x24c] sm:$0xf] }
 0x18b   :  { %2908 = vmatpush.bf16.msra.mxu0 %v5078_v33  ;;  %v1904_v17 = vpop.f32.mrf.mxu0  ;;  %v6196_v33 = vld [vmem:[#allocation11 + $0x2c] sm:$0xf] }
 0x18c   :  { %2879 = vmatpush.bf16.msrb.mxu2 %v5378_v15  ;;  %2870 = vmatmul.bf16.vlgmr.msrb.gmra.mxu1 %v6873_v26  ;;  %v5162_v15 = vor.u32 %v6244_v8, %v5159_v13  ;;  %v6906_v21 = vadd.f32 %v1904_v17, %v1892_v14  ;;  %v4970_v41 = vor.u32 %v6196_v33, %v4967_v34  ;;  %v5303_v8 = vld [vmem:[#allocation11 + $0x2d8] sm:$0xf0]  ;;  %v6298_v13 = vld [vmem:[#allocation11 + $0x354] sm:$0xf0]  ;;  %v6276_v17 = vld [vmem:[#allocation11 + $0x2ac] sm:$0xf] }
 0x18d   :  { %2914 = vmatpush.bf16.msra.mxu1 %v5318_v12  ;;  %v5002_v12 = vor.u32 %v6204_v9, %v4999_v7  ;;  %v6280_v9 = vld [vmem:[#allocation11 + $0x2cc] sm:$0xf]  ;;  %v5382_v7 = vor.u32 %v6302_v57, %v5381_v55  ;;  %v5098_v14 = vor.u32 %v6228_v10, %v5095_v11  ;;  %v6341_v55 = vld [vmem:[#allocation14 + $0xac] sm:$0xf0]  ;;  %v5501_v11 = vld [vmem:[#allocation14 + $0x60] sm:$0xf] }
 0x18e   :  { %2909 = vmatmul.bf16.vlgmr.msra.gmra.mxu0 %v6867_v40  ;;  %v6316_v34 = vld [vmem:[#allocation11 + $0x3ec] sm:$0xf] }
 0x18f   :  { %2953 = vmatpush.bf16.msrb.mxu0 %v5194_v36  ;;  %2944 = vmatpush.bf16.msrb.mxu3 %v5002_v12  ;;  %v5222_v36 = vor.u32 %v6262_v31, %v5221_v30  ;;  %v5365_v12 = vld [vmem:[#allocation11 + $0x348] sm:$0xf]  ;;  %v6349_v30 = vld [vmem:[#allocation14 + $0xec] sm:$0xf0] }
 0x190   :  { %2880 = vmatpush.bf16.msrb.mxu2 %v5362_v28  ;;  %v1815_v56 = vpop.f32.mrf.mxu1  ;;  %v5238_v28 = vor.u32 %v6266_v19, %v5237_v18  ;;  %v5366_v18 = vor.u32 %v6298_v13, %v5365_v12  ;;  %v5287_v19 = vld [vmem:[#allocation11 + $0x2b8] sm:$0xf0]  ;;  %v5333_v31 = vld [vmem:[#allocation11 + $0x308] sm:$0xf]  ;;  %v6333_v12 = vld [vmem:[#allocation14 + $0x6c] sm:$0xf0] }
 0x191   :  { %2915 = vmatpush.bf16.msra.mxu1 %v5302_v27  ;;  %v4986_v27 = vor.u32 %v6200_v23, %v4983_v24  ;;  %v5079_v23 = vld [vmem:[#allocation11 + $0x118] sm:$0xf0]  ;;  %v5350_v56 = vor.u32 %v6294_v25, %v5349_v62 }
 0x192   :  { %v5383_v62 = vld [vmem:[#allocation11 + $0x378] sm:$0xf0] }
 0x193   :  { %2954 = vmatpush.bf16.msrb.mxu0 %v5178_v35  ;;  %2945 = vmatpush.bf16.msrb.mxu3 %v4986_v27  ;;  %v1906_v46 = vpop.f32.mrf.mxu0 }
 0x194   :  { %2881 = vmatpush.bf16.msrb.mxu2 %v5346_v45  ;;  %v5130_v45 = vor.u32 %v6236_v37, %v5127_v42  ;;  %v5447_v37 = vld [vmem:[#allocation11 + $0x3f8] sm:$0xf0] }
 0x195   :  { %2916 = vmatpush.bf16.msra.mxu1 %v5286_v43  ;;  %v1133_v43 = vperm.slane %v6878_v0, 3  ;;  %v5111_v0 = vld [vmem:[#allocation11 + $0x158] sm:$0xf0] }
 0x196   :  { %v1943_v54 = vpop.f32.mrf.mxu3  ;;  %v5114_v4 = vor.u32 %v6232_v53, %v5111_v0  ;;  %v5255_v42 = vld [vmem:[#allocation11 + $0x278] sm:$0xf0] }
 0x197   :  { %2955 = vmatpush.bf16.msrb.mxu0 %v5162_v15  ;;  %2946 = vmatpush.bf16.msrb.mxu3 %v4970_v41  ;;  %v5239_v53 = vld [vmem:[#allocation11 + $0x258] sm:$0xf0] }
 0x198   :  { %2882 = vmatpush.bf16.msrb.mxu2 %v5330_v3  ;;  %v5206_v3 = vor.u32 %v6258_v47, %v5205_v44  ;;  %v5450_v44 = vor.u32 %v6316_v34, %v5447_v37  ;;  %v6312_v47 = vld [vmem:[#allocation11 + $0x3cc] sm:$0xf]  ;;  %v5351_v34 = vld [vmem:[#allocation11 + $0x338] sm:$0xf0] }
 0x199   :  { %2917 = vmatpush.bf16.msra.mxu1 %v5270_v61  ;;  %v6910_v61 = vadd.f32 %v1943_v54, %v1133_v43  ;;  %v1865_v35 = vpop.f32.mrf.mxu1  ;;  %v5549_v43 = vld [vmem:[#allocation14 + $0xc0] sm:$0xf] }
 0x19a   :  { %v6913_v5 = vadd.f32 %v1865_v35, %v6896_v63  ;;  %v5306_v63 = vor.u32 %v6280_v9, %v5303_v8  ;;  %v5533_v54 = vld [vmem:[#allocation14 + $0xa0] sm:$0xf]  ;;  %v6308_v35 = vld [vmem:[#allocation11 + $0x3ac] sm:$0xf]  ;;  %v6337_v9 = vld [vmem:[#allocation14 + $0x8c] sm:$0xf0] }
 0x19b   :  { %2883 = vmatmul.bf16.vlgmr.msrb.gmra.mxu2 %v6889_v20  ;;  %2956 = vmatpush.bf16.msrb.mxu0 %v5146_v29  ;;  %v5565_v29 = vld [vmem:[#allocation14 + $0xe0] sm:$0xf]  ;;  %v5223_v8 = vld [vmem:[#allocation11 + $0x238] sm:$0xf0] }
 0x19c   :  { %2927 = vmatpush.bf16.msra.mxu2 %v5446_v6  ;;  %v5322_v6 = vor.u32 %v6284_v49, %v5319_v48  ;;  %2947 = vmatpush.bf16.msrb.mxu3 %v4954_v59  ;;  %v5431_v49 = vld [vmem:[#allocation11 + $0x3d8] sm:$0xf0]  ;;  %v5534_v59 = vor.u32 %v6341_v55, %v5533_v54  ;;  %v5551_v55 = vld [vmem:[#allocation14 + $0xd0] sm:$0xf0] }
 0x19d   :  { %2918 = vmatpush.bf16.msra.mxu1 %v5254_v16  ;;  %v5434_v57 = vor.u32 %v6312_v47, %v5431_v49  ;;  %v6347_v47 = vld [vmem:[#allocation14 + $0xe4] sm:$0xf]  ;;  %v5567_v49 = vld [vmem:[#allocation14 + $0xf0] sm:$0xf0] }
 0x19e   :  { %v1826_v16 = vpop.f32.mrf.mxu2  ;;  %v1945_v24 = vpop.f32.mrf.mxu3 }
 0x19f   :  { %2957 = vmatpush.bf16.msrb.mxu0 %v5130_v45  ;;  %v6916_v15 = vadd.f32 %v1826_v16, %v6902_v1  ;;  %2948 = vmatmul.bf16.vlgmr.msrb.gmra.mxu3 %v6864_v58  ;;  %v5290_v1 = vor.u32 %v6276_v17, %v5287_v19  ;;  %v6290_v58 = vld [vmem:[#allocation11 + $0x314] sm:$0xf0]  ;;  %v5399_v16 = vld [vmem:[#allocation11 + $0x398] sm:$0xf0]  ;;  %v6256_v17 = vld [vmem:[#allocation11 + $0x20c] sm:$0xf]  ;;  %v5502_v19 = vor.u32 %v6333_v12, %v5501_v11 }
 0x1a0   :  { %2928 = vmatpush.bf16.msra.mxu2 %v5430_v22  ;;  %v6224_v22 = vld [vmem:[#allocation11 + $0x10c] sm:$0xf]  ;;  %v5334_v41 = vor.u32 %v6290_v58, %v5333_v31  ;;  %v5519_v12 = vld [vmem:[#allocation14 + $0x90] sm:$0xf0] }
 0x1a1   :  { %2919 = vmatpush.bf16.msra.mxu1 %v5238_v28  ;;  %v5082_v60 = vor.u32 %v6224_v22, %v5079_v23  ;;  %v1867_v27 = vpop.f32.mrf.mxu1  ;;  %v5271_v28 = vld [vmem:[#allocation11 + $0x298] sm:$0xf0]  ;;  %v6300_v24 = vld [vmem:[#allocation11 + $0x36c] sm:$0xf] }
 0x1a2   :  { %v5274_v38 = vor.u32 %v6272_v2, %v5271_v28  ;;  %v6329_v27 = vld [vmem:[#allocation14 + $0x4c] sm:$0xf0]  ;;  %v5367_v28 = vld [vmem:[#allocation11 + $0x358] sm:$0xf0] }
 0x1a3   :  { %2958 = vmatpush.bf16.msrb.mxu0 %v5114_v4  ;;  %v5242_v4 = vor.u32 %v6264_v51, %v5239_v53  ;;  %v6377_v51 = vld [vmem:[#allocation14 + $0x1cc] sm:$0xf0] }
 0x1a4   :  { %2929 = vmatpush.bf16.msra.mxu2 %v5414_v32  ;;  %v5566_v32 = vor.u32 %v6349_v30, %v5565_v29  ;;  %v5469_v29 = vld [vmem:[#allocation14 + $0x20] sm:$0xf]  ;;  %v6325_v30 = vld [vmem:[#allocation14 + $0x2c] sm:$0xf0] }
 0x1a5   :  { %2920 = vmatpush.bf16.msra.mxu1 %v5222_v36  ;;  %v6345_v36 = vld [vmem:[#allocation14 + $0xcc] sm:$0xf0]  ;;  %v5470_v58 = vor.u32 %v6325_v30, %v5469_v29 }
 0x1a6   :  { %v1828_v33 = vpop.f32.mrf.mxu2  ;;  %3786 = vmatpush.bf16.msra.mxu3 %v5566_v32  ;;  %v5550_v45 = vor.u32 %v6345_v36, %v5549_v43  ;;  %v5693_v36 = vld [vmem:[#allocation14 + $0x1e0] sm:$0xf] }
 0x1a7   :  { %2959 = vmatpush.bf16.msrb.mxu0 %v5098_v14  ;;  %v6304_v14 = vld [vmem:[#allocation11 + $0x38c] sm:$0xf] }
 0x1a8   :  { %2930 = vmatpush.bf16.msra.mxu2 %v5398_v50  ;;  %v5258_v50 = vor.u32 %v6268_v39, %v5255_v42  ;;  %v5402_v22 = vor.u32 %v6304_v14, %v5399_v16  ;;  %v6292_v33 = vld [vmem:[#allocation11 + $0x32c] sm:$0xf]  ;;  %v6321_v39 = vld [vmem:[#allocation14 + $0xc] sm:$0xf0]  ;;  %v6331_v16 = vld [vmem:[#allocation14 + $0x64] sm:$0xf] }
 0x1a9   :  { %2921 = vmatpush.bf16.msra.mxu1 %v5206_v3  ;;  %v1917_v46 = vpop.f32.mrf.mxu1  ;;  %v5415_v3 = vld [vmem:[#allocation11 + $0x3b8] sm:$0xf0]  ;;  %v6288_v42 = vld [vmem:[#allocation11 + $0x30c] sm:$0xf]  ;;  %v6365_v14 = vld [vmem:[#allocation14 + $0x16c] sm:$0xf0] }
 0x1aa   :  { %v6922_v48 = vadd.f32 %v1917_v46, %v6906_v21  ;;  %3787 = vmatpush.bf16.msra.mxu3 %v5550_v45  ;;  %v5418_v10 = vor.u32 %v6308_v35, %v5415_v3  ;;  %v5335_v45 = vld [vmem:[#allocation11 + $0x318] sm:$0xf0]  ;;  %v5661_v35 = vld [vmem:[#allocation14 + $0x1a0] sm:$0xf]  ;;  %v6373_v3 = vld [vmem:[#allocation14 + $0x1ac] sm:$0xf0] }
 0x1ab   :  { %2960 = vmatpush.bf16.msrb.mxu0 %v5082_v60  ;;  %v1956_v52 = vpop.f32.mrf.mxu0  ;;  %v5485_v60 = vld [vmem:[#allocation14 + $0x40] sm:$0xf] }
 0x1ac   :  { %2931 = vmatpush.bf16.msra.mxu2 %v5382_v7  ;;  %2922 = vmatmul.bf16.vlgmr.msra.gmra.mxu1 %v6873_v26  ;;  %v6260_v7 = vld [vmem:[#allocation11 + $0x22c] sm:$0xf]  ;;  %v5486_v2 = vor.u32 %v6329_v27, %v5485_v60  ;;  %v5597_v27 = vld [vmem:[#allocation14 + $0x120] sm:$0xf] }
 0x1ad   :  { %2966 = vmatpush.bf16.msrb.mxu1 %v5322_v6  ;;  %v5517_v6 = vld [vmem:[#allocation14 + $0x80] sm:$0xf] }
 0x1ae   :  { %2961 = vmatmul.bf16.vlgmr.msrb.gmra.mxu0 %v6867_v40  ;;  %v6925_v40 = vadd.f32 %v1956_v52, %v6910_v61  ;;  %v1878_v0 = vpop.f32.mrf.mxu2  ;;  %3788 = vmatpush.bf16.msra.mxu3 %v5534_v59  ;;  %v5518_v61 = vor.u32 %v6337_v9, %v5517_v6  ;;  %v6343_v52 = vld [vmem:[#allocation14 + $0xc4] sm:$0xf]  ;;  %v5662_v6 = vor.u32 %v6373_v3, %v5661_v35  ;;  %v5535_v9 = vld [vmem:[#allocation14 + $0xb0] sm:$0xf0] }
 0x1af   :  { %v6928_v21 = vadd.f32 %v1878_v0, %v6913_v5  ;;  %v5226_v5 = vor.u32 %v6260_v7, %v5223_v8  ;;  %v5554_v59 = vor.u32 %v6343_v52, %v5551_v55  ;;  %v5645_v8 = vld [vmem:[#allocation14 + $0x180] sm:$0xf]  ;;  %v6371_v35 = vld [vmem:[#allocation14 + $0x1a4] sm:$0xf] }
 0x1b0   :  { %2932 = vmatpush.bf16.msra.mxu2 %v5366_v18  ;;  %v5207_v18 = vld [vmem:[#allocation11 + $0x218] sm:$0xf0] }
 0x1b1   :  { %2967 = vmatpush.bf16.msrb.mxu1 %v5306_v63  ;;  %v1919_v13 = vpop.f32.mrf.mxu1  ;;  %v5210_v25 = vor.u32 %v6256_v17, %v5207_v18 }
 0x1b2   :  { %3789 = vmatpush.bf16.msra.mxu3 %v5518_v61  ;;  %v6369_v61 = vld [vmem:[#allocation14 + $0x18c] sm:$0xf0] }
 0x1b3   :  { %v1958_v63 = vpop.f32.mrf.mxu0  ;;  %v5646_v11 = vor.u32 %v6369_v61, %v5645_v8  ;;  %v6401_v8 = vld [vmem:[#allocation14 + $0x28c] sm:$0xf0]  ;;  %v6367_v61 = vld [vmem:[#allocation14 + $0x184] sm:$0xf] }
 0x1b4   :  { %2933 = vmatpush.bf16.msra.mxu2 %v5350_v56  ;;  %v6296_v56 = vld [vmem:[#allocation11 + $0x34c] sm:$0xf] }
 0x1b5   :  { %2968 = vmatpush.bf16.msrb.mxu1 %v5290_v1  ;;  %v5386_v1 = vor.u32 %v6300_v24, %v5383_v62  ;;  %v5370_v31 = vor.u32 %v6296_v56, %v5367_v28  ;;  %v5471_v28 = vld [vmem:[#allocation14 + $0x30] sm:$0xf0] }
 0x1b6   :  { %v1880_v23 = vpop.f32.mrf.mxu2  ;;  %3790 = vmatpush.bf16.msra.mxu3 %v5502_v19 }
 0x1b7   :  { %v6327_v23 = vld [vmem:[#allocation14 + $0x44] sm:$0xf] }
 0x1b8   :  { %2934 = vmatpush.bf16.msra.mxu2 %v5334_v41  ;;  %v5354_v41 = vor.u32 %v6292_v33, %v5351_v34  ;;  %v5581_v33 = vld [vmem:[#allocation14 + $0x100] sm:$0xf]  ;;  %v6353_v34 = vld [vmem:[#allocation14 + $0x10c] sm:$0xf0] }
 0x1b9   :  { %2969 = vmatpush.bf16.msrb.mxu1 %v5274_v38  ;;  %v5453_v38 = vld [vmem:[#allocation14] sm:$0xf] }
 0x1ba   :  { %3791 = vmatpush.bf16.msra.mxu3 %v5486_v2  ;;  %v5454_v43 = vor.u32 %v6321_v39, %v5453_v38  ;;  %v6323_v2 = vld [vmem:[#allocation14 + $0x24] sm:$0xf]  ;;  %v5582_v39 = vor.u32 %v6353_v34, %v5581_v33 }
 0x1bb   :  { %2935 = vmatmul.bf16.vlgmr.msra.gmra.mxu2 %v6889_v20  ;;  %v5474_v30 = vor.u32 %v6323_v2, %v5471_v28  ;;  %v6319_v38 = vld [vmem:[#allocation14 + $0x4] sm:$0xf]  ;;  %v5615_v2 = vld [vmem:[#allocation14 + $0x150] sm:$0xf0] }
 0x1bc   :  { %2979 = vmatpush.bf16.msrb.mxu2 %v5450_v44  ;;  %v6381_v44 = vld [vmem:[#allocation14 + $0x1ec] sm:$0xf0]  ;;  %v6355_v33 = vld [vmem:[#allocation14 + $0x124] sm:$0xf] }
 0x1bd   :  { %2970 = vmatpush.bf16.msrb.mxu1 %v5258_v50  ;;  %v5694_v46 = vor.u32 %v6381_v44, %v5693_v36  ;;  %v5570_v50 = vor.u32 %v6347_v47, %v5567_v49  ;;  %v6413_v44 = vld [vmem:[#allocation14 + $0x2ec] sm:$0xf0] }
 0x1be   :  { %v1930_v32 = vpop.f32.mrf.mxu2  ;;  %3792 = vmatpush.bf16.msra.mxu3 %v5470_v58  ;;  %v1986_v58 = vsub.f32 0.0, %v6916_v15  ;;  %v5805_v15 = vld [vmem:[#allocation14 + $0x2c0] sm:$0xf] }
 0x1bf   :  { %v6933_v37 = vadd.f32 %v1930_v32, %v6922_v48  ;;  %3799 = vmatpush.bf16.msra.mxu0 %v5694_v46  ;;  %v5677_v48 = vld [vmem:[#allocation14 + $0x1c0] sm:$0xf]  ;;  %v5695_v46 = vld [vmem:[#allocation14 + $0x1f0] sm:$0xf0] }
 0x1c0   :  { %2980 = vmatpush.bf16.msrb.mxu2 %v5434_v57  ;;  %v5678_v54 = vor.u32 %v6377_v51, %v5677_v48  ;;  %v6375_v48 = vld [vmem:[#allocation14 + $0x1c4] sm:$0xf] }
 0x1c1   :  { %2971 = vmatpush.bf16.msrb.mxu1 %v5242_v4  ;;  %v6339_v4 = vld [vmem:[#allocation14 + $0xa4] sm:$0xf] }
 0x1c2   :  { %3793 = vmatpush.bf16.msra.mxu3 %v5454_v43  ;;  %v5538_v7 = vor.u32 %v6339_v4, %v5535_v9  ;;  %v5663_v4 = vld [vmem:[#allocation14 + $0x1b0] sm:$0xf0] }
 0x1c3   :  { %3800 = vmatpush.bf16.msra.mxu0 %v5678_v54 }
 0x1c4   :  { %2981 = vmatpush.bf16.msrb.mxu2 %v5418_v10  ;;  %v6335_v10 = vld [vmem:[#allocation14 + $0x84] sm:$0xf] }
 0x1c5   :  { %2972 = vmatpush.bf16.msrb.mxu1 %v5226_v5  ;;  %v5522_v13 = vor.u32 %v6335_v10, %v5519_v12  ;;  %v5503_v5 = vld [vmem:[#allocation14 + $0x70] sm:$0xf0] }
 0x1c6   :  { %3838 = vmatpush.bf16.msrb.mxu3 %v5570_v50  ;;  %v1932_v53 = vpop.f32.mrf.mxu2  ;;  %v5506_v18 = vor.u32 %v6331_v16, %v5503_v5  ;;  %v1990_v50 = vmul.f32 1.442695, %v1986_v58  ;;  %v5647_v12 = vld [vmem:[#allocation14 + $0x190] sm:$0xf0]  ;;  %v6389_v58 = vld [vmem:[#allocation14 + $0x22c] sm:$0xf0] }
 0x1c7   :  { %3801 = vmatpush.bf16.msra.mxu0 %v5662_v6  ;;  %v5679_v53 = vld [vmem:[#allocation14 + $0x1d0] sm:$0xf0]  ;;  %v5666_v6 = vor.u32 %v6371_v35, %v5663_v4  ;;  %v6346_v4 = vld [vmem:[#allocation14 + $0xd4] sm:$0xf0] }
 0x1c8   :  { %2982 = vmatpush.bf16.msrb.mxu2 %v5402_v22  ;;  %v5613_v22 = vld [vmem:[#allocation14 + $0x140] sm:$0xf]  ;;  %v5682_v55 = vor.u32 %v6375_v48, %v5679_v53  ;;  %6458 = vpow2.f32 %v1990_v50 }
 0x1c9   :  { %2973 = vmatpush.bf16.msrb.mxu1 %v5210_v25  ;;  %v1969_v57 = vpop.f32.mrf.mxu1  ;;  %v5487_v25 = vld [vmem:[#allocation14 + $0x50] sm:$0xf0]  ;;  %v5949_v53 = vld [vmem:[#allocation14 + $0x3e0] sm:$0xf] }
 0x1ca   :  { %v1970_v0 = vadd.f32 %v1969_v57, %v6925_v40  ;;  %3839 = vmatpush.bf16.msrb.mxu3 %v5554_v59  ;;  %v5629_v40 = vld [vmem:[#allocation14 + $0x160] sm:$0xf]  ;;  %v5490_v60 = vor.u32 %v6327_v23, %v5487_v25  ;;  %v6944_v57 = vld [vmem:[#allocation13] sm:$0xf]  ;;  %v5631_v23 = vld [vmem:[#allocation14 + $0x170] sm:$0xf0] }
 0x1cb   :  { %3802 = vmatpush.bf16.msra.mxu0 %v5646_v11  ;;  %v5630_v17 = vor.u32 %v6365_v14, %v5629_v40  ;;  %v6939_v24 = vpop.f32.mrf.mxu0  ;;  %v5789_v59 = vld [vmem:[#allocation14 + $0x2a0] sm:$0xf]  ;;  %v2136_v9 = vperm.slane %v6944_v57, 0  ;;  %v5650_v40 = vor.u32 %v6367_v61, %v5647_v12  ;;  %v6407_v61 = vld [vmem:[#allocation14 + $0x2c4] sm:$0xf] }
 0x1cc   :  { %2983 = vmatpush.bf16.msrb.mxu2 %v5386_v1  ;;  %2974 = vmatmul.bf16.vlgmr.msrb.gmra.mxu1 %v6873_v26  ;;  %v5338_v26 = vor.u32 %v6288_v42, %v5335_v45  ;;  %v6357_v1 = vld [vmem:[#allocation14 + $0x12c] sm:$0xf0]  ;;  %v5821_v42 = vld [vmem:[#allocation14 + $0x2e0] sm:$0xf]  ;;  %v6379_v45 = vld [vmem:[#allocation14 + $0x1e4] sm:$0xf] }
 0x1cd   :  { %v5598_v56 = vor.u32 %v6357_v1, %v5597_v27  ;;  %v5822_v47 = vor.u32 %v6413_v44, %v5821_v42  ;;  %v5698_v49 = vor.u32 %v6379_v45, %v5695_v46  ;;  %v6359_v27 = vld [vmem:[#allocation14 + $0x144] sm:$0xf]  ;;  %v6350_v44 = vld [vmem:[#allocation14 + $0xf4] sm:$0xf0]  ;;  %v5807_v12 = vld [vmem:[#allocation14 + $0x2d0] sm:$0xf0] }
 0x1ce   :  { %3840 = vmatpush.bf16.msrb.mxu3 %v5538_v7  ;;  %v5773_v7 = vld [vmem:[#allocation14 + $0x280] sm:$0xf]  ;;  %v6459_v10 = vpop.eup %6458  ;;  %v5618_v28 = vor.u32 %v6359_v27, %v5615_v2  ;;  %v2137_v27 = vperm.slane %v6944_v57, 1 }
 0x1cf   :  { %3803 = vmatpush.bf16.msra.mxu0 %v5630_v17  ;;  %3812 = vmatpush.bf16.msra.mxu1 %v5822_v47  ;;  %v5774_v11 = vor.u32 %v6401_v8, %v5773_v7  ;;  %v1998_v16 = vadd.f32 1.0, %v6459_v10  ;;  %v5757_v17 = vld [vmem:[#allocation14 + $0x260] sm:$0xf]  ;;  %v6441_v8 = vld [vmem:[#allocation14 + $0x3cc] sm:$0xf0] }
 0x1d0   :  { %2984 = vmatpush.bf16.msrb.mxu2 %v5370_v31  ;;  %v5709_v47 = vld [vmem:[#allocation14 + $0x200] sm:$0xf] }
 0x1d1   :  { %v1971_v63 = vpop.f32.mrf.mxu1  ;;  %v6937_v19 = vpop.f32.mrf.mxu3  ;;  %6460 = vrcp.f32 %v1998_v16  ;;  %v5933_v7 = vld [vmem:[#allocation14 + $0x3c0] sm:$0xf]  ;;  %v5810_v16 = vor.u32 %v6407_v61, %v5807_v12  ;;  %v5727_v12 = vld [vmem:[#allocation14 + $0x230] sm:$0xf0] }
 0x1d2   :  { %3841 = vmatpush.bf16.msrb.mxu3 %v5522_v13  ;;  %v2794_v14 = vadd.f32 %v6937_v19, %v2136_v9  ;;  %v6393_v19 = vld [vmem:[#allocation14 + $0x24c] sm:$0xf0]  ;;  %v5901_v2 = vld [vmem:[#allocation14 + $0x380] sm:$0xf] }
 0x1d3   :  { %v2808_v43 = vpop.f32.mrf.mxu0 }
 0x1d4   :  { %2985 = vmatpush.bf16.msrb.mxu2 %v5354_v41  ;;  %v5455_v41 = vld [vmem:[#allocation14 + $0x10] sm:$0xf0]  ;;  %v2807_v25 = vadd.f32 %v6939_v24, %v2794_v14  ;;  %v6342_v14 = vld [vmem:[#allocation14 + $0xb4] sm:$0xf0] }
 0x1d5   :  { %v5458_v36 = vor.u32 %v6319_v38, %v5455_v41  ;;  %v1987_v41 = vsub.f32 0.0, %v6928_v21 }
 0x1d6   :  { %3842 = vmatpush.bf16.msrb.mxu3 %v5506_v18  ;;  %v6397_v18 = vld [vmem:[#allocation14 + $0x26c] sm:$0xf0] }
 0x1d7   :  { %v6461_v34 = vpop.eup %6460  ;;  %v1992_v48 = vmul.f32 1.442695, %v1987_v41 }
 0x1d8   :  { %2986 = vmatpush.bf16.msrb.mxu2 %v5338_v26  ;;  %v6409_v26 = vld [vmem:[#allocation14 + $0x2cc] sm:$0xf0]  ;;  %v2996_v46 = vadd.f32 1.0, %v6461_v34 }
 0x1d9   :  { %v2795_v31 = vpop.f32.mrf.mxu3  ;;  %v5806_v52 = vor.u32 %v6409_v26, %v5805_v15  ;;  %v6351_v15 = vld [vmem:[#allocation14 + $0x104] sm:$0xf]  ;;  %v5583_v26 = vld [vmem:[#allocation14 + $0x110] sm:$0xf0]  ;;  %6462 = vpow2.f32 %v1992_v48  ;;  %v6425_v48 = vld [vmem:[#allocation14 + $0x34c] sm:$0xf0] }
 0x1da   :  { %3843 = vmatpush.bf16.msrb.mxu3 %v5490_v60  ;;  %v5741_v60 = vld [vmem:[#allocation14 + $0x240] sm:$0xf] }
 0x1db   :  { %2987 = vmatmul.bf16.vlgmr.msrb.gmra.mxu2 %v6889_v20  ;;  %v6361_v20 = vld [vmem:[#allocation14 + $0x14c] sm:$0xf0]  ;;  %3813 = vmatpush.bf16.msra.mxu1 %v5806_v52  ;;  %v5742_v1 = vor.u32 %v6393_v19, %v5741_v60  ;;  %v5725_v31 = vld [vmem:[#allocation14 + $0x220] sm:$0xf]  ;;  %v5586_v52 = vor.u32 %v6351_v15, %v5583_v26  ;;  %v5525_v60 = vld [vmem:[#allocation14 + $0x88] sm:$0xf] }
 0x1dc   :  { %v5614_v62 = vor.u32 %v6361_v20, %v5613_v22  ;;  %v5758_v22 = vor.u32 %v6397_v18, %v5757_v17  ;;  %v6363_v20 = vld [vmem:[#allocation14 + $0x164] sm:$0xf]  ;;  %v5726_v24 = vor.u32 %v6389_v58, %v5725_v31  ;;  %v5917_v17 = vld [vmem:[#allocation14 + $0x3a0] sm:$0xf]  ;;  %v6437_v18 = vld [vmem:[#allocation14 + $0x3ac] sm:$0xf0] }
 0x1dd   :  { %v6338_v19 = vld [vmem:[#allocation14 + $0x94] sm:$0xf0]  ;;  %v5869_v26 = vld [vmem:[#allocation14 + $0x340] sm:$0xf] }
 0x1de   :  { %3804 = vmatpush.bf16.msra.mxu0 %v5614_v62  ;;  %v1982_v29 = vpop.f32.mrf.mxu2  ;;  %3844 = vmatpush.bf16.msrb.mxu3 %v5474_v30  ;;  %v5634_v62 = vor.u32 %v6363_v20, %v5631_v23  ;;  %v5918_v20 = vor.u32 %v6437_v18, %v5917_v17  ;;  %v5791_v23 = vld [vmem:[#allocation14 + $0x2b0] sm:$0xf0]  ;;  %v5526_v34 = vor.u32 %v6338_v19, %v5525_v60  ;;  %v6330_v15 = vld [vmem:[#allocation14 + $0x54] sm:$0xf0]  ;;  %v6417_v60 = vld [vmem:[#allocation14 + $0x30c] sm:$0xf0] }
 0x1df   :  { %v6942_v32 = vadd.f32 %v1982_v29, %v1970_v0  ;;  %v6405_v0 = vld [vmem:[#allocation14 + $0x2ac] sm:$0xf0]  ;;  %v6382_v18 = vld [vmem:[#allocation14 + $0x1f4] sm:$0xf0]  ;;  %v6383_v19 = vld [vmem:[#allocation14 + $0x204] sm:$0xf] }
 0x1e0   :  { %v5790_v3 = vor.u32 %v6405_v0, %v5789_v59  ;;  %v6411_v59 = vld [vmem:[#allocation14 + $0x2e4] sm:$0xf]  ;;  %v5823_v0 = vld [vmem:[#allocation14 + $0x2f0] sm:$0xf0] }
 0x1e1   :  { %v6948_v5 = vpop.f32.mrf.mxu3 }
 0x1e2   :  { %3805 = vmatpush.bf16.msra.mxu0 %v5598_v56  ;;  %3845 = vmatpush.bf16.msrb.mxu3 %v5458_v36  ;;  %v5573_v36 = vld [vmem:[#allocation14 + $0xe8] sm:$0xf] }
 0x1e3   :  { %3814 = vmatpush.bf16.msra.mxu1 %v5790_v3  ;;  %v5557_v3 = vld [vmem:[#allocation14 + $0xc8] sm:$0xf] }
 0x1e6   :  { %3806 = vmatpush.bf16.msra.mxu0 %v5582_v39  ;;  %v1984_v51 = vpop.f32.mrf.mxu2  ;;  %v5599_v39 = vld [vmem:[#allocation14 + $0x130] sm:$0xf0] }
 0x1e7   :  { %3815 = vmatpush.bf16.msra.mxu1 %v5774_v11  ;;  %v5602_v43 = vor.u32 %v6355_v33, %v5599_v39  ;;  %v5934_v11 = vor.u32 %v6441_v8, %v5933_v7  ;;  %v6334_v39 = vld [vmem:[#allocation14 + $0x74] sm:$0xf0]  ;;  %v1988_v8 = vsub.f32 0.0, %v6933_v37 }
 0x1e9   :  { %v2819_v54 = vpop.f32.mrf.mxu1  ;;  %v2847_v29 = vpop.f32.mrf.mxu3 }
 0x1ea   :  { %3851 = vmatpush.bf16.msrb.mxu0 %v5698_v49  ;;  %v2820_v56 = vadd.f32 %v2819_v54, %v2807_v25  ;;  %v6385_v49 = vld [vmem:[#allocation14 + $0x20c] sm:$0xf0] }
 0x1eb   :  { %v6950_v63 = vpop.f32.mrf.mxu0  ;;  %3816 = vmatpush.bf16.msra.mxu1 %v5758_v22  ;;  %v5710_v50 = vor.u32 %v6385_v49, %v5709_v47  ;;  %v6445_v54 = vld [vmem:[#allocation14 + $0x3ec] sm:$0xf0]  ;;  %v6403_v22 = vld [vmem:[#allocation14 + $0x2a4] sm:$0xf] }
 0x1ec   :  { %v5950_v21 = vor.u32 %v6445_v54, %v5949_v53  ;;  %v5743_v53 = vld [vmem:[#allocation14 + $0x250] sm:$0xf0] }
 0x1ee   :  { %3852 = vmatpush.bf16.msrb.mxu0 %v5682_v55  ;;  %v5574_v55 = vor.u32 %v6350_v44, %v5573_v36  ;;  %3825 = vmatpush.bf16.msra.mxu2 %v5950_v21  ;;  %v6429_v36 = vld [vmem:[#allocation14 + $0x36c] sm:$0xf0] }
 0x1ef   :  { %3817 = vmatpush.bf16.msra.mxu1 %v5742_v1  ;;  %v6463_v1 = vpop.eup %6462 }
 0x1f0   :  { %v1999_v33 = vadd.f32 1.0, %v6463_v1  ;;  %v1994_v1 = vmul.f32 1.442695, %v1988_v8  ;;  %v5903_v8 = vld [vmem:[#allocation14 + $0x390] sm:$0xf0] }
 0x1f1   :  { %v2821_v13 = vpop.f32.mrf.mxu1 }
 0x1f2   :  { %3853 = vmatpush.bf16.msrb.mxu0 %v5666_v6  ;;  %v5826_v6 = vor.u32 %v6411_v59, %v5823_v0  ;;  %v5558_v13 = vor.u32 %v6346_v4, %v5557_v3  ;;  %3826 = vmatpush.bf16.msra.mxu2 %v5934_v11  ;;  %6464 = vrcp.f32 %v1999_v33  ;;  %v5477_v59 = vld [vmem:[#allocation14 + $0x28] sm:$0xf]  ;;  %v5853_v4 = vld [vmem:[#allocation14 + $0x320] sm:$0xf]  ;;  %v5951_v33 = vld [vmem:[#allocation14 + $0x3f0] sm:$0xf0] }
 0x1f3   :  { %v2860_v30 = vpop.f32.mrf.mxu0  ;;  %3818 = vmatpush.bf16.msra.mxu1 %v5726_v24  ;;  %v5509_v24 = vld [vmem:[#allocation14 + $0x68] sm:$0xf]  ;;  %6466 = vpow2.f32 %v1994_v1 }
 0x1f4   :  { %v5775_v30 = vld [vmem:[#allocation14 + $0x290] sm:$0xf0] }
 0x1f6   :  { %3854 = vmatpush.bf16.msrb.mxu0 %v5650_v40  ;;  %v5541_v40 = vld [vmem:[#allocation14 + $0xa8] sm:$0xf]  ;;  %3827 = vmatpush.bf16.msra.mxu2 %v5918_v20  ;;  %v5575_v20 = vld [vmem:[#allocation14 + $0xf8] sm:$0xf0] }
 0x1f7   :  { %3819 = vmatpush.bf16.msra.mxu1 %v5710_v50  ;;  %v5542_v25 = vor.u32 %v6342_v14, %v5541_v40  ;;  %v5510_v50 = vor.u32 %v6334_v39, %v5509_v24  ;;  %v5461_v40 = vld [vmem:[#allocation14 + $0x8] sm:$0xf]  ;;  %v6322_v14 = vld [vmem:[#allocation14 + $0x14] sm:$0xf0]  ;;  %v6344_v24 = vld [vmem:[#allocation14 + $0xcc] sm:$0xf] }
 0x1f8   :  { %v6465_v7 = vpop.eup %6464  ;;  %v5559_v39 = vld [vmem:[#allocation14 + $0xd8] sm:$0xf0] }
 0x1fa   :  { %3855 = vmatpush.bf16.msrb.mxu0 %v5634_v62  ;;  %v5794_v62 = vor.u32 %v6403_v22, %v5791_v23  ;;  %v6348_v22 = vld [vmem:[#allocation14 + $0xec] sm:$0xf] }
 0x1fb   :  { %3864 = vmatpush.bf16.msrb.mxu1 %v5826_v6  ;;  %v6421_v6 = vld [vmem:[#allocation14 + $0x32c] sm:$0xf0] }
 0x1fc   :  { %v5854_v11 = vor.u32 %v6421_v6, %v5853_v4  ;;  %v5527_v4 = vld [vmem:[#allocation14 + $0x98] sm:$0xf0] }
 0x1fe   :  { %3856 = vmatpush.bf16.msrb.mxu0 %v5618_v28  ;;  %v2832_v38 = vpop.f32.mrf.mxu2  ;;  %v6399_v28 = vld [vmem:[#allocation14 + $0x284] sm:$0xf] }
 0x1ff   :  { %v2833_v42 = vadd.f32 %v2832_v38, %v2820_v56  ;;  %3865 = vmatpush.bf16.msrb.mxu1 %v5810_v16  ;;  %v6433_v56 = vld [vmem:[#allocation14 + $0x38c] sm:$0xf0]  ;;  %v5778_v58 = vor.u32 %v6399_v28, %v5775_v30  ;;  %v2846_v38 = vadd.f32 %v6948_v5, %v2137_v27  ;;  %v6961_v41 = vpop.f32.mrf.mxu3  ;;  %v5493_v5 = vld [vmem:[#allocation14 + $0x48] sm:$0xf]  ;;  %v5711_v27 = vld [vmem:[#allocation14 + $0x210] sm:$0xf0]  ;;  %v5578_v30 = vor.u32 %v6348_v22, %v5575_v20 }
 0x200   :  { %v5902_v29 = vor.u32 %v6433_v56, %v5901_v2  ;;  %v5701_v16 = vld [vmem:[#allocation14 + $0x1e8] sm:$0xf]  ;;  %v5462_v56 = vor.u32 %v6322_v14, %v5461_v40  ;;  %v5714_v28 = vor.u32 %v6383_v19, %v5711_v27  ;;  %v6366_v14 = vld [vmem:[#allocation14 + $0x174] sm:$0xf0]  ;;  %v6427_v22 = vld [vmem:[#allocation14 + $0x364] sm:$0xf] }
 0x201   :  { %v2992_v45 = vmax.f32 %v2833_v42, 0.0  ;;  %v2859_v49 = vadd.f32 %v6950_v63, %v2846_v38  ;;  %v6326_v63 = vld [vmem:[#allocation14 + $0x34] sm:$0xf0]  ;;  %v5637_v40 = vld [vmem:[#allocation14 + $0x168] sm:$0xf] }
 0x202   :  { %3857 = vmatpush.bf16.msrb.mxu0 %v5602_v43  ;;  %v5885_v43 = vld [vmem:[#allocation14 + $0x360] sm:$0xf]  ;;  %3828 = vmatpush.bf16.msra.mxu2 %v5902_v29  ;;  %v5702_v29 = vor.u32 %v6382_v18, %v5701_v16  ;;  %v6378_v38 = vld [vmem:[#allocation14 + $0x1d4] sm:$0xf0]  ;;  %v6332_v16 = vld [vmem:[#allocation14 + $0x6c] sm:$0xf] }
 0x203   :  { %v3000_v51 = vmul.f32 %v2996_v46, %v2992_v45  ;;  %3866 = vmatpush.bf16.msrb.mxu1 %v5794_v62  ;;  %v5886_v44 = vor.u32 %v6429_v36, %v5885_v43  ;;  %v6395_v45 = vld [vmem:[#allocation14 + $0x264] sm:$0xf]  ;;  %v5759_v46 = vld [vmem:[#allocation14 + $0x270] sm:$0xf0]  ;;  %v2997_v62 = vadd.f32 1.0, %v6465_v7 }
 0x204   :  { %v5762_v47 = vor.u32 %v6395_v45, %v5759_v46  ;;  %v6439_v45 = vld [vmem:[#allocation14 + $0x3c4] sm:$0xf]  ;;  %v5935_v46 = vld [vmem:[#allocation14 + $0x3d0] sm:$0xf0]  ;;  %v6362_v19 = vld [vmem:[#allocation14 + $0x154] sm:$0xf0] }
 0x205   :  { %v6954_v35 = vpack.c.bf16 %v3000_v51, %v3000_v51  ;;  %v6391_v51 = vld [vmem:[#allocation14 + $0x244] sm:$0xf]  ;;  %v5887_v20 = vld [vmem:[#allocation14 + $0x370] sm:$0xf0]  ;;  %v6328_v27 = vld [vmem:[#allocation14 + $0x4c] sm:$0xf] }
 0x206   :  { %3858 = vmatpush.bf16.msrb.mxu0 %v5586_v52  ;;  %v2834_v9 = vpop.f32.mrf.mxu2  ;;  %3829 = vmatpush.bf16.msra.mxu2 %v5886_v44  ;;  %v5870_v52 = vor.u32 %v6425_v48, %v5869_v26  ;;  %v5746_v21 = vor.u32 %v6391_v51, %v5743_v53  ;;  %v5543_v26 = vld [vmem:[#allocation14 + $0xb8] sm:$0xf0]  ;;  %v5938_v48 = vor.u32 %v6439_v45, %v5935_v46  ;;  %v6435_v51 = vld [vmem:[#allocation14 + $0x3a4] sm:$0xf]  ;;  %v5855_v45 = vld [vmem:[#allocation14 + $0x330] sm:$0xf0] }
 0x207   :  { %3794 = vmatmul.bf16.vlgmr.msra.gmra.mxu3 %v6954_v35  ;;  %3867 = vmatpush.bf16.msrb.mxu1 %v5778_v58  ;;  %v2899_v0 = vpop.f32.mrf.mxu3  ;;  %v6387_v9 = vld [vmem:[#allocation14 + $0x224] sm:$0xf]  ;;  %v5890_v1 = vor.u32 %v6427_v22, %v5887_v20  ;;  %v1989_v46 = vsub.f32 0.0, %v6942_v32  ;;  %v6372_v22 = vld [vmem:[#allocation14 + $0x1ac] sm:$0xf] }
 0x208   :  { %3890 = vmatpush.bf16.msra.mxu3 %v5574_v55  ;;  %v5494_v55 = vor.u32 %v6330_v15, %v5493_v5  ;;  %v5730_v17 = vor.u32 %v6387_v9, %v5727_v12  ;;  %v6443_v58 = vld [vmem:[#allocation14 + $0x3e4] sm:$0xf]  ;;  %v6374_v5 = vld [vmem:[#allocation14 + $0x1b4] sm:$0xf0]  ;;  %v6340_v15 = vld [vmem:[#allocation14 + $0xac] sm:$0xf] }
 0x209   :  { %v6957_v10 = vpop.f32.mrf.mxu1  ;;  %v5954_v43 = vor.u32 %v6443_v58, %v5951_v33  ;;  %v6370_v0 = vld [vmem:[#allocation14 + $0x194] sm:$0xf0]  ;;  %v6431_v7 = vld [vmem:[#allocation14 + $0x384] sm:$0xf]  ;;  %v6324_v33 = vld [vmem:[#allocation14 + $0x2c] sm:$0xf] }
 0x20a   :  { %v2872_v54 = vadd.f32 %v6957_v10, %v2859_v49  ;;  %3830 = vmatpush.bf16.msra.mxu2 %v5870_v52  ;;  %v5478_v10 = vor.u32 %v6326_v63, %v5477_v59  ;;  %v5562_v49 = vor.u32 %v6344_v24, %v5559_v39  ;;  %v5919_v52 = vld [vmem:[#allocation14 + $0x3b0] sm:$0xf0]  ;;  %v6467_v63 = vpop.eup %6466  ;;  %v5906_v18 = vor.u32 %v6431_v7, %v5903_v8  ;;  %v6358_v58 = vld [vmem:[#allocation14 + $0x134] sm:$0xf0]  ;;  %v5671_v20 = vld [vmem:[#allocation14 + $0x1b8] sm:$0xf0] }
 0x20b   :  { %v6963_v42 = vpop.f32.mrf.mxu0  ;;  %3868 = vmatpush.bf16.msrb.mxu1 %v5762_v47  ;;  %v5922_v6 = vor.u32 %v6435_v51, %v5919_v52 }
 0x20c   :  { %3891 = vmatpush.bf16.msra.mxu3 %v5558_v13 }
 0x20e   :  { %3831 = vmatpush.bf16.msra.mxu2 %v5854_v11  ;;  %v2000_v11 = vadd.f32 1.0, %v6467_v63  ;;  %v6415_v63 = vld [vmem:[#allocation14 + $0x304] sm:$0xf] }
 0x20f   :  { %3869 = vmatpush.bf16.msrb.mxu1 %v5746_v21  ;;  %v2138_v21 = vperm.slane %v6944_v57, 2 }
 0x210   :  { %3892 = vmatpush.bf16.msra.mxu3 %v5542_v25  ;;  %v5837_v25 = vld [vmem:[#allocation14 + $0x300] sm:$0xf]  ;;  %6468 = vrcp.f32 %v2000_v11  ;;  %v6376_v11 = vld [vmem:[#allocation14 + $0x1cc] sm:$0xf] }
 0x211   :  { %v2873_v31 = vpop.f32.mrf.mxu1  ;;  %v5838_v37 = vor.u32 %v6417_v60, %v5837_v25  ;;  %v5621_v60 = vld [vmem:[#allocation14 + $0x148] sm:$0xf] }
 0x212   :  { %v5685_v31 = vld [vmem:[#allocation14 + $0x1c8] sm:$0xf] }
 0x213   :  { %v2912_v3 = vpop.f32.mrf.mxu0  ;;  %3870 = vmatpush.bf16.msrb.mxu1 %v5730_v17  ;;  %3832 = vmatpush.bf16.msra.mxu2 %v5838_v37  ;;  %v5686_v47 = vor.u32 %v6378_v38, %v5685_v31  ;;  %v5511_v17 = vld [vmem:[#allocation14 + $0x78] sm:$0xf0]  ;;  %v5605_v31 = vld [vmem:[#allocation14 + $0x128] sm:$0xf] }
 0x214   :  { %3893 = vmatpush.bf16.msra.mxu3 %v5526_v34  ;;  %v6336_v3 = vld [vmem:[#allocation14 + $0x8c] sm:$0xf]  ;;  %v5514_v25 = vor.u32 %v6332_v16, %v5511_v17  ;;  %v5479_v38 = vld [vmem:[#allocation14 + $0x38] sm:$0xf0] }
 0x216   :  { %v6469_v39 = vpop.eup %6468 }
 0x217   :  { %3846 = vmatmul.bf16.vlgmr.msrb.gmra.mxu3 %v6954_v35  ;;  %3871 = vmatpush.bf16.msrb.mxu1 %v5714_v28  ;;  %v5871_v28 = vld [vmem:[#allocation14 + $0x350] sm:$0xf0] }
 0x218   :  { %3894 = vmatpush.bf16.msra.mxu3 %v5510_v50  ;;  %v5669_v50 = vld [vmem:[#allocation14 + $0x1a8] sm:$0xf]  ;;  %3877 = vmatpush.bf16.msrb.mxu2 %v5954_v43 }
 0x219   :  { %v5670_v53 = vor.u32 %v6374_v5, %v5669_v50  ;;  %v5482_v50 = vor.u32 %v6324_v33, %v5479_v38  ;;  %v6354_v5 = vld [vmem:[#allocation14 + $0x114] sm:$0xf0] }
 0x21c   :  { %3895 = vmatpush.bf16.msra.mxu3 %v5494_v55  ;;  %v5653_v55 = vld [vmem:[#allocation14 + $0x188] sm:$0xf]  ;;  %3878 = vmatpush.bf16.msrb.mxu2 %v5938_v48 }
 0x21d   :  { %v5654_v12 = vor.u32 %v6370_v0, %v5653_v55  ;;  %v5829_v48 = vld [vmem:[#allocation14 + $0x2e8] sm:$0xf]  ;;  %v5703_v55 = vld [vmem:[#allocation14 + $0x1f8] sm:$0xf0]  ;;  %v5839_v0 = vld [vmem:[#allocation14 + $0x310] sm:$0xf0] }
 0x21e   :  { %v2884_v61 = vpop.f32.mrf.mxu2 }
 0x21f   :  { %v2885_v13 = vadd.f32 %v2884_v61, %v2872_v54  ;;  %v5546_v54 = vor.u32 %v6340_v15, %v5543_v26  ;;  %v6320_v15 = vld [vmem:[#allocation14 + $0xc] sm:$0xf]  ;;  %v5463_v26 = vld [vmem:[#allocation14 + $0x18] sm:$0xf0] }
 0x220   :  { %3896 = vmatpush.bf16.msra.mxu3 %v5478_v10  ;;  %v2898_v10 = vadd.f32 %v6961_v41, %v2138_v21  ;;  %3879 = vmatpush.bf16.msrb.mxu2 %v5922_v6  ;;  %v5495_v41 = vld [vmem:[#allocation14 + $0x58] sm:$0xf0]  ;;  %v6414_v21 = vld [vmem:[#allocation14 + $0x2f4] sm:$0xf0]  ;;  %v1996_v6 = vmul.f32 1.442695, %v1989_v46 }
 0x221   :  { %v2993_v23 = vmax.f32 %v2885_v13, 0.0  ;;  %v5530_v13 = vor.u32 %v6336_v3, %v5527_v4  ;;  %v5466_v4 = vor.u32 %v6320_v15, %v5463_v26 }
 0x222   :  { %v6976_v59 = vpop.f32.mrf.mxu3  ;;  %6470 = vpow2.f32 %v1996_v6 }
 0x223   :  { %v3001_v2 = vmul.f32 %v2997_v62, %v2993_v23  ;;  %v2911_v23 = vadd.f32 %v6963_v42, %v2898_v10  ;;  %v5638_v62 = vor.u32 %v6366_v14, %v5637_v40  ;;  %v5622_v42 = vor.u32 %v6362_v19, %v5621_v60  ;;  %v5813_v40 = vld [vmem:[#allocation14 + $0x2c8] sm:$0xf]  ;;  %v6410_v14 = vld [vmem:[#allocation14 + $0x2d4] sm:$0xf0]  ;;  %v6368_v19 = vld [vmem:[#allocation14 + $0x18c] sm:$0xf] }
 0x224   :  { %3897 = vmatpush.bf16.msra.mxu3 %v5462_v56  ;;  %3880 = vmatpush.bf16.msrb.mxu2 %v5906_v18  ;;  %v6423_v56 = vld [vmem:[#allocation14 + $0x344] sm:$0xf]  ;;  %v5814_v18 = vor.u32 %v6410_v14, %v5813_v40  ;;  %v5674_v60 = vor.u32 %v6372_v22, %v5671_v20  ;;  %v6442_v40 = vld [vmem:[#allocation14 + $0x3d4] sm:$0xf0]  ;;  %v5925_v20 = vld [vmem:[#allocation14 + $0x3a8] sm:$0xf] }
 0x225   :  { %v6969_v34 = vpack.c.bf16 %v3001_v2, %v3001_v2  ;;  %v5874_v24 = vor.u32 %v6423_v56, %v5871_v28 }
 0x226   :  { %v2886_v36 = vpop.f32.mrf.mxu2 }
 0x227   :  { %3807 = vmatmul.bf16.vlgmr.msra.gmra.mxu0 %v6969_v34  ;;  %3898 = vmatmul.bf16.vlgmr.msra.gmra.mxu3 %v6954_v35  ;;  %v6419_v36 = vld [vmem:[#allocation14 + $0x324] sm:$0xf] }
 0x228   :  { %3903 = vmatpush.bf16.msra.mxu0 %v5702_v29  ;;  %3942 = vmatpush.bf16.msrb.mxu3 %v5578_v30  ;;  %v5498_v30 = vor.u32 %v6328_v27, %v5495_v41  ;;  %v5858_v51 = vor.u32 %v6419_v36, %v5855_v45  ;;  %v5655_v27 = vld [vmem:[#allocation14 + $0x198] sm:$0xf0]  ;;  %v6471_v41 = vpop.eup %6470  ;;  %v5749_v36 = vld [vmem:[#allocation14 + $0x248] sm:$0xf] }
 0x229   :  { %v6972_v44 = vpop.f32.mrf.mxu1  ;;  %3881 = vmatpush.bf16.msrb.mxu2 %v5890_v1  ;;  %v5781_v1 = vld [vmem:[#allocation14 + $0x288] sm:$0xf] }
 0x22a   :  { %v2951_v37 = vpop.f32.mrf.mxu3  ;;  %v2924_v29 = vadd.f32 %v6972_v44, %v2911_v23  ;;  %v5589_v44 = vld [vmem:[#allocation14 + $0x108] sm:$0xf] }
 0x22b   :  { %v6978_v9 = vpop.f32.mrf.mxu0  ;;  %v5590_v3 = vor.u32 %v6354_v5, %v5589_v44  ;;  %v5797_v23 = vld [vmem:[#allocation14 + $0x2a8] sm:$0xf] }
 0x22c   :  { %3904 = vmatpush.bf16.msra.mxu0 %v5686_v47  ;;  %3943 = vmatpush.bf16.msrb.mxu3 %v5562_v49  ;;  %v5606_v49 = vor.u32 %v6358_v58, %v5605_v31  ;;  %v5639_v31 = vld [vmem:[#allocation14 + $0x178] sm:$0xf0]  ;;  %v5765_v58 = vld [vmem:[#allocation14 + $0x268] sm:$0xf] }
 0x22d   :  { %3882 = vmatpush.bf16.msrb.mxu2 %v5874_v24  ;;  %v5733_v44 = vld [vmem:[#allocation14 + $0x228] sm:$0xf] }
 0x230   :  { %3905 = vmatpush.bf16.msra.mxu0 %v5670_v53  ;;  %3944 = vmatpush.bf16.msrb.mxu3 %v5546_v54  ;;  %v2998_v53 = vadd.f32 1.0, %v6469_v39  ;;  %v6380_v54 = vld [vmem:[#allocation14 + $0x1ec] sm:$0xf] }
 0x231   :  { %v2925_v61 = vpop.f32.mrf.mxu1  ;;  %v5706_v7 = vor.u32 %v6380_v54, %v5703_v55  ;;  %3883 = vmatpush.bf16.msrb.mxu2 %v5858_v51  ;;  %v6360_v39 = vld [vmem:[#allocation14 + $0x14c] sm:$0xf]  ;;  %v5717_v51 = vld [vmem:[#allocation14 + $0x208] sm:$0xf]  ;;  %v5591_v55 = vld [vmem:[#allocation14 + $0x118] sm:$0xf0] }
 0x232   :  { %v5830_v61 = vor.u32 %v6414_v21, %v5829_v48  ;;  %v6352_v54 = vld [vmem:[#allocation14 + $0x10c] sm:$0xf] }
 0x233   :  { %v2964_v2 = vpop.f32.mrf.mxu0 }
 0x234   :  { %3906 = vmatpush.bf16.msra.mxu0 %v5654_v12  ;;  %3945 = vmatpush.bf16.msrb.mxu3 %v5530_v13  ;;  %v5687_v12 = vld [vmem:[#allocation14 + $0x1d8] sm:$0xf0]  ;;  %v5842_v13 = vor.u32 %v6415_v63, %v5839_v0  ;;  %v6402_v2 = vld [vmem:[#allocation14 + $0x294] sm:$0xf0]  ;;  %v5957_v0 = vld [vmem:[#allocation14 + $0x3e8] sm:$0xf] }
 0x235   :  { %v5690_v17 = vor.u32 %v6376_v11, %v5687_v12 }
 0x236   :  { %3884 = vmatpush.bf16.msrb.mxu2 %v5842_v13 }
 0x237   :  { %3859 = vmatmul.bf16.vlgmr.msrb.gmra.mxu0 %v6969_v34 }
 0x238   :  { %3907 = vmatpush.bf16.msra.mxu0 %v5638_v62  ;;  %3946 = vmatpush.bf16.msrb.mxu3 %v5514_v25  ;;  %v6406_v62 = vld [vmem:[#allocation14 + $0x2b4] sm:$0xf0]  ;;  %v2139_v25 = vperm.slane %v6944_v57, 3 }
 0x239   :  { %v5798_v37 = vor.u32 %v6406_v62, %v5797_v23  ;;  %v6398_v57 = vld [vmem:[#allocation14 + $0x274] sm:$0xf0]  ;;  %v6404_v62 = vld [vmem:[#allocation14 + $0x2ac] sm:$0xf] }
 0x23a   :  { %v2950_v28 = vadd.f32 %v6976_v59, %v2139_v25  ;;  %v5766_v24 = vor.u32 %v6398_v57, %v5765_v58  ;;  %v6394_v59 = vld [vmem:[#allocation14 + $0x254] sm:$0xf0]  ;;  %v5799_v25 = vld [vmem:[#allocation14 + $0x2b8] sm:$0xf0]  ;;  %v6392_v57 = vld [vmem:[#allocation14 + $0x24c] sm:$0xf] }
 0x23b   :  { %v6438_v23 = vld [vmem:[#allocation14 + $0x3b4] sm:$0xf0] }
 0x23c   :  { %3908 = vmatpush.bf16.msra.mxu0 %v5622_v42  ;;  %3947 = vmatpush.bf16.msrb.mxu3 %v5498_v30  ;;  %v5782_v42 = vor.u32 %v6402_v2, %v5781_v1  ;;  %v6364_v30 = vld [vmem:[#allocation14 + $0x16c] sm:$0xf]  ;;  %v2963_v33 = vadd.f32 %v6978_v9, %v2950_v28  ;;  %v6390_v9 = vld [vmem:[#allocation14 + $0x234] sm:$0xf0]  ;;  %v5783_v1 = vld [vmem:[#allocation14 + $0x298] sm:$0xf0] }
 0x23d   :  { %v5642_v38 = vor.u32 %v6364_v30, %v5639_v31  ;;  %v5893_v28 = vld [vmem:[#allocation14 + $0x368] sm:$0xf]  ;;  %v6426_v58 = vld [vmem:[#allocation14 + $0x354] sm:$0xf0] }
 0x23e   :  { %v2936_v43 = vpop.f32.mrf.mxu2  ;;  %v5877_v31 = vld [vmem:[#allocation14 + $0x348] sm:$0xf] }
 0x23f   :  { %v2937_v47 = vadd.f32 %v2936_v43, %v2924_v29  ;;  %v2001_v29 = vadd.f32 1.0, %v6471_v41  ;;  %v5623_v43 = vld [vmem:[#allocation14 + $0x158] sm:$0xf0]  ;;  %v6400_v41 = vld [vmem:[#allocation14 + $0x28c] sm:$0xf] }
 0x240   :  { %3909 = vmatpush.bf16.msra.mxu0 %v5606_v49  ;;  %3948 = vmatpush.bf16.msrb.mxu3 %v5482_v50  ;;  %v5626_v46 = vor.u32 %v6360_v39, %v5623_v43  ;;  %v6356_v49 = vld [vmem:[#allocation14 + $0x12c] sm:$0xf]  ;;  %v5607_v50 = vld [vmem:[#allocation14 + $0x138] sm:$0xf0]  ;;  %v5861_v39 = vld [vmem:[#allocation14 + $0x328] sm:$0xf] }
 0x241   :  { %v2994_v52 = vmax.f32 %v2937_v47, 0.0  ;;  %6472 = vrcp.f32 %v2001_v29  ;;  %v5750_v47 = vor.u32 %v6394_v59, %v5749_v36  ;;  %v5610_v48 = vor.u32 %v6356_v49, %v5607_v50  ;;  %v6396_v29 = vld [vmem:[#allocation14 + $0x26c] sm:$0xf]  ;;  %v6422_v43 = vld [vmem:[#allocation14 + $0x334] sm:$0xf0] }
 0x242   :  { %v6388_v36 = vld [vmem:[#allocation14 + $0x22c] sm:$0xf]  ;;  %v5735_v59 = vld [vmem:[#allocation14 + $0x238] sm:$0xf0]  ;;  %v6418_v49 = vld [vmem:[#allocation14 + $0x314] sm:$0xf0] }
 0x243   :  { %v3002_v32 = vmul.f32 %v2998_v53, %v2994_v52  ;;  %v5734_v52 = vor.u32 %v6390_v9, %v5733_v44  ;;  %v6386_v53 = vld [vmem:[#allocation14 + $0x214] sm:$0xf0]  ;;  %v6384_v50 = vld [vmem:[#allocation14 + $0x20c] sm:$0xf]  ;;  %v5719_v44 = vld [vmem:[#allocation14 + $0x218] sm:$0xf0] }
 0x244   :  { %3910 = vmatpush.bf16.msra.mxu0 %v5590_v3  ;;  %3949 = vmatpush.bf16.msrb.mxu3 %v5466_v4  ;;  %v6412_v3 = vld [vmem:[#allocation14 + $0x2ec] sm:$0xf]  ;;  %v5831_v4 = vld [vmem:[#allocation14 + $0x2f8] sm:$0xf0] }
 0x245   :  { %v6985_v8 = vpack.c.bf16 %v3002_v32, %v3002_v32  ;;  %v6446_v32 = vld [vmem:[#allocation14 + $0x3f4] sm:$0xf0]  ;;  %v5834_v13 = vor.u32 %v6412_v3, %v5831_v4  ;;  %v6444_v9 = vld [vmem:[#allocation14 + $0x3ec] sm:$0xf]  ;;  %v5895_v4 = vld [vmem:[#allocation14 + $0x378] sm:$0xf0] }
 0x246   :  { %v2938_v10 = vpop.f32.mrf.mxu2  ;;  %v5958_v11 = vor.u32 %v6446_v32, %v5957_v0  ;;  %v5911_v0 = vld [vmem:[#allocation14 + $0x398] sm:$0xf0]  ;;  %v6428_v3 = vld [vmem:[#allocation14 + $0x36c] sm:$0xf] }
 0x247   :  { %3820 = vmatmul.bf16.vlgmr.msra.gmra.mxu1 %v6985_v8  ;;  %3950 = vmatmul.bf16.vlgmr.msrb.gmra.mxu3 %v6954_v35  ;;  %v5658_v35 = vor.u32 %v6368_v19, %v5655_v27  ;;  %v6473_v5 = vpop.eup %6472  ;;  %v5941_v10 = vld [vmem:[#allocation14 + $0x3c8] sm:$0xf]  ;;  %v6434_v27 = vld [vmem:[#allocation14 + $0x394] sm:$0xf0] }
 0x248   :  { %3955 = vmatpush.bf16.msrb.mxu0 %v5706_v7  ;;  %3916 = vmatpush.bf16.msra.mxu1 %v5830_v61  ;;  %v2999_v63 = vadd.f32 1.0, %v6473_v5  ;;  %v5594_v7 = vor.u32 %v6352_v54, %v5591_v55  ;;  %v5718_v61 = vor.u32 %v6386_v53, %v5717_v51  ;;  %v5909_v19 = vld [vmem:[#allocation14 + $0x388] sm:$0xf]  ;;  %v5959_v5 = vld [vmem:[#allocation14 + $0x3f8] sm:$0xf0] }
 0x249   :  { %v2975_v16 = vpop.f32.mrf.mxu1  ;;  %3911 = vmatmul.bf16.vlgmr.msra.gmra.mxu0 %v6969_v34  ;;  %v5910_v2 = vor.u32 %v6434_v27, %v5909_v19  ;;  %v6440_v51 = vld [vmem:[#allocation14 + $0x3cc] sm:$0xf]  ;;  %v5927_v55 = vld [vmem:[#allocation14 + $0x3b8] sm:$0xf0] }
 0x24a   :  { %v2976_v45 = vadd.f32 %v2975_v16, %v2963_v33  ;;  %v6408_v16 = vld [vmem:[#allocation14 + $0x2cc] sm:$0xf]  ;;  %v5751_v33 = vld [vmem:[#allocation14 + $0x258] sm:$0xf0] }
 0x24b   :  { %v6436_v54 = vld [vmem:[#allocation14 + $0x3ac] sm:$0xf] }
 0x24c   :  { %3956 = vmatpush.bf16.msrb.mxu0 %v5690_v17  ;;  %3917 = vmatpush.bf16.msra.mxu1 %v5814_v18  ;;  %v5815_v17 = vld [vmem:[#allocation14 + $0x2d8] sm:$0xf0]  ;;  %v5942_v18 = vor.u32 %v6442_v40, %v5941_v10  ;;  %v6420_v10 = vld [vmem:[#allocation14 + $0x32c] sm:$0xf] }
 0x24d   :  { %v5818_v22 = vor.u32 %v6408_v16, %v5815_v17  ;;  %v5863_v40 = vld [vmem:[#allocation14 + $0x338] sm:$0xf0] }
 0x24e   :  { %v5847_v16 = vld [vmem:[#allocation14 + $0x318] sm:$0xf0] }
 0x250   :  { %3957 = vmatpush.bf16.msrb.mxu0 %v5674_v60  ;;  %3918 = vmatpush.bf16.msra.mxu1 %v5798_v37  ;;  %v5926_v60 = vor.u32 %v6438_v23, %v5925_v20  ;;  %v5802_v37 = vor.u32 %v6404_v62, %v5799_v25 }
 0x251   :  { %v2977_v56 = vpop.f32.mrf.mxu1 }
 0x252   :  { %v5786_v56 = vor.u32 %v6400_v41, %v5783_v1 }
 0x254   :  { %3958 = vmatpush.bf16.msrb.mxu0 %v5658_v35  ;;  %3919 = vmatpush.bf16.msra.mxu1 %v5782_v42  ;;  %v6430_v35 = vld [vmem:[#allocation14 + $0x374] sm:$0xf0] }
 0x255   :  { %v5894_v42 = vor.u32 %v6430_v35, %v5893_v28 }
 0x257   :  { %3872 = vmatmul.bf16.vlgmr.msrb.gmra.mxu1 %v6985_v8 }
 0x258   :  { %3959 = vmatpush.bf16.msrb.mxu0 %v5642_v38  ;;  %3920 = vmatpush.bf16.msra.mxu1 %v5766_v24  ;;  %v5878_v38 = vor.u32 %v6426_v58, %v5877_v31  ;;  %v5754_v24 = vor.u32 %v6392_v57, %v5751_v33 }
 0x25c   :  { %3960 = vmatpush.bf16.msrb.mxu0 %v5626_v46  ;;  %3921 = vmatpush.bf16.msra.mxu1 %v5750_v47  ;;  %v5738_v46 = vor.u32 %v6388_v36, %v5735_v59  ;;  %v5845_v47 = vld [vmem:[#allocation14 + $0x308] sm:$0xf] }
 0x25e   :  { %v2988_v15 = vpop.f32.mrf.mxu2 }
 0x25f   :  { %v2989_v26 = vadd.f32 %v2988_v15, %v2976_v45  ;;  %v5862_v45 = vor.u32 %v6422_v43, %v5861_v39  ;;  %v5846_v15 = vor.u32 %v6418_v49, %v5845_v47 }
 0x260   :  { %3961 = vmatpush.bf16.msrb.mxu0 %v5610_v48  ;;  %3922 = vmatpush.bf16.msra.mxu1 %v5734_v52  ;;  %v5962_v48 = vor.u32 %v6444_v9, %v5959_v5  ;;  %v5943_v52 = vld [vmem:[#allocation14 + $0x3d8] sm:$0xf0] }
 0x261   :  { %v2995_v21 = vmax.f32 %v2989_v26, 0.0  ;;  %v5722_v26 = vor.u32 %v6384_v50, %v5719_v44  ;;  %v5946_v53 = vor.u32 %v6440_v51, %v5943_v52 }
 0x263   :  { %v3003_v6 = vmul.f32 %v2999_v63, %v2995_v21  ;;  %v5930_v21 = vor.u32 %v6436_v54, %v5927_v55  ;;  %v6432_v63 = vld [vmem:[#allocation14 + $0x38c] sm:$0xf] }
 0x264   :  { %3962 = vmatpush.bf16.msrb.mxu0 %v5594_v7  ;;  %3923 = vmatpush.bf16.msra.mxu1 %v5718_v61  ;;  %v5914_v32 = vor.u32 %v6432_v63, %v5911_v0  ;;  %v6424_v7 = vld [vmem:[#allocation14 + $0x34c] sm:$0xf]  ;;  %v5879_v61 = vld [vmem:[#allocation14 + $0x358] sm:$0xf0] }
 0x265   :  { %v6994_v12 = vpack.c.bf16 %v3003_v6, %v3003_v6  ;;  %v5898_v6 = vor.u32 %v6428_v3, %v5895_v4 }
 0x266   :  { %v2990_v14 = vpop.f32.mrf.mxu2 }
 0x267   :  { %3833 = vmatmul.bf16.vlgmr.msra.gmra.mxu2 %v6994_v12  ;;  %3963 = vmatmul.bf16.vlgmr.msrb.gmra.mxu0 %v6969_v34  ;;  %v5767_v34 = vld [vmem:[#allocation14 + $0x278] sm:$0xf0]  ;;  %v5866_v14 = vor.u32 %v6420_v10, %v5863_v40 }
 0x268   :  { %3929 = vmatpush.bf16.msra.mxu2 %v5958_v11  ;;  %3968 = vmatpush.bf16.msrb.mxu1 %v5834_v13  ;;  %v5770_v30 = vor.u32 %v6396_v29, %v5767_v34  ;;  %v5882_v13 = vor.u32 %v6424_v7, %v5879_v61  ;;  %v3136_v29 = vld [vmem:[%s7018_s9] sm:$0xf]  ;;  %s6712_s9 = smov [#allocation16]  }
 0x269   :  { %3924 = vmatmul.bf16.vlgmr.msra.gmra.mxu1 %v6985_v8  ;;  %v3139_v36 = vperm.slane %v3136_v29, 1  ;;  %v3140_v9 = vperm.slane %v3136_v29, 2  ;;  %v3141_v63 = vperm.slane %v3136_v29, 3  ;;  %s4007_s29 = sshll.u32 %s6712_s9, 4  ;;  %s4008_s29 = int_to_ptr.vmem [resolvable:$true] %s4007_s29 }
 0x26c   :  { %3930 = vmatpush.bf16.msra.mxu2 %v5942_v18  ;;  %3969 = vmatpush.bf16.msrb.mxu1 %v5818_v22 }
 0x270   :  { %3931 = vmatpush.bf16.msra.mxu2 %v5926_v60  ;;  %3970 = vmatpush.bf16.msrb.mxu1 %v5802_v37 }
 0x274   :  { %3932 = vmatpush.bf16.msra.mxu2 %v5910_v2  ;;  %3971 = vmatpush.bf16.msrb.mxu1 %v5786_v56 }
 0x277   :  { %3885 = vmatmul.bf16.vlgmr.msrb.gmra.mxu2 %v6994_v12 }
 0x278   :  { %3933 = vmatpush.bf16.msra.mxu2 %v5894_v42  ;;  %3972 = vmatpush.bf16.msrb.mxu1 %v5770_v30 }
 0x27c   :  { %3934 = vmatpush.bf16.msra.mxu2 %v5878_v38  ;;  %3973 = vmatpush.bf16.msrb.mxu1 %v5754_v24 }
 0x280   :  { %3935 = vmatpush.bf16.msra.mxu2 %v5862_v45  ;;  %3974 = vmatpush.bf16.msrb.mxu1 %v5738_v46 }
 0x284   :  { %3936 = vmatpush.bf16.msra.mxu2 %v5846_v15  ;;  %3975 = vmatpush.bf16.msrb.mxu1 %v5722_v26 }
 0x287   :  { %3937 = vmatmul.bf16.vlgmr.msra.gmra.mxu2 %v6994_v12  ;;  %3976 = vmatmul.bf16.vlgmr.msrb.gmra.mxu1 %v6985_v8  ;;  %v6416_v8 = vld [vmem:[#allocation14 + $0x30c] sm:$0xf] }
 0x288   :  { %3981 = vmatpush.bf16.msrb.mxu2 %v5962_v48  ;;  %v5850_v18 = vor.u32 %v6416_v8, %v5847_v16 }
 0x28a   :  { %v3795_v11 = vpop.f32.mrf.mxu3 }
 0x28c   :  { %3982 = vmatpush.bf16.msrb.mxu2 %v5946_v53 }
 0x290   :  { %3983 = vmatpush.bf16.msrb.mxu2 %v5930_v21 }
 0x292   :  { %v3797_v17 = vpop.f32.mrf.mxu3 }
 0x294   :  { %3984 = vmatpush.bf16.msrb.mxu2 %v5914_v32 }
 0x298   :  { %3985 = vmatpush.bf16.msrb.mxu2 %v5898_v6 }
 0x29a   :  { %v3847_v22 = vpop.f32.mrf.mxu3 }
 0x29b   :  { %v3848_v45 = vadd.f32 %v3847_v22, %v3139_v36 }
 0x29c   :  { %3986 = vmatpush.bf16.msrb.mxu2 %v5882_v13 }
 0x2a0   :  { %3987 = vmatpush.bf16.msrb.mxu2 %v5866_v14 }
 0x2a2   :  { %v3849_v23 = vpop.f32.mrf.mxu3 }
 0x2a4   :  { %3988 = vmatpush.bf16.msrb.mxu2 %v5850_v18  ;;  %v3808_v20 = vpop.f32.mrf.mxu0 }
 0x2a7   :  { %3989 = vmatmul.bf16.vlgmr.msrb.gmra.mxu2 %v6994_v12  ;;  %v3138_v12 = vperm.slane %v3136_v29, 0 }
 0x2a9   :  { %v3796_v42 = vadd.f32 %v3795_v11, %v3138_v12 }
 0x2aa   :  { %v3899_v25 = vpop.f32.mrf.mxu3 }
 0x2ab   :  { %v3809_v30 = vadd.f32 %v3808_v20, %v3796_v42  ;;  %v3900_v15 = vadd.f32 %v3899_v25, %v3140_v9 }
 0x2ac   :  { %v3810_v62 = vpop.f32.mrf.mxu0 }
 0x2b2   :  { %v3901_v37 = vpop.f32.mrf.mxu3 }
 0x2b4   :  { %v3860_v60 = vpop.f32.mrf.mxu0 }
 0x2b5   :  { %v3861_v46 = vadd.f32 %v3860_v60, %v3848_v45 }
 0x2bc   :  { %v3862_v19 = vpop.f32.mrf.mxu0 }
 0x2c4   :  { %v3821_v27 = vpop.f32.mrf.mxu1 }
 0x2c5   :  { %v3822_v57 = vadd.f32 %v3821_v27, %v3809_v30 }
 0x2c6   :  { %v3912_v41 = vpop.f32.mrf.mxu0 }
 0x2c7   :  { %v3913_v48 = vadd.f32 %v3912_v41, %v3900_v15 }
 0x2ca   :  { %v3951_v2 = vpop.f32.mrf.mxu3 }
 0x2cb   :  { %v3952_v0 = vadd.f32 %v3951_v2, %v3141_v63 }
 0x2cc   :  { %v3823_v1 = vpop.f32.mrf.mxu1 }
 0x2ce   :  { %v3914_v56 = vpop.f32.mrf.mxu0 }
 0x2d2   :  { %v3953_v35 = vpop.f32.mrf.mxu3 }
 0x2d4   :  { %v3873_v28 = vpop.f32.mrf.mxu1 }
 0x2d5   :  { %v3874_v47 = vadd.f32 %v3873_v28, %v3861_v46 }
 0x2dc   :  { %v3875_v34 = vpop.f32.mrf.mxu1 }
 0x2e4   :  { %v3964_v31 = vpop.f32.mrf.mxu0 }
 0x2e5   :  { %v3965_v32 = vadd.f32 %v3964_v31, %v3952_v0 }
 0x2e6   :  { %v3925_v58 = vpop.f32.mrf.mxu1 }
 0x2e7   :  { %v3926_v51 = vadd.f32 %v3925_v58, %v3913_v48 }
 0x2ea   :  { %v3834_v33 = vpop.f32.mrf.mxu2 }
 0x2eb   :  { %v3835_v38 = vadd.f32 %v3834_v33, %v3822_v57 }
 0x2ec   :  { %v3966_v39 = vpop.f32.mrf.mxu0 }
 0x2ed   :  { %v3994_v24 = vmax.f32 %v3835_v38, 0.0 }
 0x2ee   :  { %v3927_v43 = vpop.f32.mrf.mxu1 }
 0x2ef   :  { %3998 = vst [vmem:[#allocation16] sm:$0xff] %v3994_v24 }
 0x2f2   :  { %v3836_v59 = vpop.f32.mrf.mxu2 }
 0x2fa   :  { %v3886_v49 = vpop.f32.mrf.mxu2 }
 0x2fb   :  { %v3887_v50 = vadd.f32 %v3886_v49, %v3874_v47 }
 0x2fd   :  { %v3995_v44 = vmax.f32 %v3887_v50, 0.0 }
 0x2ff   :  { %3999 = vst [vmem:[#allocation16 + $0x8] sm:$0xff] %v3995_v44 }
 0x302   :  { %v3888_v5 = vpop.f32.mrf.mxu2 }
 0x304   :  { %v3977_v26 = vpop.f32.mrf.mxu1 }
 0x305   :  { %v3978_v3 = vadd.f32 %v3977_v26, %v3965_v32 }
 0x30a   :  { %v3938_v52 = vpop.f32.mrf.mxu2 }
 0x30b   :  { %v3939_v53 = vadd.f32 %v3938_v52, %v3926_v51 }
 0x30c   :  { %v3979_v55 = vpop.f32.mrf.mxu1 }
 0x30d   :  { %v3996_v54 = vmax.f32 %v3939_v53, 0.0 }
 0x30f   :  { %4000 = vst [vmem:[#allocation16 + $0x10] sm:$0xff] %v3996_v54 }
 0x312   :  { %v3940_v21 = vpop.f32.mrf.mxu2 }
 0x32a   :  { %v3990_v4 = vpop.f32.mrf.mxu2 }
 0x32b   :  { %v3991_v6 = vadd.f32 %v3990_v4, %v3978_v3 }
 0x32d   :  { %v3997_v7 = vmax.f32 %v3991_v6, 0.0 }
 0x32f   :  { %4001 = vst [vmem:[#allocation16 + $0x18] sm:$0xff] %v3997_v7 }
 0x330   :  { %4012 = dma.vmem_to_hbm [thread:$0]  %s4008_s29, 512, %s4010_s11, [#allocation4]  }
 0x332   :  { %v3992_v61 = vpop.f32.mrf.mxu2 }
 0x333   :  { %6700 = dma.done.wait [#allocation4], 512  }
 0x334   :  { %6701 = vsyncadd [#allocation4], 4294966784 }
 0x335   :  { %4017 = vsyncpa [#allocation3], 1 }
 0x336   :  { %4018 = vsyncpa [#allocation6], 1 }
 0x337   :  { %4019 = vsyncpa [#allocation9], 1 }
 0x338   :  { %4020 = vsyncpa [#allocation12], 1 }
 0x339   :  { %4021 = vsyncpa [#allocation15], 1 }
 0x33a   :  { %4022 = vsyncpa [#allocation4], 1 }

</bundles_post_ra>
